<compile_context>
chip_gen: v7x
topology: tpu7x:2x2x1
jax: 0.10.0
libtpu: 0.0.40
codegen_flags: <defaults>
</compile_context>

<pallas_src>
import jax
import jax.numpy as jnp
from jax.experimental import pallas as pl
from jax.experimental.pallas import tpu as pltpu

LAYER_DIMS = [
    (6, 200), (200, 200), (200, 200), (200, 400), (400, 800),
    (800, 800), (800, 800), (800, 400), (400, 200), (200, 30),
]
IN_DIM = LAYER_DIMS[0][0]     # 6
OUT_DIM = LAYER_DIMS[-1][1]   # 30
IN_PAD = 128                  # lane-aligned padded input width
OUT_PAD = 128                 # lane-aligned padded output width


def _round_up(n, m):
    return ((n + m - 1) // m) * m


def decoder_kernel(x_ref, *refs):
    """All 10 linear layers + ReLUs fused for one batch tile.

    refs = (w1, b1, w2, b2, ..., w10, b10, out_ref).
    Weights are bf16 (pre-transposed to (in, out)), biases f32 (1, out),
    accumulation in f32 on the MXU.
    """
    out_ref = refs[-1]
    params = refs[:-1]
    n_layers = len(params) // 2

    h = x_ref[...].astype(jnp.bfloat16)              # (bb, 128) padded input
    for li in range(n_layers):
        w = params[2 * li][...]                      # bf16 (K, N)
        b = params[2 * li + 1][...]                  # f32  (1, N)
        acc = jnp.dot(h, w, preferred_element_type=jnp.float32) + b
        if li < n_layers - 1:
            h = jnp.maximum(acc, 0.0).astype(jnp.bfloat16)   # ReLU -> bf16 for next MXU pass
        else:
            h = acc                                  # last layer: no ReLU, keep f32
    out_ref[...] = h.astype(out_ref.dtype)


def _prepare_params(params):
    """Zero-pad layer-0 rows 6->128 and final-layer cols 30->128; cast W to bf16."""
    prepped = []
    last = len(params) - 1
    for li, (w, b) in enumerate(params):
        fan_in, fan_out = w.shape
        if li == 0:
            w = jnp.pad(w, ((0, IN_PAD - fan_in), (0, 0)))
        if li == last:
            w = jnp.pad(w, ((0, 0), (0, OUT_PAD - fan_out)))
            b = jnp.pad(b, ((0, 0), (0, OUT_PAD - fan_out)))
        prepped.append((w.astype(jnp.bfloat16), b.astype(jnp.float32)))
    return prepped


def decoder_forward(x, params, *, block_batch=256):
    """x: (B, 6) f32 -> (B, 30) f32.

    The batch is padded to a multiple of the batch tile and tiled by the grid;
    weights/biases are full (untiled), single-buffered blocks reused every step.
    """
    B, in_dim = x.shape
    assert in_dim == IN_DIM

    # Fill the MXU M dim; for tiny batches run a single grid step instead of
    # padding all the way up to block_batch.
    bb = min(block_batch, _round_up(max(B, 8), 8))
    Bp = _round_up(B, bb)

    # Lane-dense, zero-padded input (B, 6) -> (Bp, 128).
    xp = jnp.pad(x.astype(jnp.float32), ((0, Bp - B), (0, IN_PAD - in_dim)))

    prepped = _prepare_params(params)

    in_specs = [pl.BlockSpec((bb, IN_PAD), lambda i: (i, 0))]
    flat_params = []
    for (w, b) in prepped:
        flat_params.append(w)
        flat_params.append(b)
        # Same block every grid step -> single-buffer to halve weight VMEM.
        in_specs.append(
            pl.BlockSpec(w.shape, lambda i: (0, 0), pipeline_mode=pl.Buffered(1)))
        in_specs.append(
            pl.BlockSpec(b.shape, lambda i: (0, 0), pipeline_mode=pl.Buffered(1)))

    out = pl.pallas_call(
        decoder_kernel,
        out_shape=jax.ShapeDtypeStruct((Bp, OUT_PAD), jnp.float32),
        grid=(Bp // bb,),
        in_specs=in_specs,
        out_specs=pl.BlockSpec((bb, OUT_PAD), lambda i: (i, 0)),
        compiler_params=pltpu.CompilerParams(
            dimension_semantics=("parallel",),
            vmem_limit_bytes=48 * 1024 * 1024),
    )(xp, *flat_params)

    return out[:B, :OUT_DIM]


def init_params(key):
    """Deterministic init mimicking nn.Linear's U(-1/sqrt(fan_in), 1/sqrt(fan_in))."""
    params = []
    for (fan_in, fan_out) in LAYER_DIMS:
        key, kw, kb = jax.random.split(key, 3)
        bound = 1.0 / (fan_in ** 0.5)
        w = jax.random.uniform(kw, (fan_in, fan_out), jnp.float32, -bound, bound)
        b = jax.random.uniform(kb, (1, fan_out), jnp.float32, -bound, bound)
        params.append((w, b))
    return params


def ref_forward(x, params):
    """Plain-JAX reference mirroring the kernel's bf16-weight / f32-accum math."""
    h = x.astype(jnp.float32)
    for i, (w, b) in enumerate(params):
        h = jnp.dot(h.astype(jnp.bfloat16), w.astype(jnp.bfloat16),
                    preferred_element_type=jnp.float32) + b
        if i < len(params) - 1:
            h = jnp.maximum(h, 0.0)
    return h


if __name__ == "__main__":
    key = jax.random.PRNGKey(0)
    key, kx = jax.random.split(key)

    B = 16                                  # small batch -> single grid step
    x = jax.random.normal(kx, (B, IN_DIM), jnp.float32)
    params = init_params(key)

    out = decoder_forward(x, params)
    out = jax.block_until_ready(out)

    expected = ref_forward(x, params)
    assert out.shape == (B, OUT_DIM)
    assert jnp.allclose(out, expected, atol=1e-2, rtol=1e-2), "mismatch vs reference"

    print("KERNEL_OK")
</pallas_src>

<mosaic_0001>
module attributes {stable_mosaic.version = 11 : i64} {
  func.func @decoder_kernel(%arg0: i32, %arg1: memref<16x128xf32, #tpu.memory_space<vmem>>, %arg2: memref<128x200xbf16, #tpu.memory_space<vmem>>, %arg3: memref<1x200xf32, #tpu.memory_space<vmem>>, %arg4: memref<200x200xbf16, #tpu.memory_space<vmem>>, %arg5: memref<1x200xf32, #tpu.memory_space<vmem>>, %arg6: memref<200x200xbf16, #tpu.memory_space<vmem>>, %arg7: memref<1x200xf32, #tpu.memory_space<vmem>>, %arg8: memref<200x400xbf16, #tpu.memory_space<vmem>>, %arg9: memref<1x400xf32, #tpu.memory_space<vmem>>, %arg10: memref<400x800xbf16, #tpu.memory_space<vmem>>, %arg11: memref<1x800xf32, #tpu.memory_space<vmem>>, %arg12: memref<800x800xbf16, #tpu.memory_space<vmem>>, %arg13: memref<1x800xf32, #tpu.memory_space<vmem>>, %arg14: memref<800x800xbf16, #tpu.memory_space<vmem>>, %arg15: memref<1x800xf32, #tpu.memory_space<vmem>>, %arg16: memref<800x400xbf16, #tpu.memory_space<vmem>>, %arg17: memref<1x400xf32, #tpu.memory_space<vmem>>, %arg18: memref<400x200xbf16, #tpu.memory_space<vmem>>, %arg19: memref<1x200xf32, #tpu.memory_space<vmem>>, %arg20: memref<200x128xbf16, #tpu.memory_space<vmem>>, %arg21: memref<1x128xf32, #tpu.memory_space<vmem>>, %arg22: memref<16x128xf32, #tpu.memory_space<vmem>>) attributes {dimension_semantics = [#tpu.dimension_semantics<parallel>], iteration_bounds = array<i64: 1>, scalar_prefetch = 0 : i64, scratch_operands = 0 : i64, tpu.core_type = #tpu.core_type<tc>, window_params = [{transform_indices = @transform_0, window_bounds = array<i64: 16, 128>}, {pipeline_mode = #tpu.pipeline_mode<synchronous>, transform_indices = @transform_1, window_bounds = array<i64: 128, 200>}, {pipeline_mode = #tpu.pipeline_mode<synchronous>, transform_indices = @transform_2, window_bounds = array<i64: 1, 200>}, {pipeline_mode = #tpu.pipeline_mode<synchronous>, transform_indices = @transform_3, window_bounds = array<i64: 200, 200>}, {pipeline_mode = #tpu.pipeline_mode<synchronous>, transform_indices = @transform_4, window_bounds = array<i64: 1, 200>}, {pipeline_mode = #tpu.pipeline_mode<synchronous>, transform_indices = @transform_5, window_bounds = array<i64: 200, 200>}, {pipeline_mode = #tpu.pipeline_mode<synchronous>, transform_indices = @transform_6, window_bounds = array<i64: 1, 200>}, {pipeline_mode = #tpu.pipeline_mode<synchronous>, transform_indices = @transform_7, window_bounds = array<i64: 200, 400>}, {pipeline_mode = #tpu.pipeline_mode<synchronous>, transform_indices = @transform_8, window_bounds = array<i64: 1, 400>}, {pipeline_mode = #tpu.pipeline_mode<synchronous>, transform_indices = @transform_9, window_bounds = array<i64: 400, 800>}, {pipeline_mode = #tpu.pipeline_mode<synchronous>, transform_indices = @transform_10, window_bounds = array<i64: 1, 800>}, {pipeline_mode = #tpu.pipeline_mode<synchronous>, transform_indices = @transform_11, window_bounds = array<i64: 800, 800>}, {pipeline_mode = #tpu.pipeline_mode<synchronous>, transform_indices = @transform_12, window_bounds = array<i64: 1, 800>}, {pipeline_mode = #tpu.pipeline_mode<synchronous>, transform_indices = @transform_13, window_bounds = array<i64: 800, 800>}, {pipeline_mode = #tpu.pipeline_mode<synchronous>, transform_indices = @transform_14, window_bounds = array<i64: 1, 800>}, {pipeline_mode = #tpu.pipeline_mode<synchronous>, transform_indices = @transform_15, window_bounds = array<i64: 800, 400>}, {pipeline_mode = #tpu.pipeline_mode<synchronous>, transform_indices = @transform_16, window_bounds = array<i64: 1, 400>}, {pipeline_mode = #tpu.pipeline_mode<synchronous>, transform_indices = @transform_17, window_bounds = array<i64: 400, 200>}, {pipeline_mode = #tpu.pipeline_mode<synchronous>, transform_indices = @transform_18, window_bounds = array<i64: 1, 200>}, {pipeline_mode = #tpu.pipeline_mode<synchronous>, transform_indices = @transform_19, window_bounds = array<i64: 200, 128>}, {pipeline_mode = #tpu.pipeline_mode<synchronous>, transform_indices = @transform_20, window_bounds = array<i64: 1, 128>}, {transform_indices = @transform_21, window_bounds = array<i64: 16, 128>}]} {
    %c0 = arith.constant 0 : index
    %c0_0 = arith.constant 0 : index
    %0 = vector.load %arg1[%c0, %c0_0] : memref<16x128xf32, #tpu.memory_space<vmem>>, vector<16x128xf32>
    %1 = arith.truncf %0 : vector<16x128xf32> to vector<16x128xbf16>
    %c0_1 = arith.constant 0 : index
    %c0_2 = arith.constant 0 : index
    %2 = vector.load %arg2[%c0_1, %c0_2] : memref<128x200xbf16, #tpu.memory_space<vmem>>, vector<128x200xbf16>
    %c0_3 = arith.constant 0 : index
    %c0_4 = arith.constant 0 : index
    %3 = vector.load %arg3[%c0_3, %c0_4] : memref<1x200xf32, #tpu.memory_space<vmem>>, vector<1x200xf32>
    %cst = arith.constant dense<0.000000e+00> : vector<16x200xf32>
    %4 = tpu.matmul %1, %2, %cst {dimension_numbers = #tpu.dot_dimension_numbers<[1], [0], [0], [1], [0, 0, 1, 1], [], []>} : vector<16x128xbf16>, vector<128x200xbf16>, vector<16x200xf32> -> vector<16x200xf32>
    %5 = vector.broadcast %3 : vector<1x200xf32> to vector<16x200xf32>
    %6 = arith.addf %4, %5 : vector<16x200xf32>
    %cst_5 = arith.constant 0.000000e+00 : f32
    %7 = vector.broadcast %cst_5 : f32 to vector<16x200xf32>
    %8 = arith.maximumf %6, %7 : vector<16x200xf32>
    %9 = arith.truncf %8 : vector<16x200xf32> to vector<16x200xbf16>
    %c0_6 = arith.constant 0 : index
    %c0_7 = arith.constant 0 : index
    %10 = vector.load %arg4[%c0_6, %c0_7] : memref<200x200xbf16, #tpu.memory_space<vmem>>, vector<200x200xbf16>
    %c0_8 = arith.constant 0 : index
    %c0_9 = arith.constant 0 : index
    %11 = vector.load %arg5[%c0_8, %c0_9] : memref<1x200xf32, #tpu.memory_space<vmem>>, vector<1x200xf32>
    %cst_10 = arith.constant dense<0.000000e+00> : vector<16x200xf32>
    %12 = tpu.matmul %9, %10, %cst_10 {dimension_numbers = #tpu.dot_dimension_numbers<[1], [0], [0], [1], [0, 0, 1, 1], [], []>} : vector<16x200xbf16>, vector<200x200xbf16>, vector<16x200xf32> -> vector<16x200xf32>
    %13 = vector.broadcast %11 : vector<1x200xf32> to vector<16x200xf32>
    %14 = arith.addf %12, %13 : vector<16x200xf32>
    %cst_11 = arith.constant 0.000000e+00 : f32
    %15 = vector.broadcast %cst_11 : f32 to vector<16x200xf32>
    %16 = arith.maximumf %14, %15 : vector<16x200xf32>
    %17 = arith.truncf %16 : vector<16x200xf32> to vector<16x200xbf16>
    %c0_12 = arith.constant 0 : index
    %c0_13 = arith.constant 0 : index
    %18 = vector.load %arg6[%c0_12, %c0_13] : memref<200x200xbf16, #tpu.memory_space<vmem>>, vector<200x200xbf16>
    %c0_14 = arith.constant 0 : index
    %c0_15 = arith.constant 0 : index
    %19 = vector.load %arg7[%c0_14, %c0_15] : memref<1x200xf32, #tpu.memory_space<vmem>>, vector<1x200xf32>
    %cst_16 = arith.constant dense<0.000000e+00> : vector<16x200xf32>
    %20 = tpu.matmul %17, %18, %cst_16 {dimension_numbers = #tpu.dot_dimension_numbers<[1], [0], [0], [1], [0, 0, 1, 1], [], []>} : vector<16x200xbf16>, vector<200x200xbf16>, vector<16x200xf32> -> vector<16x200xf32>
    %21 = vector.broadcast %19 : vector<1x200xf32> to vector<16x200xf32>
    %22 = arith.addf %20, %21 : vector<16x200xf32>
    %cst_17 = arith.constant 0.000000e+00 : f32
    %23 = vector.broadcast %cst_17 : f32 to vector<16x200xf32>
    %24 = arith.maximumf %22, %23 : vector<16x200xf32>
    %25 = arith.truncf %24 : vector<16x200xf32> to vector<16x200xbf16>
    %c0_18 = arith.constant 0 : index
    %c0_19 = arith.constant 0 : index
    %26 = vector.load %arg8[%c0_18, %c0_19] : memref<200x400xbf16, #tpu.memory_space<vmem>>, vector<200x400xbf16>
    %c0_20 = arith.constant 0 : index
    %c0_21 = arith.constant 0 : index
    %27 = vector.load %arg9[%c0_20, %c0_21] : memref<1x400xf32, #tpu.memory_space<vmem>>, vector<1x400xf32>
    %cst_22 = arith.constant dense<0.000000e+00> : vector<16x400xf32>
    %28 = tpu.matmul %25, %26, %cst_22 {dimension_numbers = #tpu.dot_dimension_numbers<[1], [0], [0], [1], [0, 0, 1, 1], [], []>} : vector<16x200xbf16>, vector<200x400xbf16>, vector<16x400xf32> -> vector<16x400xf32>
    %29 = vector.broadcast %27 : vector<1x400xf32> to vector<16x400xf32>
    %30 = arith.addf %28, %29 : vector<16x400xf32>
    %cst_23 = arith.constant 0.000000e+00 : f32
    %31 = vector.broadcast %cst_23 : f32 to vector<16x400xf32>
    %32 = arith.maximumf %30, %31 : vector<16x400xf32>
    %33 = arith.truncf %32 : vector<16x400xf32> to vector<16x400xbf16>
    %c0_24 = arith.constant 0 : index
    %c0_25 = arith.constant 0 : index
    %34 = vector.load %arg10[%c0_24, %c0_25] : memref<400x800xbf16, #tpu.memory_space<vmem>>, vector<400x800xbf16>
    %c0_26 = arith.constant 0 : index
    %c0_27 = arith.constant 0 : index
    %35 = vector.load %arg11[%c0_26, %c0_27] : memref<1x800xf32, #tpu.memory_space<vmem>>, vector<1x800xf32>
    %cst_28 = arith.constant dense<0.000000e+00> : vector<16x800xf32>
    %36 = tpu.matmul %33, %34, %cst_28 {dimension_numbers = #tpu.dot_dimension_numbers<[1], [0], [0], [1], [0, 0, 1, 1], [], []>} : vector<16x400xbf16>, vector<400x800xbf16>, vector<16x800xf32> -> vector<16x800xf32>
    %37 = vector.broadcast %35 : vector<1x800xf32> to vector<16x800xf32>
    %38 = arith.addf %36, %37 : vector<16x800xf32>
    %cst_29 = arith.constant 0.000000e+00 : f32
    %39 = vector.broadcast %cst_29 : f32 to vector<16x800xf32>
    %40 = arith.maximumf %38, %39 : vector<16x800xf32>
    %41 = arith.truncf %40 : vector<16x800xf32> to vector<16x800xbf16>
    %c0_30 = arith.constant 0 : index
    %c0_31 = arith.constant 0 : index
    %42 = vector.load %arg12[%c0_30, %c0_31] : memref<800x800xbf16, #tpu.memory_space<vmem>>, vector<800x800xbf16>
    %c0_32 = arith.constant 0 : index
    %c0_33 = arith.constant 0 : index
    %43 = vector.load %arg13[%c0_32, %c0_33] : memref<1x800xf32, #tpu.memory_space<vmem>>, vector<1x800xf32>
    %cst_34 = arith.constant dense<0.000000e+00> : vector<16x800xf32>
    %44 = tpu.matmul %41, %42, %cst_34 {dimension_numbers = #tpu.dot_dimension_numbers<[1], [0], [0], [1], [0, 0, 1, 1], [], []>} : vector<16x800xbf16>, vector<800x800xbf16>, vector<16x800xf32> -> vector<16x800xf32>
    %45 = vector.broadcast %43 : vector<1x800xf32> to vector<16x800xf32>
    %46 = arith.addf %44, %45 : vector<16x800xf32>
    %cst_35 = arith.constant 0.000000e+00 : f32
    %47 = vector.broadcast %cst_35 : f32 to vector<16x800xf32>
    %48 = arith.maximumf %46, %47 : vector<16x800xf32>
    %49 = arith.truncf %48 : vector<16x800xf32> to vector<16x800xbf16>
    %c0_36 = arith.constant 0 : index
    %c0_37 = arith.constant 0 : index
    %50 = vector.load %arg14[%c0_36, %c0_37] : memref<800x800xbf16, #tpu.memory_space<vmem>>, vector<800x800xbf16>
    %c0_38 = arith.constant 0 : index
    %c0_39 = arith.constant 0 : index
    %51 = vector.load %arg15[%c0_38, %c0_39] : memref<1x800xf32, #tpu.memory_space<vmem>>, vector<1x800xf32>
    %cst_40 = arith.constant dense<0.000000e+00> : vector<16x800xf32>
    %52 = tpu.matmul %49, %50, %cst_40 {dimension_numbers = #tpu.dot_dimension_numbers<[1], [0], [0], [1], [0, 0, 1, 1], [], []>} : vector<16x800xbf16>, vector<800x800xbf16>, vector<16x800xf32> -> vector<16x800xf32>
    %53 = vector.broadcast %51 : vector<1x800xf32> to vector<16x800xf32>
    %54 = arith.addf %52, %53 : vector<16x800xf32>
    %cst_41 = arith.constant 0.000000e+00 : f32
    %55 = vector.broadcast %cst_41 : f32 to vector<16x800xf32>
    %56 = arith.maximumf %54, %55 : vector<16x800xf32>
    %57 = arith.truncf %56 : vector<16x800xf32> to vector<16x800xbf16>
    %c0_42 = arith.constant 0 : index
    %c0_43 = arith.constant 0 : index
    %58 = vector.load %arg16[%c0_42, %c0_43] : memref<800x400xbf16, #tpu.memory_space<vmem>>, vector<800x400xbf16>
    %c0_44 = arith.constant 0 : index
    %c0_45 = arith.constant 0 : index
    %59 = vector.load %arg17[%c0_44, %c0_45] : memref<1x400xf32, #tpu.memory_space<vmem>>, vector<1x400xf32>
    %cst_46 = arith.constant dense<0.000000e+00> : vector<16x400xf32>
    %60 = tpu.matmul %57, %58, %cst_46 {dimension_numbers = #tpu.dot_dimension_numbers<[1], [0], [0], [1], [0, 0, 1, 1], [], []>} : vector<16x800xbf16>, vector<800x400xbf16>, vector<16x400xf32> -> vector<16x400xf32>
    %61 = vector.broadcast %59 : vector<1x400xf32> to vector<16x400xf32>
    %62 = arith.addf %60, %61 : vector<16x400xf32>
    %cst_47 = arith.constant 0.000000e+00 : f32
    %63 = vector.broadcast %cst_47 : f32 to vector<16x400xf32>
    %64 = arith.maximumf %62, %63 : vector<16x400xf32>
    %65 = arith.truncf %64 : vector<16x400xf32> to vector<16x400xbf16>
    %c0_48 = arith.constant 0 : index
    %c0_49 = arith.constant 0 : index
    %66 = vector.load %arg18[%c0_48, %c0_49] : memref<400x200xbf16, #tpu.memory_space<vmem>>, vector<400x200xbf16>
    %c0_50 = arith.constant 0 : index
    %c0_51 = arith.constant 0 : index
    %67 = vector.load %arg19[%c0_50, %c0_51] : memref<1x200xf32, #tpu.memory_space<vmem>>, vector<1x200xf32>
    %cst_52 = arith.constant dense<0.000000e+00> : vector<16x200xf32>
    %68 = tpu.matmul %65, %66, %cst_52 {dimension_numbers = #tpu.dot_dimension_numbers<[1], [0], [0], [1], [0, 0, 1, 1], [], []>} : vector<16x400xbf16>, vector<400x200xbf16>, vector<16x200xf32> -> vector<16x200xf32>
    %69 = vector.broadcast %67 : vector<1x200xf32> to vector<16x200xf32>
    %70 = arith.addf %68, %69 : vector<16x200xf32>
    %cst_53 = arith.constant 0.000000e+00 : f32
    %71 = vector.broadcast %cst_53 : f32 to vector<16x200xf32>
    %72 = arith.maximumf %70, %71 : vector<16x200xf32>
    %73 = arith.truncf %72 : vector<16x200xf32> to vector<16x200xbf16>
    %c0_54 = arith.constant 0 : index
    %c0_55 = arith.constant 0 : index
    %74 = vector.load %arg20[%c0_54, %c0_55] : memref<200x128xbf16, #tpu.memory_space<vmem>>, vector<200x128xbf16>
    %c0_56 = arith.constant 0 : index
    %c0_57 = arith.constant 0 : index
    %75 = vector.load %arg21[%c0_56, %c0_57] : memref<1x128xf32, #tpu.memory_space<vmem>>, vector<1x128xf32>
    %cst_58 = arith.constant dense<0.000000e+00> : vector<16x128xf32>
    %76 = tpu.matmul %73, %74, %cst_58 {dimension_numbers = #tpu.dot_dimension_numbers<[1], [0], [0], [1], [0, 0, 1, 1], [], []>} : vector<16x200xbf16>, vector<200x128xbf16>, vector<16x128xf32> -> vector<16x128xf32>
    %77 = vector.broadcast %75 : vector<1x128xf32> to vector<16x128xf32>
    %78 = arith.addf %76, %77 : vector<16x128xf32>
    %c0_59 = arith.constant 0 : index
    %c0_60 = arith.constant 0 : index
    %79 = vector.load %arg22[%c0_59, %c0_60] : memref<16x128xf32, #tpu.memory_space<vmem>>, vector<16x128xf32>
    tpu.vector_store %arg22[%c0_59, %c0_60], %78 {strides = array<i32>} : memref<16x128xf32, #tpu.memory_space<vmem>>, vector<16x128xf32>,
    return
  }
  func.func @transform_0(%arg0: i32) -> (i32, i32) {
    %c0_i32 = arith.constant 0 : i32
    %c0_i32_0 = arith.constant 0 : i32
    return %arg0, %c0_i32 : i32, i32
  }
  func.func @transform_1(%arg0: i32) -> (i32, i32) {
    %c0_i32 = arith.constant 0 : i32
    %c0_i32_0 = arith.constant 0 : i32
    %c0_i32_1 = arith.constant 0 : i32
    return %c0_i32, %c0_i32_0 : i32, i32
  }
  func.func @transform_2(%arg0: i32) -> (i32, i32) {
    %c0_i32 = arith.constant 0 : i32
    %c0_i32_0 = arith.constant 0 : i32
    %c0_i32_1 = arith.constant 0 : i32
    return %c0_i32, %c0_i32_0 : i32, i32
  }
  func.func @transform_3(%arg0: i32) -> (i32, i32) {
    %c0_i32 = arith.constant 0 : i32
    %c0_i32_0 = arith.constant 0 : i32
    %c0_i32_1 = arith.constant 0 : i32
    return %c0_i32, %c0_i32_0 : i32, i32
  }
  func.func @transform_4(%arg0: i32) -> (i32, i32) {
    %c0_i32 = arith.constant 0 : i32
    %c0_i32_0 = arith.constant 0 : i32
    %c0_i32_1 = arith.constant 0 : i32
    return %c0_i32, %c0_i32_0 : i32, i32
  }
  func.func @transform_5(%arg0: i32) -> (i32, i32) {
    %c0_i32 = arith.constant 0 : i32
    %c0_i32_0 = arith.constant 0 : i32
    %c0_i32_1 = arith.constant 0 : i32
    return %c0_i32, %c0_i32_0 : i32, i32
  }
  func.func @transform_6(%arg0: i32) -> (i32, i32) {
    %c0_i32 = arith.constant 0 : i32
    %c0_i32_0 = arith.constant 0 : i32
    %c0_i32_1 = arith.constant 0 : i32
    return %c0_i32, %c0_i32_0 : i32, i32
  }
  func.func @transform_7(%arg0: i32) -> (i32, i32) {
    %c0_i32 = arith.constant 0 : i32
    %c0_i32_0 = arith.constant 0 : i32
    %c0_i32_1 = arith.constant 0 : i32
    return %c0_i32, %c0_i32_0 : i32, i32
  }
  func.func @transform_8(%arg0: i32) -> (i32, i32) {
    %c0_i32 = arith.constant 0 : i32
    %c0_i32_0 = arith.constant 0 : i32
    %c0_i32_1 = arith.constant 0 : i32
    return %c0_i32, %c0_i32_0 : i32, i32
  }
  func.func @transform_9(%arg0: i32) -> (i32, i32) {
    %c0_i32 = arith.constant 0 : i32
    %c0_i32_0 = arith.constant 0 : i32
    %c0_i32_1 = arith.constant 0 : i32
    return %c0_i32, %c0_i32_0 : i32, i32
  }
  func.func @transform_10(%arg0: i32) -> (i32, i32) {
    %c0_i32 = arith.constant 0 : i32
    %c0_i32_0 = arith.constant 0 : i32
    %c0_i32_1 = arith.constant 0 : i32
    return %c0_i32, %c0_i32_0 : i32, i32
  }
  func.func @transform_11(%arg0: i32) -> (i32, i32) {
    %c0_i32 = arith.constant 0 : i32
    %c0_i32_0 = arith.constant 0 : i32
    %c0_i32_1 = arith.constant 0 : i32
    return %c0_i32, %c0_i32_0 : i32, i32
  }
  func.func @transform_12(%arg0: i32) -> (i32, i32) {
    %c0_i32 = arith.constant 0 : i32
    %c0_i32_0 = arith.constant 0 : i32
    %c0_i32_1 = arith.constant 0 : i32
    return %c0_i32, %c0_i32_0 : i32, i32
  }
  func.func @transform_13(%arg0: i32) -> (i32, i32) {
    %c0_i32 = arith.constant 0 : i32
    %c0_i32_0 = arith.constant 0 : i32
    %c0_i32_1 = arith.constant 0 : i32
    return %c0_i32, %c0_i32_0 : i32, i32
  }
  func.func @transform_14(%arg0: i32) -> (i32, i32) {
    %c0_i32 = arith.constant 0 : i32
    %c0_i32_0 = arith.constant 0 : i32
    %c0_i32_1 = arith.constant 0 : i32
    return %c0_i32, %c0_i32_0 : i32, i32
  }
  func.func @transform_15(%arg0: i32) -> (i32, i32) {
    %c0_i32 = arith.constant 0 : i32
    %c0_i32_0 = arith.constant 0 : i32
    %c0_i32_1 = arith.constant 0 : i32
    return %c0_i32, %c0_i32_0 : i32, i32
  }
  func.func @transform_16(%arg0: i32) -> (i32, i32) {
    %c0_i32 = arith.constant 0 : i32
    %c0_i32_0 = arith.constant 0 : i32
    %c0_i32_1 = arith.constant 0 : i32
    return %c0_i32, %c0_i32_0 : i32, i32
  }
  func.func @transform_17(%arg0: i32) -> (i32, i32) {
    %c0_i32 = arith.constant 0 : i32
    %c0_i32_0 = arith.constant 0 : i32
    %c0_i32_1 = arith.constant 0 : i32
    return %c0_i32, %c0_i32_0 : i32, i32
  }
  func.func @transform_18(%arg0: i32) -> (i32, i32) {
    %c0_i32 = arith.constant 0 : i32
    %c0_i32_0 = arith.constant 0 : i32
    %c0_i32_1 = arith.constant 0 : i32
    return %c0_i32, %c0_i32_0 : i32, i32
  }
  func.func @transform_19(%arg0: i32) -> (i32, i32) {
    %c0_i32 = arith.constant 0 : i32
    %c0_i32_0 = arith.constant 0 : i32
    %c0_i32_1 = arith.constant 0 : i32
    return %c0_i32, %c0_i32_0 : i32, i32
  }
  func.func @transform_20(%arg0: i32) -> (i32, i32) {
    %c0_i32 = arith.constant 0 : i32
    %c0_i32_0 = arith.constant 0 : i32
    %c0_i32_1 = arith.constant 0 : i32
    return %c0_i32, %c0_i32_0 : i32, i32
  }
  func.func @transform_21(%arg0: i32) -> (i32, i32) {
    %c0_i32 = arith.constant 0 : i32
    %c0_i32_0 = arith.constant 0 : i32
    return %arg0, %c0_i32 : i32, i32
  }
}

</mosaic_0001>

<bundles_post_ra>
// kernel: tpu_custom_call.1
= control target key start
LH: loop header
LB: loop body
LE: loop exit
PB: predicated region body
PF: predicated region fallthrough
CT: control target
= control target key end

     0   :  { %s16772_s0 = inlined_call_operand.vmem [shape: f32[16,128], index: 0, kind: input, shape index: {}]   ;;  %s16773_s1 = inlined_call_operand.vmem [shape: bf16[128,200], index: 1, kind: input, shape index: {}]   ;;  %s16774_s2 = inlined_call_operand.vmem [shape: f32[1,200], index: 2, kind: input, shape index: {}]   ;;  %s16775_s3 = inlined_call_operand.hbm [shape: bf16[200,200], index: 3, kind: input, shape index: {}]   ;;  %s16776_s4 = inlined_call_operand.vmem [shape: f32[1,200], index: 4, kind: input, shape index: {}]   ;;  %s16777_s5 = inlined_call_operand.hbm [shape: bf16[200,200], index: 5, kind: input, shape index: {}]   ;;  %s16778_s6 = inlined_call_operand.vmem [shape: f32[1,200], index: 6, kind: input, shape index: {}]   ;;  %s16779_s7 = inlined_call_operand.vmem [shape: bf16[200,400], index: 7, kind: input, shape index: {}]   ;;  %s16780_s8 = inlined_call_operand.vmem [shape: f32[1,400], index: 8, kind: input, shape index: {}]   ;;  %s16781_s9 = inlined_call_operand.hbm [shape: bf16[400,800], index: 9, kind: input, shape index: {}]   ;;  %s16782_s10 = inlined_call_operand.vmem [shape: f32[1,800], index: 10, kind: input, shape index: {}]   ;;  %s16783_s11 = inlined_call_operand.vmem [shape: bf16[800,800], index: 11, kind: input, shape index: {}]   ;;  %s16784_s12 = inlined_call_operand.vmem [shape: f32[1,800], index: 12, kind: input, shape index: {}]   ;;  %s16785_s13 = inlined_call_operand.hbm [shape: bf16[800,800], index: 13, kind: input, shape index: {}]   ;;  %s16786_s14 = inlined_call_operand.vmem [shape: f32[1,800], index: 14, kind: input, shape index: {}]   ;;  %s16787_s15 = inlined_call_operand.vmem [shape: bf16[800,400], index: 15, kind: input, shape index: {}]   ;;  %s16788_s16 = inlined_call_operand.vmem [shape: f32[1,400], index: 16, kind: input, shape index: {}]   ;;  %s16789_s17 = inlined_call_operand.hbm [shape: bf16[400,200], index: 17, kind: input, shape index: {}]   ;;  %s16790_s18 = inlined_call_operand.vmem [shape: f32[1,200], index: 18, kind: input, shape index: {}]   ;;  %s16791_s19 = inlined_call_operand.hbm [shape: bf16[200,128], index: 19, kind: input, shape index: {}]   ;;  %s16792_s20 = inlined_call_operand.vmem [shape: f32[1,128], index: 20, kind: input, shape index: {}]   ;;  %s16793_s21 = inlined_call_operand.hbm [shape: f32[16,128], index: 21, kind: output, shape index: {}]  }
   0x1   :  { %16800 = sst [smem:[#allocation19_spill]] %s16772_s0 }
   0x2   :  { %16801 = sst [smem:[#allocation20_spill]] %s16773_s1 }
   0x3   :  { %16802 = sst [smem:[#allocation21_spill]] %s16774_s2 }
   0x4   :  { %16803 = sst [smem:[#allocation22_spill]] %s16775_s3 }
   0x5   :  { %16804 = sst [smem:[#allocation23_spill]] %s16776_s4 }
   0x6   :  { %16805 = sst [smem:[#allocation24_spill]] %s16777_s5 }
   0x7   :  { %16806 = sst [smem:[#allocation25_spill]] %s16792_s20 }
   0x8   :  { %16807 = sst [smem:[#allocation26_spill]] %s16793_s21 }
   0x9   :  { %26 = vsyncpa [#allocation3], 0 }
   0xa   :  { %27 = vsyncpa [#allocation6], 0 }
   0xb   :  { %28 = vsyncpa [#allocation9], 0 }
   0xc   :  { %29 = vsyncpa [#allocation12], 0 }
   0xd   :  { %30 = vsyncpa [#allocation4], 0  ;;  %s14351_s2 = smov [#allocation5]   ;;  %s16808_s3 = sld [smem:[#allocation24_spill]] }
   0xe   :  { %s56_s25 = sshll.u32 %s14351_s2, 4  ;;  %s57_s25 = int_to_ptr.vmem [resolvable:$true] %s56_s25 }
  0x13   :  { %s14187_s28 = scalar_lea.hbm %s16808_s3, 3200 }
  0x14   :  { %p14188_p0 = scmp.ne.s32.totalorder %s16808_s3, %s14187_s28  ;;  %p14191_p1 = scmp.lt.u32.totalorder %s14187_s28, %s16808_s3 }
  0x16   :  { %p14193_p2 = pnand %p14191_p1, %p14188_p0 }
  0x18   :  { %14196 = shalt.err (!%p14193_p2)
}
  0x19   :  { %s14197_s5 = scalar_lea.vmem %s57_s25, 3200  ;;  %p14202_p4 = scmp.lt.s32.totalorder %s57_s25, %s57_s25 }
  0x1a   :  { %p14198_p3 = scmp.ne.s32.totalorder %s57_s25, %s14197_s5  ;;  %p14203_p5 = scmp.lt.s32.totalorder %s14197_s5, %s14197_s5 }
  0x1c   :  { %p14204_p6 = por %p14203_p5, %p14202_p4 }
  0x1e   :  { %p14205_p7 = pnand %p14204_p6, %p14198_p3 }
  0x20   :  { %14208 = shalt.err (!%p14205_p7)
}
  0x21   :  { %s14352_s22 = smov 128   ;;  %s14353_s23 = smov 8  }
  0x22   :  { %62 = dma.hbm_to_vmem [thread:$0]  %s16808_s3, 3200, %s57_s25, [#allocation6], %s14352_s22, %s14352_s22, %s14353_s23  }
  0x23   :  { %s14354_s2 = smov [#allocation8]   ;;  %s14355_s27 = smov [#allocation2]  }
  0x24   :  { %s92_s26 = sshll.u32 %s14354_s2, 4  ;;  %s42_s28 = sshll.u32 %s14355_s27, 4  ;;  %s93_s26 = int_to_ptr.vmem [resolvable:$true] %s92_s26  ;;  %s43_s28 = int_to_ptr.vmem [resolvable:$true] %s42_s28 }
  0x25   :  { %s14209_s4 = scalar_lea.hbm %s16785_s13, 44800 }
  0x26   :  { %p14210_p8 = scmp.ne.s32.totalorder %s16785_s13, %s14209_s4  ;;  %p14213_p9 = scmp.lt.u32.totalorder %s14209_s4, %s16785_s13 }
  0x28   :  { %p14215_p10 = pnand %p14213_p9, %p14210_p8 }
  0x2a   :  { %14218 = shalt.err (!%p14215_p10)
}
  0x2b   :  { %s14219_s25 = scalar_lea.vmem %s93_s26, 44800  ;;  %p14224_p12 = scmp.lt.s32.totalorder %s93_s26, %s93_s26 }
  0x2c   :  { %p14220_p11 = scmp.ne.s32.totalorder %s93_s26, %s14219_s25  ;;  %p14225_p13 = scmp.lt.s32.totalorder %s14219_s25, %s14219_s25 }
  0x2e   :  { %p14226_p0 = por %p14225_p13, %p14224_p12 }
  0x30   :  { %p14227_p1 = pnand %p14226_p0, %p14220_p11 }
  0x32   :  { %14230 = shalt.err (!%p14227_p1)
}
  0x33   :  { %s16799_s3 = smov 448   ;;  %s14357_s1 = smov 28  }
  0x34   :  { %98 = dma.hbm_to_vmem [thread:$0]  %s16785_s13, 44800, %s93_s26, [#allocation9], %s16799_s3, %s16799_s3, %s14357_s1  }
  0x35   :  { %s16809_s27 = sld [smem:[#allocation22_spill]] }
  0x3b   :  { %s14231_s29 = scalar_lea.hbm %s16809_s27, 3200 }
  0x3c   :  { %p14232_p2 = scmp.ne.s32.totalorder %s16809_s27, %s14231_s29  ;;  %p14235_p3 = scmp.lt.u32.totalorder %s14231_s29, %s16809_s27 }
  0x3e   :  { %p14237_p4 = pnand %p14235_p3, %p14232_p2 }
  0x40   :  { %14240 = shalt.err (!%p14237_p4)
}
  0x41   :  { %s14241_s25 = scalar_lea.vmem %s43_s28, 3200  ;;  %p14246_p6 = scmp.lt.s32.totalorder %s43_s28, %s43_s28 }
  0x42   :  { %p14242_p5 = scmp.ne.s32.totalorder %s43_s28, %s14241_s25  ;;  %p14247_p7 = scmp.lt.s32.totalorder %s14241_s25, %s14241_s25 }
  0x44   :  { %p14248_p8 = por %p14247_p7, %p14246_p6 }
  0x46   :  { %p14249_p9 = pnand %p14248_p8, %p14242_p5 }
  0x48   :  { %14252 = shalt.err (!%p14249_p9)
}
  0x49   :  { %48 = dma.hbm_to_vmem [thread:$0]  %s16809_s27, 3200, %s43_s28, [#allocation3], %s14352_s22, %s14352_s22, %s14353_s23  }
  0x4a   :  { %s14358_s24 = smov [#allocation7]   ;;  %s14359_s20 = smov [#allocation10]  }
  0x4b   :  { %s74_s2 = sshll.u32 %s14358_s24, 4  ;;  %s110_s21 = sshll.u32 %s14359_s20, 4  ;;  %s75_s2 = int_to_ptr.vmem [resolvable:$true] %s74_s2  ;;  %s111_s21 = int_to_ptr.vmem [resolvable:$true] %s110_s21 }
  0x4c   :  { %s14253_s4 = scalar_lea.hbm %s16781_s9, 22400 }
  0x4d   :  { %p14254_p10 = scmp.ne.s32.totalorder %s16781_s9, %s14253_s4  ;;  %p14257_p11 = scmp.lt.u32.totalorder %s14253_s4, %s16781_s9 }
  0x4f   :  { %p14259_p12 = pnand %p14257_p11, %p14254_p10 }
  0x51   :  { %14262 = shalt.err (!%p14259_p12)
}
  0x52   :  { %s14263_s28 = scalar_lea.vmem %s75_s2, 22400  ;;  %p14268_p0 = scmp.lt.s32.totalorder %s75_s2, %s75_s2 }
  0x53   :  { %p14264_p13 = scmp.ne.s32.totalorder %s75_s2, %s14263_s28  ;;  %p14269_p1 = scmp.lt.s32.totalorder %s14263_s28, %s14263_s28 }
  0x55   :  { %p14270_p2 = por %p14269_p1, %p14268_p0 }
  0x57   :  { %p14271_p3 = pnand %p14270_p2, %p14264_p13 }
  0x59   :  { %14274 = shalt.err (!%p14271_p3)
}
  0x5a   :  { %s16810_s27 = smov 448   ;;  %s14275_s20 = scalar_lea.hbm %s16789_s17, 6400 }
  0x5b   :  { %80 = dma.hbm_to_vmem [thread:$0]  %s16781_s9, 22400, %s75_s2, [#allocation6], %s16810_s27, %s16810_s27, %s14357_s1  }
  0x5c   :  { %p14276_p4 = scmp.ne.s32.totalorder %s16789_s17, %s14275_s20  ;;  %p14279_p5 = scmp.lt.u32.totalorder %s14275_s20, %s16789_s17 }
  0x5e   :  { %p14281_p6 = pnand %p14279_p5, %p14276_p4 }
  0x60   :  { %14284 = shalt.err (!%p14281_p6)
}
  0x61   :  { %s14285_s5 = scalar_lea.vmem %s111_s21, 6400  ;;  %p14290_p8 = scmp.lt.s32.totalorder %s111_s21, %s111_s21 }
  0x62   :  { %p14286_p7 = scmp.ne.s32.totalorder %s111_s21, %s14285_s5  ;;  %p14291_p9 = scmp.lt.s32.totalorder %s14285_s5, %s14285_s5 }
  0x64   :  { %p14292_p10 = por %p14291_p9, %p14290_p8 }
  0x66   :  { %p14293_p11 = pnand %p14292_p10, %p14286_p7 }
  0x68   :  { %14296 = shalt.err (!%p14293_p11)
}
  0x69   :  { %116 = dma.hbm_to_vmem [thread:$0]  %s16789_s17, 6400, %s111_s21, [#allocation9], %s14352_s22, %s14352_s22, %s14353_s23  }
  0x6a   :  { %s14360_s2 = smov [#allocation11]   ;;  %s14297_s13 = scalar_lea.hbm %s16791_s19, 1600 }
  0x6b   :  { %s124_s25 = sshll.u32 %s14360_s2, 4  ;;  %p14298_p12 = scmp.ne.s32.totalorder %s16791_s19, %s14297_s13  ;;  %s125_s25 = int_to_ptr.vmem [resolvable:$true] %s124_s25 }
  0x6c   :  { %p14301_p13 = scmp.lt.u32.totalorder %s14297_s13, %s16791_s19 }
  0x6e   :  { %p14303_p0 = pnand %p14301_p13, %p14298_p12 }
  0x70   :  { %14306 = shalt.err (!%p14303_p0)
}
  0x71   :  { %s14307_s29 = scalar_lea.vmem %s125_s25, 1600  ;;  %p14312_p2 = scmp.lt.s32.totalorder %s125_s25, %s125_s25 }
  0x72   :  { %p14308_p1 = scmp.ne.s32.totalorder %s125_s25, %s14307_s29  ;;  %p14313_p3 = scmp.lt.s32.totalorder %s14307_s29, %s14307_s29 }
  0x74   :  { %p14314_p4 = por %p14313_p3, %p14312_p2 }
  0x76   :  { %p14315_p5 = pnand %p14314_p4, %p14308_p1 }
  0x78   :  { %14318 = shalt.err (!%p14315_p5)
}
  0x79   :  { %s14361_s17 = smov 64   ;;  %s14362_s21 = smov 4  }
  0x7a   :  { %130 = dma.hbm_to_vmem [thread:$0]  %s16791_s19, 1600, %s125_s25, [#allocation12], %s14361_s17, %s14361_s17, %s14362_s21  }
  0x7b   :  { %14341 = dma.done.wait [#allocation3], 3200  }
  0x7c   :  { %14342 = vsyncadd [#allocation3], 4294964096 }
  0x7d   :  { %14343 = dma.done.wait [#allocation6], 25600  }
  0x7e   :  { %14344 = vsyncadd [#allocation6], 4294941696 }
  0x7f   :  { %14345 = dma.done.wait [#allocation9], 51200  }
  0x80   :  { %14346 = vsyncadd [#allocation9], 4294916096 }
  0x81   :  { %14347 = dma.done.wait [#allocation12], 1600  }
  0x82   :  { %14348 = vsyncadd [#allocation12], 4294965696  ;;  %v14363_v0 = vmov 0   ;;  %s16811_s9 = sld [smem:[#allocation20_spill]]  ;;  %s16812_s0 = sld [smem:[#allocation19_spill]]  ;;  %v336_v44 = vld [vmem:[#allocation2 + $0xc0] sm:$0xff] }
  0x83   :  { %295 = vmatprep.mubr.bf16.mxu1 %v14363_v0  ;;  %v12399_v19 = vld [vmem:[#allocation2 + $0x4] ss:$8 sps:$4 sm:$0xff]   ;;  %v12397_v20 = vld [vmem:[#allocation2] ss:$8 sps:$4 sm:$0xff]   ;;  %v12402_v22 = vld [vmem:[#allocation2 + $0x14] ss:$8 sps:$4 sm:$0xff]   ;;  %v10779_v45 = vcombine.high %v336_v44, %v336_v44  ;;  %v10778_v46 = vcombine.low %v336_v44, %v336_v44 }
  0x84   :  { %v12400_v23 = vld [vmem:[#allocation2 + $0x10] ss:$8 sps:$4 sm:$0xff]   ;;  %v12405_v24 = vld [vmem:[#allocation2 + $0x24] ss:$8 sps:$4 sm:$0xff]   ;;  %v12403_v25 = vld [vmem:[#allocation2 + $0x20] ss:$8 sps:$4 sm:$0xff]  }
  0x85   :  { %v12408_v26 = vld [vmem:[#allocation2 + $0x34] ss:$8 sps:$4 sm:$0xff]   ;;  %v12406_v27 = vld [vmem:[#allocation2 + $0x30] ss:$8 sps:$4 sm:$0xff]   ;;  %v12411_v28 = vld [vmem:[#allocation2 + $0x44] ss:$8 sps:$4 sm:$0xff]  }
  0x86   :  { %v12409_v29 = vld [vmem:[#allocation2 + $0x40] ss:$8 sps:$4 sm:$0xff]   ;;  %v12414_v30 = vld [vmem:[#allocation2 + $0x54] ss:$8 sps:$4 sm:$0xff]   ;;  %v12412_v31 = vld [vmem:[#allocation2 + $0x50] ss:$8 sps:$4 sm:$0xff]  }
  0x87   :  { %v12417_v32 = vld [vmem:[#allocation2 + $0x64] ss:$8 sps:$4 sm:$0xff]   ;;  %v12415_v33 = vld [vmem:[#allocation2 + $0x60] ss:$8 sps:$4 sm:$0xff]   ;;  %v12420_v34 = vld [vmem:[#allocation2 + $0x74] ss:$8 sps:$4 sm:$0xff]  }
  0x88   :  { %v12373_v1 = vld [vmem:[%s16811_s9 + $0x4] ss:$8 sps:$4 sm:$0xff]   ;;  %v12375_v2 = vld [vmem:[%s16811_s9] ss:$8 sps:$4 sm:$0xff]   ;;  %v12376_v3 = vld [vmem:[%s16811_s9 + $0x14] ss:$8 sps:$4 sm:$0xff]  }
  0x89   :  { %263 = vmatprep.subr.bf16.mxu1 %v12373_v1  ;;  %v12378_v4 = vld [vmem:[%s16811_s9 + $0x10] ss:$8 sps:$4 sm:$0xff]   ;;  %v12379_v5 = vld [vmem:[%s16811_s9 + $0x24] ss:$8 sps:$4 sm:$0xff]   ;;  %v12381_v6 = vld [vmem:[%s16811_s9 + $0x20] ss:$8 sps:$4 sm:$0xff]  }
  0x8a   :  { %264 = vmatpush1.bf16.msra.mxu1 %v12375_v2  ;;  %v12382_v7 = vld [vmem:[%s16811_s9 + $0x34] ss:$8 sps:$4 sm:$0xff]   ;;  %v12384_v8 = vld [vmem:[%s16811_s9 + $0x30] ss:$8 sps:$4 sm:$0xff]   ;;  %v12385_v9 = vld [vmem:[%s16811_s9 + $0x44] ss:$8 sps:$4 sm:$0xff]  }
  0x8b   :  { %265 = vmatprep.subr.bf16.mxu1 %v12376_v3  ;;  %v12387_v10 = vld [vmem:[%s16811_s9 + $0x40] ss:$8 sps:$4 sm:$0xff]   ;;  %v12388_v11 = vld [vmem:[%s16811_s9 + $0x54] ss:$8 sps:$4 sm:$0xff]   ;;  %v12390_v12 = vld [vmem:[%s16811_s9 + $0x50] ss:$8 sps:$4 sm:$0xff]  }
  0x8c   :  { %v12391_v13 = vld [vmem:[%s16811_s9 + $0x64] ss:$8 sps:$4 sm:$0xff]   ;;  %v12393_v14 = vld [vmem:[%s16811_s9 + $0x60] ss:$8 sps:$4 sm:$0xff]   ;;  %v12394_v15 = vld [vmem:[%s16811_s9 + $0x74] ss:$8 sps:$4 sm:$0xff]  }
  0x8d   :  { %v12396_v16 = vld [vmem:[%s16811_s9 + $0x70] ss:$8 sps:$4 sm:$0xff]   ;;  %v152_v17 = vld [vmem:[%s16812_s0] sm:$0xff]  ;;  %v153_v18 = vld [vmem:[%s16812_s0 + $0x8] sm:$0xff]  ;;  %vm478_vm0 = vcmask 1043456   ;;  %s16813_s1 = sld [smem:[#allocation21_spill]] }
  0x8e   :  { %266 = vmatpush1.bf16.msra.mxu1 %v12378_v4  ;;  %v154_v21 = vpack.c.bf16 %v153_v18, %v152_v17  ;;  %v12418_v35 = vld [vmem:[#allocation2 + $0x70] ss:$8 sps:$4 sm:$0xff]   ;;  %v12423_v36 = vld [vmem:[#allocation2 + $0x84] ss:$8 sps:$4 sm:$0xff]   ;;  %v12421_v37 = vld [vmem:[#allocation2 + $0x80] ss:$8 sps:$4 sm:$0xff]  }
  0x8f   :  { %267 = vmatprep.subr.bf16.mxu1 %v12379_v5  ;;  %v12426_v38 = vld [vmem:[#allocation2 + $0x94] ss:$8 sps:$4 sm:$0xff]   ;;  %v12424_v39 = vld [vmem:[#allocation2 + $0x90] ss:$8 sps:$4 sm:$0xff]   ;;  %v12429_v40 = vld [vmem:[#allocation2 + $0xa4] ss:$8 sps:$4 sm:$0xff]  }
  0x90   :  { %v12427_v41 = vld [vmem:[#allocation2 + $0xa0] ss:$8 sps:$4 sm:$0xff]   ;;  %v12432_v42 = vld [vmem:[#allocation2 + $0xb4] ss:$8 sps:$4 sm:$0xff]   ;;  %v12430_v43 = vld [vmem:[#allocation2 + $0xb0] ss:$8 sps:$4 sm:$0xff]  }
  0x91   :  { %v480_v47 = vsel %vm478_vm0, %v10778_v46, 0  ;;  %v12435_v48 = vld [vmem:[#allocation5 + $0x4] ss:$8 sps:$4 sm:$0xff]   ;;  %v12437_v49 = vld [vmem:[#allocation5] ss:$8 sps:$4 sm:$0xff]   ;;  %vm474_vm1 = vcmask 588800  }
  0x92   :  { %268 = vmatpush1.bf16.msra.mxu1 %v12381_v6  ;;  %v12438_v50 = vld [vmem:[#allocation5 + $0x14] ss:$8 sps:$4 sm:$0xff]   ;;  %705 = vmatprep.subr.bf16.mxu0 %v12435_v48  ;;  %v12440_v51 = vld [vmem:[#allocation5 + $0x10] ss:$8 sps:$4 sm:$0xff]   ;;  %v12441_v52 = vld [vmem:[#allocation5 + $0x24] ss:$8 sps:$4 sm:$0xff]   ;;  %v173_v6 = vlaneseq }
  0x93   :  { %269 = vmatprep.subr.bf16.mxu1 %v12382_v7  ;;  %706 = vmatpush1.bf16.msra.mxu0 %v12437_v49  ;;  %v12443_v53 = vld [vmem:[#allocation5 + $0x20] ss:$8 sps:$4 sm:$0xff]   ;;  %v12444_v54 = vld [vmem:[#allocation5 + $0x34] ss:$8 sps:$4 sm:$0xff]   ;;  %v12446_v55 = vld [vmem:[#allocation5 + $0x30] ss:$8 sps:$4 sm:$0xff]  }
  0x94   :  { %707 = vmatprep.subr.bf16.mxu0 %v12438_v50  ;;  %v12447_v56 = vld [vmem:[#allocation5 + $0x44] ss:$8 sps:$4 sm:$0xff]   ;;  %v12449_v57 = vld [vmem:[#allocation5 + $0x40] ss:$8 sps:$4 sm:$0xff]   ;;  %v12450_v58 = vld [vmem:[#allocation5 + $0x54] ss:$8 sps:$4 sm:$0xff]  }
  0x95   :  { %v12452_v59 = vld [vmem:[#allocation5 + $0x50] ss:$8 sps:$4 sm:$0xff]   ;;  %v12453_v60 = vld [vmem:[#allocation5 + $0x64] ss:$8 sps:$4 sm:$0xff]   ;;  %v12455_v61 = vld [vmem:[#allocation5 + $0x60] ss:$8 sps:$4 sm:$0xff]  }
  0x96   :  { %270 = vmatpush1.bf16.msra.mxu1 %v12384_v8  ;;  %v12456_v62 = vld [vmem:[#allocation5 + $0x74] ss:$8 sps:$4 sm:$0xff]   ;;  %v12458_v63 = vld [vmem:[#allocation5 + $0x70] ss:$8 sps:$4 sm:$0xff]   ;;  %v12459_v1 = vld [vmem:[#allocation5 + $0x84] ss:$8 sps:$4 sm:$0xff]  }
  0x97   :  { %271 = vmatprep.subr.bf16.mxu1 %v12385_v9  ;;  %708 = vmatpush1.bf16.msra.mxu0 %v12440_v51  ;;  %v12461_v2 = vld [vmem:[#allocation5 + $0x80] ss:$8 sps:$4 sm:$0xff]   ;;  %v12462_v3 = vld [vmem:[#allocation5 + $0x94] ss:$8 sps:$4 sm:$0xff]   ;;  %v12464_v4 = vld [vmem:[#allocation5 + $0x90] ss:$8 sps:$4 sm:$0xff]  }
  0x98   :  { %709 = vmatprep.subr.bf16.mxu0 %v12441_v52  ;;  %v12465_v5 = vld [vmem:[#allocation5 + $0xa4] ss:$8 sps:$4 sm:$0xff]   ;;  %v14621_v7 = vshrl.u32 %v173_v6, 7  ;;  %v171_v8 = vld [vmem:[%s16813_s1] sm:$0x3]  ;;  %s16814_s29 = sld [smem:[#allocation23_spill]] }
  0x99   :  { %v12497_v44 = vld [vmem:[%s16779_s7 + $0x80] ss:$16 sps:$4 sm:$0xff]   ;;  %v12517_v49 = vld [vmem:[%s16779_s7 + $0xe4] ss:$16 sps:$4 sm:$0xff]   ;;  %vm2326_vm2 = vcmask 130048   ;;  %vm4928_vm3 = vcmask 261120  }
  0x9a   :  { %272 = vmatpush1.bf16.msra.mxu1 %v12387_v10  ;;  %v14627_v9 = vsub.s32 0, %v14621_v7  ;;  %v14630_v10 = vsub.s32 1, %v14621_v7  ;;  %v12503_v46 = vld [vmem:[%s16779_s7 + $0xa0] ss:$16 sps:$4 sm:$0xff]   ;;  %v12523_v51 = vld [vmem:[%s16779_s7 + $0x104] ss:$16 sps:$4 sm:$0xff]  }
  0x9b   :  { %273 = vmatprep.subr.bf16.mxu1 %v12388_v11  ;;  %710 = vmatpush1.bf16.msra.mxu0 %v12443_v53  ;;  %v12509_v48 = vld [vmem:[%s16779_s7 + $0xc0] ss:$16 sps:$4 sm:$0xff]   ;;  %v12529_v53 = vld [vmem:[%s16779_s7 + $0x124] ss:$16 sps:$4 sm:$0xff]   ;;  %vm14365_vm4 = vmmov 0   ;;  %s16815_s19 = sld [smem:[#allocation25_spill]] }
  0x9c   :  { %711 = vmatprep.subr.bf16.mxu0 %v12444_v54  ;;  %v176_v11 = vrot.slane %v171_v8, %v14627_v9  ;;  %v12515_v50 = vld [vmem:[%s16779_s7 + $0xe0] ss:$16 sps:$4 sm:$0xff]   ;;  %s14366_s25 = smov [#allocation13]  }
  0x9d   :  { %v12521_v52 = vld [vmem:[%s16779_s7 + $0x100] ss:$16 sps:$4 sm:$0xff]   ;;  %s10723_s28 = sshll.u32 %s14366_s25, 4  ;;  %s10724_s28 = int_to_ptr.vmem [resolvable:$true] %s10723_s28 }
  0x9e   :  { %274 = vmatpush1.bf16.msra.mxu1 %v12390_v12  ;;  %v180_v12 = vrot.slane %v171_v8, %v14630_v10  ;;  %v12527_v54 = vld [vmem:[%s16779_s7 + $0x120] ss:$16 sps:$4 sm:$0xff]   ;;  %s14319_s27 = scalar_lea.vmem %s10724_s28, 256  ;;  %p14324_p7 = scmp.lt.s32.totalorder %s10724_s28, %s10724_s28 }
  0x9f   :  { %275 = vmatprep.subr.bf16.mxu1 %v12391_v13  ;;  %712 = vmatpush1.bf16.msra.mxu0 %v12446_v55  ;;  %v12535_v55 = vld [vmem:[%s16779_s7 + $0x144] ss:$16 sps:$4 sm:$0xff]   ;;  %p14320_p6 = scmp.ne.s32.totalorder %s10724_s28, %s14319_s27  ;;  %p14325_p8 = scmp.lt.s32.totalorder %s14319_s27, %s14319_s27 }
  0xa0   :  { %713 = vmatprep.subr.bf16.mxu0 %v12447_v56  ;;  %v12533_v56 = vld [vmem:[%s16779_s7 + $0x140] ss:$16 sps:$4 sm:$0xff]  }
  0xa1   :  { %p14326_p9 = por %p14325_p8, %p14324_p7 }
  0xa2   :  { %276 = vmatpush1.bf16.msra.mxu1 %v12393_v14 }
  0xa3   :  { %277 = vmatprep.subr.bf16.mxu1 %v12394_v15  ;;  %714 = vmatpush1.bf16.msra.mxu0 %v12449_v57  ;;  %v337_v57 = vld [vmem:[%s16814_s29] sm:$0x3]  ;;  %p14327_p10 = pnand %p14326_p9, %p14320_p6 }
  0xa4   :  { %715 = vmatprep.subr.bf16.mxu0 %v12450_v58  ;;  %v342_v58 = vrot.slane %v337_v57, %v14627_v9 }
  0xa6   :  { %278 = vmatpush1.bf16.msra.mxu1 %v12396_v16 }
  0xa7   :  { %485 = vmatprep.subr.bf16.mxu1 %v12399_v19  ;;  %716 = vmatpush1.bf16.msra.mxu0 %v12452_v59  ;;  %v346_v59 = vrot.slane %v337_v57, %v14630_v10 }
  0xa8   :  { %717 = vmatprep.subr.bf16.mxu0 %v12453_v60 }
  0xa9   :  { %296 = vmatmul.mubr.bf16.vlgmr.msra.gmra.mrb[0].mxu1 %v154_v21 }
  0xaa   :  { %486 = vmatpush1.bf16.msra.mxu1 %v12397_v20 }
  0xab   :  { %487 = vmatprep.subr.bf16.mxu1 %v12402_v22  ;;  %718 = vmatpush1.bf16.msra.mxu0 %v12455_v61 }
  0xac   :  { %719 = vmatprep.subr.bf16.mxu0 %v12456_v62 }
  0xae   :  { %488 = vmatpush1.bf16.msra.mxu1 %v12400_v23 }
  0xaf   :  { %489 = vmatprep.subr.bf16.mxu1 %v12405_v24  ;;  %720 = vmatpush1.bf16.msra.mxu0 %v12458_v63 }
  0xb0   :  { %721 = vmatprep.subr.bf16.mxu0 %v12459_v1 }
  0xb2   :  { %490 = vmatpush1.bf16.msra.mxu1 %v12403_v25 }
  0xb3   :  { %491 = vmatprep.subr.bf16.mxu1 %v12408_v26  ;;  %722 = vmatpush1.bf16.msra.mxu0 %v12461_v2 }
  0xb4   :  { %723 = vmatprep.subr.bf16.mxu0 %v12462_v3 }
  0xb6   :  { %492 = vmatpush1.bf16.msra.mxu1 %v12406_v27  ;;  %v12467_v27 = vld [vmem:[#allocation5 + $0xa0] ss:$8 sps:$4 sm:$0xff]  }
  0xb7   :  { %493 = vmatprep.subr.bf16.mxu1 %v12411_v28  ;;  %724 = vmatpush1.bf16.msra.mxu0 %v12464_v4  ;;  %v12468_v28 = vld [vmem:[#allocation5 + $0xb4] ss:$8 sps:$4 sm:$0xff]  }
  0xb8   :  { %725 = vmatprep.subr.bf16.mxu0 %v12465_v5 }
  0xba   :  { %494 = vmatpush1.bf16.msra.mxu1 %v12409_v29  ;;  %v12470_v29 = vld [vmem:[#allocation5 + $0xb0] ss:$8 sps:$4 sm:$0xff]  }
  0xbb   :  { %495 = vmatprep.subr.bf16.mxu1 %v12414_v30  ;;  %726 = vmatpush1.bf16.msra.mxu0 %v12467_v27  ;;  %v558_v30 = vld [vmem:[#allocation5 + $0xc0] sm:$0xff] }
  0xbc   :  { %727 = vmatprep.subr.bf16.mxu0 %v12468_v28  ;;  %v12520_v27 = vld [vmem:[%s16779_s7 + $0xec] ss:$16 sps:$4 sm:$0xff]   ;;  %v12518_v28 = vld [vmem:[%s16779_s7 + $0xe8] ss:$16 sps:$4 sm:$0xff]  }
  0xbe   :  { %496 = vmatpush1.bf16.msra.mxu1 %v12412_v31  ;;  %v10807_v31 = vcombine.high %v558_v30, %v558_v30 }
  0xbf   :  { %497 = vmatprep.subr.bf16.mxu1 %v12417_v32  ;;  %728 = vmatpush1.bf16.msra.mxu0 %v12470_v29  ;;  %v10806_v32 = vcombine.low %v558_v30, %v558_v30  ;;  %v12526_v29 = vld [vmem:[%s16779_s7 + $0x10c] ss:$16 sps:$4 sm:$0xff]   ;;  %v12524_v30 = vld [vmem:[%s16779_s7 + $0x108] ss:$16 sps:$4 sm:$0xff]  }
  0xc0   :  { %10808 = vmatprep.subr.msk.bf16.mxu0 %vm478_vm0, %v10807_v31  ;;  %v12532_v31 = vld [vmem:[%s16779_s7 + $0x12c] ss:$16 sps:$4 sm:$0xff]  }
  0xc2   :  { %498 = vmatpush1.bf16.msra.mxu1 %v12415_v33  ;;  %v700_v33 = vsel %vm478_vm0, %v10806_v32, 0  ;;  %v12530_v32 = vld [vmem:[%s16779_s7 + $0x128] ss:$16 sps:$4 sm:$0xff]  }
  0xc3   :  { %499 = vmatprep.subr.bf16.mxu1 %v12420_v34  ;;  %730 = vmatpush1.bf16.msra.mxu0 %v700_v33  ;;  %v12473_v34 = vld [vmem:[%s16779_s7] ss:$16 sps:$4 sm:$0xff]   ;;  %v12538_v33 = vld [vmem:[%s16779_s7 + $0x14c] ss:$16 sps:$4 sm:$0xff]  }
  0xc6   :  { %500 = vmatpush1.bf16.msra.mxu1 %v12418_v35  ;;  %v12475_v35 = vld [vmem:[%s16779_s7 + $0x4] ss:$16 sps:$4 sm:$0xff]  }
  0xc7   :  { %501 = vmatprep.subr.bf16.mxu1 %v12423_v36  ;;  %v12478_v36 = vld [vmem:[%s16779_s7 + $0xc] ss:$16 sps:$4 sm:$0xff]  }
  0xc8   :  { %1134 = vmatprep.subr.bf16.mxu0 %v12478_v36  ;;  %v12544_v36 = vld [vmem:[%s16779_s7 + $0x16c] ss:$16 sps:$4 sm:$0xff]  }
  0xca   :  { %502 = vmatpush1.bf16.msra.mxu1 %v12421_v37  ;;  %v12481_v37 = vld [vmem:[%s16779_s7 + $0x24] ss:$16 sps:$4 sm:$0xff]  }
  0xcb   :  { %503 = vmatprep.subr.bf16.mxu1 %v12426_v38  ;;  %v12479_v38 = vld [vmem:[%s16779_s7 + $0x20] ss:$16 sps:$4 sm:$0xff]  }
  0xce   :  { %504 = vmatpush1.bf16.msra.mxu1 %v12424_v39  ;;  %v12487_v39 = vld [vmem:[%s16779_s7 + $0x44] ss:$16 sps:$4 sm:$0xff]  }
  0xcf   :  { %505 = vmatprep.subr.bf16.mxu1 %v12429_v40  ;;  %v12485_v40 = vld [vmem:[%s16779_s7 + $0x40] ss:$16 sps:$4 sm:$0xff]  }
  0xd2   :  { %506 = vmatpush1.bf16.msra.mxu1 %v12427_v41  ;;  %v12493_v41 = vld [vmem:[%s16779_s7 + $0x64] ss:$16 sps:$4 sm:$0xff]  }
  0xd3   :  { %507 = vmatprep.subr.bf16.mxu1 %v12432_v42  ;;  %v12491_v42 = vld [vmem:[%s16779_s7 + $0x60] ss:$16 sps:$4 sm:$0xff]  }
  0xd6   :  { %508 = vmatpush1.bf16.msra.mxu1 %v12430_v43  ;;  %v12499_v43 = vld [vmem:[%s16779_s7 + $0x84] ss:$16 sps:$4 sm:$0xff]  }
  0xd7   :  { %10780 = vmatprep.subr.msk.bf16.mxu1 %vm478_vm0, %v10779_v45  ;;  %v12505_v45 = vld [vmem:[%s16779_s7 + $0xa4] ss:$16 sps:$4 sm:$0xff]  }
  0xda   :  { %510 = vmatpush1.bf16.msra.mxu1 %v480_v47  ;;  %v12511_v47 = vld [vmem:[%s16779_s7 + $0xc4] ss:$16 sps:$4 sm:$0xff]  }
  0xdb   :  { %1091 = vmatprep.subr.bf16.mxu1 %v12475_v35  ;;  %v12541_v35 = vld [vmem:[%s16779_s7 + $0x164] ss:$16 sps:$4 sm:$0xff]  }
 0x17c   :  { %v297_v13 = vpop.f32.mrb[0].mxu1 }
 0x17d   :  { %v298_v14 = vadd.f32 %v297_v13, %v176_v11  ;;  %v299_v15 = vpop.f32.mrb[1].mxu1 }
 0x17e   :  { %v300_v16 = vadd.f32 %v299_v15, %v180_v12  ;;  %v301_v17 = vpop.f32.mrb[2].mxu1 }
 0x17f   :  { %v302_v18 = vadd.f32 %v301_v17, %v176_v11  ;;  %v303_v19 = vpop.f32.mrb[3].mxu1  ;;  %v306_v21 = vmax.f32 %v298_v14, 0.0  ;;  %v12484_v14 = vld [vmem:[%s16779_s7 + $0x2c] ss:$16 sps:$4 sm:$0xff]  }
 0x180   :  { %v304_v20 = vadd.f32 %v303_v19, %v180_v12  ;;  %v307_v23 = vmax.f32 %v300_v16, 0.0  ;;  %v12476_v12 = vld [vmem:[%s16779_s7 + $0x8] ss:$16 sps:$4 sm:$0xff]   ;;  %v12490_v17 = vld [vmem:[%s16779_s7 + $0x4c] ss:$16 sps:$4 sm:$0xff]  }
 0x181   :  { %v308_v22 = vmax.f32 %v302_v18, 0.0  ;;  %v12482_v16 = vld [vmem:[%s16779_s7 + $0x28] ss:$16 sps:$4 sm:$0xff]   ;;  %v12496_v19 = vld [vmem:[%s16779_s7 + $0x6c] ss:$16 sps:$4 sm:$0xff]  }
 0x182   :  { %v309_v24 = vmax.f32 %v304_v20, 0.0  ;;  %v12488_v18 = vld [vmem:[%s16779_s7 + $0x48] ss:$16 sps:$4 sm:$0xff]  }
 0x183   :  { %v310_v25 = vpack.c.bf16 %v308_v22, %v306_v21  ;;  %v12494_v20 = vld [vmem:[%s16779_s7 + $0x68] ss:$16 sps:$4 sm:$0xff]   ;;  %v12502_v21 = vld [vmem:[%s16779_s7 + $0x8c] ss:$16 sps:$4 sm:$0xff]  }
 0x184   :  { %v311_v26 = vpack.c.bf16 %v309_v24, %v307_v23  ;;  %v12500_v22 = vld [vmem:[%s16779_s7 + $0x88] ss:$16 sps:$4 sm:$0xff]   ;;  %v12508_v23 = vld [vmem:[%s16779_s7 + $0xac] ss:$16 sps:$4 sm:$0xff]  }
 0x185   :  { %v12506_v24 = vld [vmem:[%s16779_s7 + $0xa8] ss:$16 sps:$4 sm:$0xff]  }
 0x186   :  { %10781 = vmatprep.mubr.msk.bf16.mxu1 %vm474_vm1, %v311_v26  ;;  %v12512_v26 = vld [vmem:[%s16779_s7 + $0xc8] ss:$16 sps:$4 sm:$0xff]  }
 0x187   :  { %518 = vmatmul.mubr.bf16.vlgmr.msra.gmra.mrb[4].mxu1 %v310_v25  ;;  %v12514_v25 = vld [vmem:[%s16779_s7 + $0xcc] ss:$16 sps:$4 sm:$0xff]  }
 0x188   :  { %1092 = vmatpush1.bf16.msra.mxu1 %v12473_v34  ;;  %v12536_v34 = vld [vmem:[%s16779_s7 + $0x148] ss:$16 sps:$4 sm:$0xff]  }
 0x189   :  { %1093 = vmatprep.subr.bf16.mxu1 %v12481_v37  ;;  %v12539_v37 = vld [vmem:[%s16779_s7 + $0x160] ss:$16 sps:$4 sm:$0xff]  }
 0x18c   :  { %1094 = vmatpush1.bf16.msra.mxu1 %v12479_v38  ;;  %v12542_v38 = vld [vmem:[%s16779_s7 + $0x168] ss:$16 sps:$4 sm:$0xff]  }
 0x18d   :  { %1095 = vmatprep.subr.bf16.mxu1 %v12487_v39  ;;  %v802_v39 = vld [vmem:[%s16779_s7 + $0x180] sm:$0xff] }
 0x190   :  { %1096 = vmatpush1.bf16.msra.mxu1 %v12485_v40  ;;  %v803_v40 = vld [vmem:[%s16779_s7 + $0x188] sm:$0xff] }
 0x191   :  { %1097 = vmatprep.subr.bf16.mxu1 %v12493_v41  ;;  %v10859_v41 = vcombine.high %v802_v39, %v802_v39 }
 0x194   :  { %1098 = vmatpush1.bf16.msra.mxu1 %v12491_v42  ;;  %v10861_v42 = vcombine.high %v803_v40, %v803_v40 }
 0x195   :  { %1099 = vmatprep.subr.bf16.mxu1 %v12499_v43  ;;  %v10858_v43 = vcombine.low %v802_v39, %v802_v39  ;;  %v12600_v39 = vld [vmem:[#allocation7 + $0x1c8] ss:$28 sps:$4 sm:$0xff]  }
 0x198   :  { %1100 = vmatpush1.bf16.msra.mxu1 %v12497_v44  ;;  %v10860_v44 = vcombine.low %v803_v40, %v803_v40  ;;  %v12605_v40 = vld [vmem:[#allocation7 + $0x1fc] ss:$28 sps:$4 sm:$0xff]  }
 0x199   :  { %1101 = vmatprep.subr.bf16.mxu1 %v12505_v45  ;;  %v1080_v45 = vsel %vm478_vm0, %v10858_v43, 0  ;;  %v12606_v43 = vld [vmem:[#allocation7 + $0x200] ss:$28 sps:$4 sm:$0xff]  }
 0x19c   :  { %1102 = vmatpush1.bf16.msra.mxu1 %v12503_v46  ;;  %v1086_v46 = vsel %vm478_vm0, %v10860_v44, 0  ;;  %v12611_v44 = vld [vmem:[#allocation7 + $0x234] ss:$28 sps:$4 sm:$0xff]  }
 0x19d   :  { %1103 = vmatprep.subr.bf16.mxu1 %v12511_v47  ;;  %v12551_v47 = vld [vmem:[#allocation7 + $0x4] ss:$28 sps:$4 sm:$0xff]  }
 0x1a0   :  { %1104 = vmatpush1.bf16.msra.mxu1 %v12509_v48  ;;  %v12554_v48 = vld [vmem:[#allocation7 + $0xc] ss:$28 sps:$4 sm:$0xff]  }
 0x1a1   :  { %1105 = vmatprep.subr.bf16.mxu1 %v12517_v49  ;;  %v559_v49 = vld [vmem:[%s16778_s6] sm:$0x3] }
 0x1a4   :  { %1106 = vmatpush1.bf16.msra.mxu1 %v12515_v50  ;;  %v564_v50 = vrot.slane %v559_v49, %v14627_v9 }
 0x1a5   :  { %1107 = vmatprep.subr.bf16.mxu1 %v12523_v51  ;;  %v568_v51 = vrot.slane %v559_v49, %v14630_v10  ;;  %v12620_v49 = vld [vmem:[#allocation7 + $0x274] ss:$28 sps:$4 sm:$0xff]  }
 0x1a8   :  { %1108 = vmatpush1.bf16.msra.mxu1 %v12521_v52 }
 0x1a9   :  { %1109 = vmatprep.subr.bf16.mxu1 %v12529_v53 }
 0x1ac   :  { %1110 = vmatpush1.bf16.msra.mxu1 %v12527_v54 }
 0x1ad   :  { %1111 = vmatprep.subr.bf16.mxu1 %v12535_v55 }
 0x1b0   :  { %1112 = vmatpush1.bf16.msra.mxu1 %v12533_v56 }
 0x1b1   :  { %1113 = vmatprep.subr.bf16.mxu1 %v12541_v35  ;;  %v12594_v35 = vld [vmem:[#allocation7 + $0x190] ss:$28 sps:$4 sm:$0xff]  }
 0x1b4   :  { %1114 = vmatpush1.bf16.msra.mxu1 %v12539_v37  ;;  %v12602_v37 = vld [vmem:[#allocation7 + $0x1cc] ss:$28 sps:$4 sm:$0xff]  }
 0x1b5   :  { %10862 = vmatprep.subr.msk.bf16.mxu1 %vm478_vm0, %v10859_v41  ;;  %v12608_v41 = vld [vmem:[#allocation7 + $0x204] ss:$28 sps:$4 sm:$0xff]  }
 0x1b8   :  { %1116 = vmatpush1.bf16.msra.mxu1 %v1080_v45  ;;  %v12614_v45 = vld [vmem:[#allocation7 + $0x23c] ss:$28 sps:$4 sm:$0xff]  }
 0x1b9   :  { %2330 = vmatprep.subr.bf16.mxu1 %v12551_v47  ;;  %v12612_v47 = vld [vmem:[#allocation7 + $0x238] ss:$28 sps:$4 sm:$0xff]  }
 0x25a   :  { %v519_v60 = vpop.f32.mrb[4].mxu1 }
 0x25b   :  { %v520_v61 = vadd.f32 %v519_v60, %v342_v58  ;;  %v521_v62 = vpop.f32.mrb[5].mxu1 }
 0x25c   :  { %v522_v63 = vadd.f32 %v521_v62, %v346_v59  ;;  %v523_v1 = vpop.f32.mrb[6].mxu1 }
 0x25d   :  { %v524_v2 = vadd.f32 %v523_v1, %v342_v58  ;;  %v525_v3 = vpop.f32.mrb[7].mxu1  ;;  %v528_v5 = vmax.f32 %v520_v61, 0.0 }
 0x25e   :  { %v526_v4 = vadd.f32 %v525_v3, %v346_v59  ;;  %v529_v8 = vmax.f32 %v522_v63, 0.0  ;;  %v12549_v3 = vld [vmem:[#allocation7] ss:$28 sps:$4 sm:$0xff]  }
 0x25f   :  { %v530_v6 = vmax.f32 %v524_v2, 0.0 }
 0x260   :  { %v531_v11 = vmax.f32 %v526_v4, 0.0  ;;  %v12552_v4 = vld [vmem:[#allocation7 + $0x8] ss:$28 sps:$4 sm:$0xff]  }
 0x261   :  { %v532_v13 = vpack.c.bf16 %v530_v6, %v528_v5  ;;  %v12557_v5 = vld [vmem:[#allocation7 + $0x3c] ss:$28 sps:$4 sm:$0xff]   ;;  %v12560_v6 = vld [vmem:[#allocation7 + $0x44] ss:$28 sps:$4 sm:$0xff]  }
 0x262   :  { %v533_v15 = vpack.c.bf16 %v531_v11, %v529_v8  ;;  %v12555_v8 = vld [vmem:[#allocation7 + $0x38] ss:$28 sps:$4 sm:$0xff]   ;;  %v12558_v11 = vld [vmem:[#allocation7 + $0x40] ss:$28 sps:$4 sm:$0xff]  }
 0x264   :  { %10809 = vmatprep.mubr.msk.bf16.mxu0 %vm474_vm1, %v533_v15  ;;  %v12564_v15 = vld [vmem:[#allocation7 + $0x78] ss:$28 sps:$4 sm:$0xff]  }
 0x265   :  { %738 = vmatmul.mubr.bf16.vlgmr.msra.gmra.mrb[0].mxu0 %v532_v13  ;;  %v12566_v13 = vld [vmem:[#allocation7 + $0x7c] ss:$28 sps:$4 sm:$0xff]  }
 0x266   :  { %1135 = vmatpush1.bf16.msra.mxu0 %v12476_v12  ;;  %v12563_v12 = vld [vmem:[#allocation7 + $0x74] ss:$28 sps:$4 sm:$0xff]  }
 0x267   :  { %1136 = vmatprep.subr.bf16.mxu0 %v12484_v14  ;;  %v12561_v14 = vld [vmem:[#allocation7 + $0x70] ss:$28 sps:$4 sm:$0xff]  }
 0x26a   :  { %1137 = vmatpush1.bf16.msra.mxu0 %v12482_v16  ;;  %v12569_v16 = vld [vmem:[#allocation7 + $0xac] ss:$28 sps:$4 sm:$0xff]  }
 0x26b   :  { %1138 = vmatprep.subr.bf16.mxu0 %v12490_v17  ;;  %v12572_v17 = vld [vmem:[#allocation7 + $0xb4] ss:$28 sps:$4 sm:$0xff]  }
 0x26e   :  { %1139 = vmatpush1.bf16.msra.mxu0 %v12488_v18  ;;  %v12567_v18 = vld [vmem:[#allocation7 + $0xa8] ss:$28 sps:$4 sm:$0xff]  }
 0x26f   :  { %1140 = vmatprep.subr.bf16.mxu0 %v12496_v19  ;;  %v12570_v19 = vld [vmem:[#allocation7 + $0xb0] ss:$28 sps:$4 sm:$0xff]  }
 0x272   :  { %1141 = vmatpush1.bf16.msra.mxu0 %v12494_v20  ;;  %v12575_v20 = vld [vmem:[#allocation7 + $0xe4] ss:$28 sps:$4 sm:$0xff]  }
 0x273   :  { %1142 = vmatprep.subr.bf16.mxu0 %v12502_v21  ;;  %v12578_v21 = vld [vmem:[#allocation7 + $0xec] ss:$28 sps:$4 sm:$0xff]  }
 0x276   :  { %1143 = vmatpush1.bf16.msra.mxu0 %v12500_v22  ;;  %v12573_v22 = vld [vmem:[#allocation7 + $0xe0] ss:$28 sps:$4 sm:$0xff]  }
 0x277   :  { %1144 = vmatprep.subr.bf16.mxu0 %v12508_v23  ;;  %v12576_v23 = vld [vmem:[#allocation7 + $0xe8] ss:$28 sps:$4 sm:$0xff]  }
 0x27a   :  { %1145 = vmatpush1.bf16.msra.mxu0 %v12506_v24  ;;  %v12581_v24 = vld [vmem:[#allocation7 + $0x11c] ss:$28 sps:$4 sm:$0xff]  }
 0x27b   :  { %1146 = vmatprep.subr.bf16.mxu0 %v12514_v25  ;;  %v12584_v25 = vld [vmem:[#allocation7 + $0x124] ss:$28 sps:$4 sm:$0xff]  }
 0x27e   :  { %1147 = vmatpush1.bf16.msra.mxu0 %v12512_v26  ;;  %v12579_v26 = vld [vmem:[#allocation7 + $0x118] ss:$28 sps:$4 sm:$0xff]  }
 0x27f   :  { %1148 = vmatprep.subr.bf16.mxu0 %v12520_v27  ;;  %v12582_v27 = vld [vmem:[#allocation7 + $0x120] ss:$28 sps:$4 sm:$0xff]  }
 0x282   :  { %1149 = vmatpush1.bf16.msra.mxu0 %v12518_v28  ;;  %v12587_v28 = vld [vmem:[#allocation7 + $0x154] ss:$28 sps:$4 sm:$0xff]  }
 0x283   :  { %1150 = vmatprep.subr.bf16.mxu0 %v12526_v29  ;;  %v12590_v29 = vld [vmem:[#allocation7 + $0x15c] ss:$28 sps:$4 sm:$0xff]  }
 0x286   :  { %1151 = vmatpush1.bf16.msra.mxu0 %v12524_v30  ;;  %v12585_v30 = vld [vmem:[#allocation7 + $0x150] ss:$28 sps:$4 sm:$0xff]  }
 0x287   :  { %1152 = vmatprep.subr.bf16.mxu0 %v12532_v31  ;;  %v12588_v31 = vld [vmem:[#allocation7 + $0x158] ss:$28 sps:$4 sm:$0xff]  }
 0x28a   :  { %1153 = vmatpush1.bf16.msra.mxu0 %v12530_v32  ;;  %v12593_v32 = vld [vmem:[#allocation7 + $0x18c] ss:$28 sps:$4 sm:$0xff]  }
 0x28b   :  { %1154 = vmatprep.subr.bf16.mxu0 %v12538_v33  ;;  %v12596_v33 = vld [vmem:[#allocation7 + $0x194] ss:$28 sps:$4 sm:$0xff]  }
 0x28e   :  { %1155 = vmatpush1.bf16.msra.mxu0 %v12536_v34  ;;  %v12591_v34 = vld [vmem:[#allocation7 + $0x188] ss:$28 sps:$4 sm:$0xff]  }
 0x28f   :  { %1156 = vmatprep.subr.bf16.mxu0 %v12544_v36  ;;  %v12599_v36 = vld [vmem:[#allocation7 + $0x1c4] ss:$28 sps:$4 sm:$0xff]  }
 0x292   :  { %1157 = vmatpush1.bf16.msra.mxu0 %v12542_v38  ;;  %v12597_v38 = vld [vmem:[#allocation7 + $0x1c0] ss:$28 sps:$4 sm:$0xff]  }
 0x293   :  { %10864 = vmatprep.subr.msk.bf16.mxu0 %vm478_vm0, %v10861_v42  ;;  %v12603_v42 = vld [vmem:[#allocation7 + $0x1f8] ss:$28 sps:$4 sm:$0xff]  }
 0x296   :  { %1159 = vmatpush1.bf16.msra.mxu0 %v1086_v46  ;;  %v12609_v46 = vld [vmem:[#allocation7 + $0x230] ss:$28 sps:$4 sm:$0xff]  }
 0x297   :  { %2416 = vmatprep.subr.bf16.mxu0 %v12554_v48  ;;  %v12617_v48 = vld [vmem:[#allocation7 + $0x26c] ss:$28 sps:$4 sm:$0xff]  }
 0x338   :  { %v739_v52 = vpop.f32.mrb[0].mxu0 }
 0x339   :  { %v740_v53 = vadd.f32 %v739_v52, %v564_v50  ;;  %v741_v54 = vpop.f32.mrb[1].mxu0  ;;  %v12623_v52 = vld [vmem:[#allocation7 + $0x2a4] ss:$28 sps:$4 sm:$0xff]  }
 0x33a   :  { %v742_v55 = vadd.f32 %v741_v54, %v568_v51  ;;  %v743_v56 = vpop.f32.mrb[2].mxu0  ;;  %v12621_v54 = vld [vmem:[#allocation7 + $0x2a0] ss:$28 sps:$4 sm:$0xff]  }
 0x33b   :  { %v744_v57 = vadd.f32 %v743_v56, %v564_v50  ;;  %v745_v58 = vpop.f32.mrb[3].mxu0  ;;  %v748_v60 = vmax.f32 %v740_v53, 0.0  ;;  %v12615_v50 = vld [vmem:[#allocation7 + $0x268] ss:$28 sps:$4 sm:$0xff]   ;;  %v12629_v56 = vld [vmem:[#allocation7 + $0x2dc] ss:$28 sps:$4 sm:$0xff]  }
 0x33c   :  { %v746_v59 = vadd.f32 %v745_v58, %v568_v51  ;;  %v749_v62 = vmax.f32 %v742_v55, 0.0  ;;  %v12618_v51 = vld [vmem:[#allocation7 + $0x270] ss:$28 sps:$4 sm:$0xff]   ;;  %v12624_v55 = vld [vmem:[#allocation7 + $0x2a8] ss:$28 sps:$4 sm:$0xff]  }
 0x33d   :  { %v750_v61 = vmax.f32 %v744_v57, 0.0  ;;  %v12626_v53 = vld [vmem:[#allocation7 + $0x2ac] ss:$28 sps:$4 sm:$0xff]   ;;  %v12632_v57 = vld [vmem:[#allocation7 + $0x2e4] ss:$28 sps:$4 sm:$0xff]  }
 0x33e   :  { %v751_v63 = vmax.f32 %v746_v59, 0.0  ;;  %v12627_v58 = vld [vmem:[#allocation7 + $0x2d8] ss:$28 sps:$4 sm:$0xff]   ;;  %v12630_v59 = vld [vmem:[#allocation7 + $0x2e0] ss:$28 sps:$4 sm:$0xff]  }
 0x33f   :  { %v752_v1 = vpack.c.bf16 %v750_v61, %v748_v60  ;;  %v12635_v60 = vld [vmem:[#allocation7 + $0x314] ss:$28 sps:$4 sm:$0xff]   ;;  %v12638_v61 = vld [vmem:[#allocation7 + $0x31c] ss:$28 sps:$4 sm:$0xff]  }
 0x340   :  { %v753_v2 = vpack.c.bf16 %v751_v63, %v749_v62  ;;  %v12633_v62 = vld [vmem:[#allocation7 + $0x310] ss:$28 sps:$4 sm:$0xff]   ;;  %v12636_v63 = vld [vmem:[#allocation7 + $0x318] ss:$28 sps:$4 sm:$0xff]  }
 0x342   :  { %10863 = vmatprep.mubr.msk.bf16.mxu1 %vm474_vm1, %v753_v2  ;;  %10865 = vmatprep.mubr.msk.bf16.mxu0 %vm474_vm1, %v753_v2  ;;  %v12644_v2 = vld [vmem:[#allocation7 + $0x354] ss:$28 sps:$4 sm:$0xff]  }
 0x343   :  { %1124 = vmatmul.mubr.bf16.vlgmr.msra.gmra.mrb[8].mxu1 %v752_v1  ;;  %1167 = vmatmul.mubr.bf16.vlgmr.msra.gmra.mrb[4].mxu0 %v752_v1  ;;  %v12641_v1 = vld [vmem:[#allocation7 + $0x34c] ss:$28 sps:$4 sm:$0xff]  }
 0x344   :  { %2331 = vmatpush1.bf16.msra.mxu1 %v12549_v3  ;;  %2417 = vmatpush1.bf16.msra.mxu0 %v12552_v4  ;;  %v12639_v3 = vld [vmem:[#allocation7 + $0x348] ss:$28 sps:$4 sm:$0xff]   ;;  %v12642_v4 = vld [vmem:[#allocation7 + $0x350] ss:$28 sps:$4 sm:$0xff]  }
 0x345   :  { %2332 = vmatprep.subr.bf16.mxu1 %v12557_v5  ;;  %2418 = vmatprep.subr.bf16.mxu0 %v12560_v6  ;;  %v12647_v5 = vld [vmem:[#allocation7 + $0x384] ss:$28 sps:$4 sm:$0xff]   ;;  %v12650_v6 = vld [vmem:[#allocation7 + $0x38c] ss:$28 sps:$4 sm:$0xff]  }
 0x348   :  { %2333 = vmatpush1.bf16.msra.mxu1 %v12555_v8  ;;  %2419 = vmatpush1.bf16.msra.mxu0 %v12558_v11  ;;  %v14805_v8 = vsub.s32 2, %v14621_v7  ;;  %v804_v11 = vld [vmem:[%s16780_s8] sm:$0xf] }
 0x349   :  { %2334 = vmatprep.subr.bf16.mxu1 %v12563_v12  ;;  %2420 = vmatprep.subr.bf16.mxu0 %v12566_v13  ;;  %v14811_v12 = vsub.s32 3, %v14621_v7  ;;  %v809_v13 = vrot.slane %v804_v11, %v14627_v9 }
 0x34c   :  { %2335 = vmatpush1.bf16.msra.mxu1 %v12561_v14  ;;  %2421 = vmatpush1.bf16.msra.mxu0 %v12564_v15  ;;  %v817_v14 = vrot.slane %v804_v11, %v14805_v8  ;;  %v813_v15 = vrot.slane %v804_v11, %v14630_v10 }
 0x34d   :  { %2336 = vmatprep.subr.bf16.mxu1 %v12569_v16  ;;  %2422 = vmatprep.subr.bf16.mxu0 %v12572_v17  ;;  %v821_v16 = vrot.slane %v804_v11, %v14811_v12  ;;  %v12684_v11 = vld [vmem:[#allocation7 + $0x4d8] ss:$28 sps:$4 sm:$0xff]  }
 0x350   :  { %2337 = vmatpush1.bf16.msra.mxu1 %v12567_v18  ;;  %2423 = vmatpush1.bf16.msra.mxu0 %v12570_v19 }
 0x351   :  { %2338 = vmatprep.subr.bf16.mxu1 %v12575_v20  ;;  %2424 = vmatprep.subr.bf16.mxu0 %v12578_v21 }
 0x354   :  { %2339 = vmatpush1.bf16.msra.mxu1 %v12573_v22  ;;  %2425 = vmatpush1.bf16.msra.mxu0 %v12576_v23 }
 0x355   :  { %2340 = vmatprep.subr.bf16.mxu1 %v12581_v24  ;;  %2426 = vmatprep.subr.bf16.mxu0 %v12584_v25 }
 0x358   :  { %2341 = vmatpush1.bf16.msra.mxu1 %v12579_v26  ;;  %2427 = vmatpush1.bf16.msra.mxu0 %v12582_v27 }
 0x359   :  { %2342 = vmatprep.subr.bf16.mxu1 %v12587_v28  ;;  %2428 = vmatprep.subr.bf16.mxu0 %v12590_v29 }
 0x35c   :  { %2343 = vmatpush1.bf16.msra.mxu1 %v12585_v30  ;;  %2429 = vmatpush1.bf16.msra.mxu0 %v12588_v31 }
 0x35d   :  { %2344 = vmatprep.subr.bf16.mxu1 %v12593_v32  ;;  %2430 = vmatprep.subr.bf16.mxu0 %v12596_v33 }
 0x360   :  { %2345 = vmatpush1.bf16.msra.mxu1 %v12591_v34  ;;  %2431 = vmatpush1.bf16.msra.mxu0 %v12594_v35 }
 0x361   :  { %2346 = vmatprep.subr.bf16.mxu1 %v12599_v36  ;;  %2432 = vmatprep.subr.bf16.mxu0 %v12602_v37 }
 0x364   :  { %2347 = vmatpush1.bf16.msra.mxu1 %v12597_v38  ;;  %2433 = vmatpush1.bf16.msra.mxu0 %v12600_v39 }
 0x365   :  { %2348 = vmatprep.subr.bf16.mxu1 %v12605_v40  ;;  %2434 = vmatprep.subr.bf16.mxu0 %v12608_v41 }
 0x368   :  { %2349 = vmatpush1.bf16.msra.mxu1 %v12603_v42  ;;  %2435 = vmatpush1.bf16.msra.mxu0 %v12606_v43 }
 0x369   :  { %2350 = vmatprep.subr.bf16.mxu1 %v12611_v44  ;;  %2436 = vmatprep.subr.bf16.mxu0 %v12614_v45  ;;  %v12645_v45 = vld [vmem:[#allocation7 + $0x380] ss:$28 sps:$4 sm:$0xff]  }
 0x36c   :  { %2351 = vmatpush1.bf16.msra.mxu1 %v12609_v46  ;;  %2437 = vmatpush1.bf16.msra.mxu0 %v12612_v47  ;;  %v12648_v46 = vld [vmem:[#allocation7 + $0x388] ss:$28 sps:$4 sm:$0xff]   ;;  %v12653_v47 = vld [vmem:[#allocation7 + $0x3bc] ss:$28 sps:$4 sm:$0xff]  }
 0x36d   :  { %2352 = vmatprep.subr.bf16.mxu1 %v12617_v48  ;;  %2438 = vmatprep.subr.bf16.mxu0 %v12620_v49  ;;  %v12656_v48 = vld [vmem:[#allocation7 + $0x3c4] ss:$28 sps:$4 sm:$0xff]   ;;  %v12651_v49 = vld [vmem:[#allocation7 + $0x3b8] ss:$28 sps:$4 sm:$0xff]  }
 0x370   :  { %2353 = vmatpush1.bf16.msra.mxu1 %v12615_v50  ;;  %2439 = vmatpush1.bf16.msra.mxu0 %v12618_v51  ;;  %v12654_v50 = vld [vmem:[#allocation7 + $0x3c0] ss:$28 sps:$4 sm:$0xff]   ;;  %v12659_v51 = vld [vmem:[#allocation7 + $0x3f4] ss:$28 sps:$4 sm:$0xff]  }
 0x371   :  { %2354 = vmatprep.subr.bf16.mxu1 %v12623_v52  ;;  %2440 = vmatprep.subr.bf16.mxu0 %v12626_v53  ;;  %v12662_v52 = vld [vmem:[#allocation7 + $0x3fc] ss:$28 sps:$4 sm:$0xff]   ;;  %v12657_v53 = vld [vmem:[#allocation7 + $0x3f0] ss:$28 sps:$4 sm:$0xff]  }
 0x374   :  { %2355 = vmatpush1.bf16.msra.mxu1 %v12621_v54  ;;  %2441 = vmatpush1.bf16.msra.mxu0 %v12624_v55  ;;  %v12660_v54 = vld [vmem:[#allocation7 + $0x3f8] ss:$28 sps:$4 sm:$0xff]   ;;  %v12665_v55 = vld [vmem:[#allocation7 + $0x42c] ss:$28 sps:$4 sm:$0xff]  }
 0x375   :  { %2356 = vmatprep.subr.bf16.mxu1 %v12629_v56  ;;  %2442 = vmatprep.subr.bf16.mxu0 %v12632_v57  ;;  %v12668_v56 = vld [vmem:[#allocation7 + $0x434] ss:$28 sps:$4 sm:$0xff]   ;;  %v12663_v57 = vld [vmem:[#allocation7 + $0x428] ss:$28 sps:$4 sm:$0xff]  }
 0x378   :  { %2357 = vmatpush1.bf16.msra.mxu1 %v12627_v58  ;;  %2443 = vmatpush1.bf16.msra.mxu0 %v12630_v59  ;;  %v12666_v58 = vld [vmem:[#allocation7 + $0x430] ss:$28 sps:$4 sm:$0xff]   ;;  %v12671_v59 = vld [vmem:[#allocation7 + $0x464] ss:$28 sps:$4 sm:$0xff]  }
 0x379   :  { %2358 = vmatprep.subr.bf16.mxu1 %v12635_v60  ;;  %2444 = vmatprep.subr.bf16.mxu0 %v12638_v61  ;;  %v12674_v60 = vld [vmem:[#allocation7 + $0x46c] ss:$28 sps:$4 sm:$0xff]   ;;  %v12669_v61 = vld [vmem:[#allocation7 + $0x460] ss:$28 sps:$4 sm:$0xff]  }
 0x37c   :  { %2359 = vmatpush1.bf16.msra.mxu1 %v12633_v62  ;;  %2445 = vmatpush1.bf16.msra.mxu0 %v12636_v63  ;;  %v12672_v62 = vld [vmem:[#allocation7 + $0x468] ss:$28 sps:$4 sm:$0xff]   ;;  %v12677_v63 = vld [vmem:[#allocation7 + $0x49c] ss:$28 sps:$4 sm:$0xff]  }
 0x37d   :  { %2360 = vmatprep.subr.bf16.mxu1 %v12641_v1  ;;  %2446 = vmatprep.subr.bf16.mxu0 %v12644_v2  ;;  %v12680_v1 = vld [vmem:[#allocation7 + $0x4a4] ss:$28 sps:$4 sm:$0xff]   ;;  %v12675_v2 = vld [vmem:[#allocation7 + $0x498] ss:$28 sps:$4 sm:$0xff]  }
 0x380   :  { %2361 = vmatpush1.bf16.msra.mxu1 %v12639_v3  ;;  %2447 = vmatpush1.bf16.msra.mxu0 %v12642_v4  ;;  %v12678_v3 = vld [vmem:[#allocation7 + $0x4a0] ss:$28 sps:$4 sm:$0xff]   ;;  %v12683_v4 = vld [vmem:[#allocation7 + $0x4d4] ss:$28 sps:$4 sm:$0xff]  }
 0x381   :  { %2373 = vmatprep.subr.bf16.mxu1 %v12647_v5  ;;  %2459 = vmatprep.subr.bf16.mxu0 %v12650_v6  ;;  %v12686_v5 = vld [vmem:[#allocation7 + $0x4dc] ss:$28 sps:$4 sm:$0xff]   ;;  %v12681_v6 = vld [vmem:[#allocation7 + $0x4d0] ss:$28 sps:$4 sm:$0xff]  }
 0x416   :  { %v1125_v17 = vpop.f32.mrb[8].mxu1  ;;  %v1168_v18 = vpop.f32.mrb[4].mxu0 }
 0x417   :  { %v1126_v19 = vadd.f32 %v1125_v17, %v809_v13  ;;  %v1169_v20 = vadd.f32 %v1168_v18, %v817_v14  ;;  %v1127_v21 = vpop.f32.mrb[9].mxu1  ;;  %v1170_v22 = vpop.f32.mrb[5].mxu0  ;;  %v12695_v17 = vld [vmem:[#allocation7 + $0x544] ss:$28 sps:$4 sm:$0xff]   ;;  %v12698_v18 = vld [vmem:[#allocation7 + $0x54c] ss:$28 sps:$4 sm:$0xff]  }
 0x418   :  { %v1128_v23 = vadd.f32 %v1127_v21, %v813_v15  ;;  %v1171_v24 = vadd.f32 %v1170_v22, %v821_v16  ;;  %v1129_v25 = vpop.f32.mrb[10].mxu1  ;;  %v1172_v26 = vpop.f32.mrb[6].mxu0  ;;  %v12701_v21 = vld [vmem:[#allocation7 + $0x14] ss:$28 sps:$4 sm:$0xff]  }
 0x419   :  { %v1130_v27 = vadd.f32 %v1129_v25, %v809_v13  ;;  %v1173_v28 = vadd.f32 %v1172_v26, %v817_v14  ;;  %v1131_v29 = vpop.f32.mrb[11].mxu1  ;;  %v1174_v30 = vpop.f32.mrb[7].mxu0  ;;  %v1177_v33 = vmax.f32 %v1126_v19, 0.0  ;;  %v1179_v34 = vmax.f32 %v1169_v20, 0.0  ;;  %v12689_v13 = vld [vmem:[#allocation7 + $0x50c] ss:$28 sps:$4 sm:$0xff]  }
 0x41a   :  { %v1132_v31 = vadd.f32 %v1131_v29, %v813_v15  ;;  %v1175_v32 = vadd.f32 %v1174_v30, %v821_v16  ;;  %v1178_v37 = vmax.f32 %v1128_v23, 0.0  ;;  %v1180_v38 = vmax.f32 %v1171_v24, 0.0  ;;  %v12692_v14 = vld [vmem:[#allocation7 + $0x514] ss:$28 sps:$4 sm:$0xff]   ;;  %v12687_v15 = vld [vmem:[#allocation7 + $0x508] ss:$28 sps:$4 sm:$0xff]  }
 0x41b   :  { %v1181_v35 = vmax.f32 %v1130_v27, 0.0  ;;  %v1183_v36 = vmax.f32 %v1173_v28, 0.0  ;;  %v12690_v16 = vld [vmem:[#allocation7 + $0x510] ss:$28 sps:$4 sm:$0xff]   ;;  %v12693_v19 = vld [vmem:[#allocation7 + $0x540] ss:$28 sps:$4 sm:$0xff]  }
 0x41c   :  { %v1182_v39 = vmax.f32 %v1132_v31, 0.0  ;;  %v1184_v40 = vmax.f32 %v1175_v32, 0.0  ;;  %v12696_v20 = vld [vmem:[#allocation7 + $0x548] ss:$28 sps:$4 sm:$0xff]   ;;  %v12702_v22 = vld [vmem:[#allocation7 + $0x1d8] ss:$28 sps:$4 sm:$0xff]  }
 0x41d   :  { %v14817_v41 = vpack.c.bf16 %v1181_v35, %v1177_v33  ;;  %v14819_v42 = vpack.c.bf16 %v1183_v36, %v1179_v34  ;;  %v12699_v23 = vld [vmem:[#allocation7 + $0x10] ss:$28 sps:$4 sm:$0xff]   ;;  %v12703_v24 = vld [vmem:[#allocation7 + $0x18] ss:$28 sps:$4 sm:$0xff]   ;;  %v12704_v27 = vld [vmem:[#allocation7 + $0x48] ss:$28 sps:$4 sm:$0xff]  }
 0x41e   :  { %v14821_v43 = vpack.c.bf16 %v1182_v39, %v1178_v37  ;;  %v14823_v44 = vpack.c.bf16 %v1184_v40, %v1180_v38  ;;  %v12706_v25 = vld [vmem:[#allocation7 + $0x4c] ss:$28 sps:$4 sm:$0xff]   ;;  %v12711_v29 = vld [vmem:[#allocation7 + $0x84] ss:$28 sps:$4 sm:$0xff]   ;;  %v12716_v33 = vld [vmem:[#allocation7 + $0xbc] ss:$28 sps:$4 sm:$0xff]  }
 0x41f   :  { %v12707_v26 = vld [vmem:[#allocation7 + $0x210] ss:$28 sps:$4 sm:$0xff]   ;;  %v12712_v30 = vld [vmem:[#allocation7 + $0x248] ss:$28 sps:$4 sm:$0xff]   ;;  %v12709_v31 = vld [vmem:[#allocation7 + $0x80] ss:$28 sps:$4 sm:$0xff]  }
 0x420   :  { %2362 = vmatprep.mubr.bf16.mxu1 %v14821_v43  ;;  %2448 = vmatprep.mubr.bf16.mxu0 %v14821_v43  ;;  %v12708_v28 = vld [vmem:[#allocation7 + $0x50] ss:$28 sps:$4 sm:$0xff]   ;;  %v12713_v32 = vld [vmem:[#allocation7 + $0x88] ss:$28 sps:$4 sm:$0xff]   ;;  %v12717_v34 = vld [vmem:[#allocation7 + $0x280] ss:$28 sps:$4 sm:$0xff]  }
 0x421   :  { %2363 = vmatmul.mubr.bf16.vlgmr.msra.gmra.mrb[12].mxu1 %v14817_v41  ;;  %2449 = vmatmul.mubr.bf16.vlgmr.msra.gmra.mrb[8].mxu0 %v14817_v41  ;;  %v12714_v35 = vld [vmem:[#allocation7 + $0xb8] ss:$28 sps:$4 sm:$0xff]   ;;  %v12718_v36 = vld [vmem:[#allocation7 + $0xc0] ss:$28 sps:$4 sm:$0xff]   ;;  %v12719_v39 = vld [vmem:[#allocation7 + $0xf0] ss:$28 sps:$4 sm:$0xff]  }
 0x422   :  { %2374 = vmatpush1.bf16.msra.mxu1 %v12645_v45  ;;  %2460 = vmatpush1.bf16.msra.mxu0 %v12648_v46  ;;  %v12721_v37 = vld [vmem:[#allocation7 + $0xf4] ss:$28 sps:$4 sm:$0xff]   ;;  %v12724_v46 = vld [vmem:[#allocation7 + $0x128] ss:$28 sps:$4 sm:$0xff]  }
 0x423   :  { %11041 = vmatprep.mubr.msk.bf16.mxu1 %vm2326_vm2, %v14823_v44  ;;  %11042 = vmatprep.mubr.msk.bf16.mxu0 %vm2326_vm2, %v14823_v44  ;;  %v12722_v38 = vld [vmem:[#allocation7 + $0x2b8] ss:$28 sps:$4 sm:$0xff]   ;;  %v12727_v45 = vld [vmem:[#allocation7 + $0x2f0] ss:$28 sps:$4 sm:$0xff]  }
 0x424   :  { %2375 = vmatprep.subr.bf16.mxu1 %v12653_v47  ;;  %2461 = vmatprep.subr.bf16.mxu0 %v12656_v48  ;;  %v12723_v40 = vld [vmem:[#allocation7 + $0xf8] ss:$28 sps:$4 sm:$0xff]   ;;  %v12728_v47 = vld [vmem:[#allocation7 + $0x130] ss:$28 sps:$4 sm:$0xff]   ;;  %v12731_v48 = vld [vmem:[#allocation7 + $0x164] ss:$28 sps:$4 sm:$0xff]  }
 0x426   :  { %2376 = vmatpush1.bf16.msra.mxu1 %v12651_v49  ;;  %2462 = vmatpush1.bf16.msra.mxu0 %v12654_v50  ;;  %v12732_v49 = vld [vmem:[#allocation7 + $0x328] ss:$28 sps:$4 sm:$0xff]   ;;  %v12729_v50 = vld [vmem:[#allocation7 + $0x160] ss:$28 sps:$4 sm:$0xff]  }
 0x427   :  { %2377 = vmatprep.subr.bf16.mxu1 %v12659_v51  ;;  %2463 = vmatprep.subr.bf16.mxu0 %v12662_v52  ;;  %v12733_v51 = vld [vmem:[#allocation7 + $0x168] ss:$28 sps:$4 sm:$0xff]   ;;  %v12736_v52 = vld [vmem:[#allocation7 + $0x19c] ss:$28 sps:$4 sm:$0xff]  }
 0x42a   :  { %2378 = vmatpush1.bf16.msra.mxu1 %v12657_v53  ;;  %2464 = vmatpush1.bf16.msra.mxu0 %v12660_v54  ;;  %v12737_v53 = vld [vmem:[#allocation7 + $0x360] ss:$28 sps:$4 sm:$0xff]   ;;  %v12734_v54 = vld [vmem:[#allocation7 + $0x198] ss:$28 sps:$4 sm:$0xff]  }
 0x42b   :  { %2379 = vmatprep.subr.bf16.mxu1 %v12665_v55  ;;  %2465 = vmatprep.subr.bf16.mxu0 %v12668_v56  ;;  %v12738_v55 = vld [vmem:[#allocation7 + $0x1a0] ss:$28 sps:$4 sm:$0xff]   ;;  %v12741_v56 = vld [vmem:[#allocation7 + $0x1d4] ss:$28 sps:$4 sm:$0xff]  }
 0x42e   :  { %2380 = vmatpush1.bf16.msra.mxu1 %v12663_v57  ;;  %2466 = vmatpush1.bf16.msra.mxu0 %v12666_v58  ;;  %v12739_v57 = vld [vmem:[#allocation7 + $0x1d0] ss:$28 sps:$4 sm:$0xff]   ;;  %v12742_v58 = vld [vmem:[#allocation7 + $0x398] ss:$28 sps:$4 sm:$0xff]  }
 0x42f   :  { %2381 = vmatprep.subr.bf16.mxu1 %v12671_v59  ;;  %2467 = vmatprep.subr.bf16.mxu0 %v12674_v60  ;;  %v12745_v59 = vld [vmem:[#allocation7 + $0x20c] ss:$28 sps:$4 sm:$0xff]  }
 0x430   :  { %v12743_v60 = vld [vmem:[#allocation7 + $0x208] ss:$28 sps:$4 sm:$0xff]  }
 0x432   :  { %2382 = vmatpush1.bf16.msra.mxu1 %v12669_v61  ;;  %2468 = vmatpush1.bf16.msra.mxu0 %v12672_v62  ;;  %v12746_v61 = vld [vmem:[#allocation7 + $0x3d0] ss:$28 sps:$4 sm:$0xff]   ;;  %v12749_v62 = vld [vmem:[#allocation7 + $0x244] ss:$28 sps:$4 sm:$0xff]  }
 0x433   :  { %2383 = vmatprep.subr.bf16.mxu1 %v12677_v63  ;;  %2469 = vmatprep.subr.bf16.mxu0 %v12680_v1  ;;  %v12747_v63 = vld [vmem:[#allocation7 + $0x240] ss:$28 sps:$4 sm:$0xff]   ;;  %v12750_v1 = vld [vmem:[#allocation7 + $0x408] ss:$28 sps:$4 sm:$0xff]  }
 0x436   :  { %2384 = vmatpush1.bf16.msra.mxu1 %v12675_v2  ;;  %2470 = vmatpush1.bf16.msra.mxu0 %v12678_v3  ;;  %v12753_v2 = vld [vmem:[#allocation7 + $0x27c] ss:$28 sps:$4 sm:$0xff]  }
 0x437   :  { %2385 = vmatprep.subr.bf16.mxu1 %v12683_v4  ;;  %2471 = vmatprep.subr.bf16.mxu0 %v12686_v5  ;;  %v12751_v3 = vld [vmem:[#allocation7 + $0x278] ss:$28 sps:$4 sm:$0xff]   ;;  %v12754_v4 = vld [vmem:[#allocation7 + $0x440] ss:$28 sps:$4 sm:$0xff]  }
 0x438   :  { %v12757_v5 = vld [vmem:[#allocation7 + $0x2b4] ss:$28 sps:$4 sm:$0xff]  }
 0x43a   :  { %2386 = vmatpush1.bf16.msra.mxu1 %v12681_v6  ;;  %2472 = vmatpush1.bf16.msra.mxu0 %v12684_v11  ;;  %v12755_v6 = vld [vmem:[#allocation7 + $0x2b0] ss:$28 sps:$4 sm:$0xff]   ;;  %v12758_v11 = vld [vmem:[#allocation7 + $0x478] ss:$28 sps:$4 sm:$0xff]  }
 0x43b   :  { %2387 = vmatprep.subr.bf16.mxu1 %v12689_v13  ;;  %2473 = vmatprep.subr.bf16.mxu0 %v12692_v14  ;;  %v12761_v13 = vld [vmem:[#allocation7 + $0x2ec] ss:$28 sps:$4 sm:$0xff]  }
 0x43c   :  { %v12759_v14 = vld [vmem:[#allocation7 + $0x2e8] ss:$28 sps:$4 sm:$0xff]  }
 0x43e   :  { %2388 = vmatpush1.bf16.msra.mxu1 %v12687_v15  ;;  %2474 = vmatpush1.bf16.msra.mxu0 %v12690_v16  ;;  %v12762_v15 = vld [vmem:[#allocation7 + $0x4b0] ss:$28 sps:$4 sm:$0xff]   ;;  %v12765_v16 = vld [vmem:[#allocation7 + $0x324] ss:$28 sps:$4 sm:$0xff]  }
 0x43f   :  { %2389 = vmatprep.subr.bf16.mxu1 %v12695_v17  ;;  %2475 = vmatprep.subr.bf16.mxu0 %v12698_v18  ;;  %v12763_v17 = vld [vmem:[#allocation7 + $0x320] ss:$28 sps:$4 sm:$0xff]   ;;  %v12766_v18 = vld [vmem:[#allocation7 + $0x4e8] ss:$28 sps:$4 sm:$0xff]  }
 0x442   :  { %2390 = vmatpush1.bf16.msra.mxu1 %v12693_v19  ;;  %2476 = vmatpush1.bf16.msra.mxu0 %v12696_v20  ;;  %v12769_v19 = vld [vmem:[#allocation7 + $0x35c] ss:$28 sps:$4 sm:$0xff]  }
 0x443   :  { %2502 = vmatprep.subr.bf16.mxu1 %v12701_v21  ;;  %12021 = vmatprep.subr.bf16.mxu0 %v12702_v22  ;;  %v12767_v20 = vld [vmem:[#allocation7 + $0x358] ss:$28 sps:$4 sm:$0xff]   ;;  %v12770_v21 = vld [vmem:[#allocation7 + $0x520] ss:$28 sps:$4 sm:$0xff]  }
 0x444   :  { %v12773_v22 = vld [vmem:[#allocation7 + $0x394] ss:$28 sps:$4 sm:$0xff]  }
 0x445   :  { %2406 = vmatmul.mubr.bf16.vlgmr.msra.gmra.mrb[12].mxu1 %v14819_v42  ;;  %2492 = vmatmul.mubr.bf16.vlgmr.msra.gmra.mrb[8].mxu0 %v14819_v42 }
 0x446   :  { %2503 = vmatpush1.bf16.msra.mxu1 %v12699_v23  ;;  %2534 = vmatprep.mubr.bf16.mxu1 %v14821_v43  ;;  %v12771_v23 = vld [vmem:[#allocation7 + $0x390] ss:$28 sps:$4 sm:$0xff]  }
 0x447   :  { %12022 = vmatpush3.bf16.msra.mxu0 %v12703_v24  ;;  %2620 = vmatprep.mubr.bf16.mxu0 %v14821_v43  ;;  %v12726_v43 = vld [vmem:[#allocation7 + $0x12c] ss:$28 sps:$4 sm:$0xff]   ;;  %v12774_v24 = vld [vmem:[#allocation7 + $0x558] ss:$28 sps:$4 sm:$0xff]  }
 0x448   :  { %2504 = vmatprep.subr.bf16.mxu1 %v12706_v25  ;;  %12023 = vmatprep.subr.bf16.mxu0 %v12707_v26  ;;  %v12777_v25 = vld [vmem:[#allocation7 + $0x3cc] ss:$28 sps:$4 sm:$0xff]   ;;  %v12801_v26 = vld [vmem:[%s16783_s11 + $0x4] ss:$28 sps:$4 sm:$0xff]  }
 0x44a   :  { %2505 = vmatpush1.bf16.msra.mxu1 %v12704_v27  ;;  %v12775_v27 = vld [vmem:[#allocation7 + $0x3c8] ss:$28 sps:$4 sm:$0xff]  }
 0x44b   :  { %12024 = vmatpush3.bf16.msra.mxu0 %v12708_v28  ;;  %2506 = vmatprep.subr.bf16.mxu1 %v12711_v29  ;;  %v12780_v28 = vld [vmem:[#allocation7 + $0x404] ss:$28 sps:$4 sm:$0xff]   ;;  %v12799_v29 = vld [vmem:[%s16783_s11] ss:$28 sps:$4 sm:$0xff]  }
 0x44c   :  { %12025 = vmatprep.subr.bf16.mxu0 %v12712_v30  ;;  %v12807_v30 = vld [vmem:[%s16783_s11 + $0x3c] ss:$28 sps:$4 sm:$0xff]  }
 0x44e   :  { %2507 = vmatpush1.bf16.msra.mxu1 %v12709_v31  ;;  %v12783_v31 = vld [vmem:[#allocation7 + $0x43c] ss:$28 sps:$4 sm:$0xff]  }
 0x44f   :  { %12026 = vmatpush3.bf16.msra.mxu0 %v12713_v32  ;;  %2508 = vmatprep.subr.bf16.mxu1 %v12716_v33  ;;  %v12813_v32 = vld [vmem:[%s16783_s11 + $0x74] ss:$28 sps:$4 sm:$0xff]   ;;  %v12781_v33 = vld [vmem:[#allocation7 + $0x438] ss:$28 sps:$4 sm:$0xff]  }
 0x450   :  { %12027 = vmatprep.subr.bf16.mxu0 %v12717_v34  ;;  %v12786_v34 = vld [vmem:[#allocation7 + $0x474] ss:$28 sps:$4 sm:$0xff]  }
 0x452   :  { %2509 = vmatpush1.bf16.msra.mxu1 %v12714_v35  ;;  %v12811_v35 = vld [vmem:[%s16783_s11 + $0x70] ss:$28 sps:$4 sm:$0xff]  }
 0x453   :  { %12028 = vmatpush3.bf16.msra.mxu0 %v12718_v36  ;;  %2510 = vmatprep.subr.bf16.mxu1 %v12721_v37  ;;  %v12819_v36 = vld [vmem:[%s16783_s11 + $0xac] ss:$28 sps:$4 sm:$0xff]   ;;  %v12784_v37 = vld [vmem:[#allocation7 + $0x470] ss:$28 sps:$4 sm:$0xff]  }
 0x454   :  { %12029 = vmatprep.subr.bf16.mxu0 %v12722_v38  ;;  %v12789_v38 = vld [vmem:[#allocation7 + $0x4ac] ss:$28 sps:$4 sm:$0xff]  }
 0x456   :  { %2511 = vmatpush1.bf16.msra.mxu1 %v12719_v39  ;;  %v12817_v39 = vld [vmem:[%s16783_s11 + $0xa8] ss:$28 sps:$4 sm:$0xff]  }
 0x457   :  { %12030 = vmatpush3.bf16.msra.mxu0 %v12723_v40  ;;  %2512 = vmatprep.subr.bf16.mxu1 %v12726_v43  ;;  %v12825_v40 = vld [vmem:[%s16783_s11 + $0xe4] ss:$28 sps:$4 sm:$0xff]   ;;  %v12787_v43 = vld [vmem:[#allocation7 + $0x4a8] ss:$28 sps:$4 sm:$0xff]  }
 0x458   :  { %12031 = vmatprep.subr.bf16.mxu0 %v12727_v45  ;;  %v12792_v45 = vld [vmem:[#allocation7 + $0x4e4] ss:$28 sps:$4 sm:$0xff]  }
 0x45a   :  { %2513 = vmatpush1.bf16.msra.mxu1 %v12724_v46  ;;  %v12823_v46 = vld [vmem:[%s16783_s11 + $0xe0] ss:$28 sps:$4 sm:$0xff]  }
 0x45b   :  { %12032 = vmatpush3.bf16.msra.mxu0 %v12728_v47  ;;  %2514 = vmatprep.subr.bf16.mxu1 %v12731_v48  ;;  %v12831_v47 = vld [vmem:[%s16783_s11 + $0x11c] ss:$28 sps:$4 sm:$0xff]   ;;  %v12790_v48 = vld [vmem:[#allocation7 + $0x4e0] ss:$28 sps:$4 sm:$0xff]  }
 0x45c   :  { %12033 = vmatprep.subr.bf16.mxu0 %v12732_v49  ;;  %v12795_v49 = vld [vmem:[#allocation7 + $0x51c] ss:$28 sps:$4 sm:$0xff]  }
 0x45e   :  { %2515 = vmatpush1.bf16.msra.mxu1 %v12729_v50  ;;  %v12829_v50 = vld [vmem:[%s16783_s11 + $0x118] ss:$28 sps:$4 sm:$0xff]  }
 0x45f   :  { %12034 = vmatpush3.bf16.msra.mxu0 %v12733_v51  ;;  %2516 = vmatprep.subr.bf16.mxu1 %v12736_v52  ;;  %v12837_v51 = vld [vmem:[%s16783_s11 + $0x154] ss:$28 sps:$4 sm:$0xff]   ;;  %v12793_v52 = vld [vmem:[#allocation7 + $0x518] ss:$28 sps:$4 sm:$0xff]  }
 0x460   :  { %12035 = vmatprep.subr.bf16.mxu0 %v12737_v53  ;;  %v12798_v53 = vld [vmem:[#allocation7 + $0x554] ss:$28 sps:$4 sm:$0xff]  }
 0x462   :  { %2517 = vmatpush1.bf16.msra.mxu1 %v12734_v54  ;;  %v12835_v54 = vld [vmem:[%s16783_s11 + $0x150] ss:$28 sps:$4 sm:$0xff]  }
 0x463   :  { %12036 = vmatpush3.bf16.msra.mxu0 %v12738_v55  ;;  %2518 = vmatprep.subr.bf16.mxu1 %v12741_v56  ;;  %v12843_v55 = vld [vmem:[%s16783_s11 + $0x18c] ss:$28 sps:$4 sm:$0xff]   ;;  %v12796_v56 = vld [vmem:[#allocation7 + $0x550] ss:$28 sps:$4 sm:$0xff]  }
 0x464   :  { %2629 = vmatprep.subr.bf16.mxu0 %v14363_v0 }
 0x466   :  { %2621 = vmatmul.mubr.bf16.vlgmr.msra.gmra.mrb[12].mxu0 %v14817_v41  ;;  %2519 = vmatpush1.bf16.msra.mxu1 %v12739_v57  ;;  %v12804_v57 = vld [vmem:[%s16783_s11 + $0xc] ss:$28 sps:$4 sm:$0xff]  }
 0x467   :  { %2630 = vmatpush1.bf16.msra.mxu0 %v12742_v58  ;;  %11044 = vmatprep.mubr.msk.bf16.mxu0 %vm2326_vm2, %v14823_v44  ;;  %v12841_v58 = vld [vmem:[%s16783_s11 + $0x188] ss:$28 sps:$4 sm:$0xff]  }
 0x468   :  { %2520 = vmatprep.subr.bf16.mxu1 %v12745_v59  ;;  %2631 = vmatprep.subr.bf16.mxu0 %v14363_v0  ;;  %v12849_v59 = vld [vmem:[%s16783_s11 + $0x1c4] ss:$28 sps:$4 sm:$0xff]  }
 0x46a   :  { %2521 = vmatpush1.bf16.msra.mxu1 %v12743_v60  ;;  %v12802_v60 = vld [vmem:[%s16783_s11 + $0x8] ss:$28 sps:$4 sm:$0xff]  }
 0x46b   :  { %2632 = vmatpush1.bf16.msra.mxu0 %v12746_v61  ;;  %2522 = vmatprep.subr.bf16.mxu1 %v12749_v62  ;;  %v12810_v61 = vld [vmem:[%s16783_s11 + $0x44] ss:$28 sps:$4 sm:$0xff]  }
 0x46c   :  { %2633 = vmatprep.subr.bf16.mxu0 %v14363_v0  ;;  %v12847_v62 = vld [vmem:[%s16783_s11 + $0x1c0] ss:$28 sps:$4 sm:$0xff]  }
 0x46e   :  { %2523 = vmatpush1.bf16.msra.mxu1 %v12747_v63  ;;  %v12855_v63 = vld [vmem:[%s16783_s11 + $0x1fc] ss:$28 sps:$4 sm:$0xff]  }
 0x46f   :  { %2634 = vmatpush1.bf16.msra.mxu0 %v12750_v1  ;;  %2524 = vmatprep.subr.bf16.mxu1 %v12753_v2  ;;  %v12808_v1 = vld [vmem:[%s16783_s11 + $0x40] ss:$28 sps:$4 sm:$0xff]  }
 0x470   :  { %2635 = vmatprep.subr.bf16.mxu0 %v14363_v0  ;;  %v12816_v2 = vld [vmem:[%s16783_s11 + $0x7c] ss:$28 sps:$4 sm:$0xff]  }
 0x472   :  { %2525 = vmatpush1.bf16.msra.mxu1 %v12751_v3  ;;  %v12853_v3 = vld [vmem:[%s16783_s11 + $0x1f8] ss:$28 sps:$4 sm:$0xff]  }
 0x473   :  { %2636 = vmatpush1.bf16.msra.mxu0 %v12754_v4  ;;  %2526 = vmatprep.subr.bf16.mxu1 %v12757_v5  ;;  %v12814_v4 = vld [vmem:[%s16783_s11 + $0x78] ss:$28 sps:$4 sm:$0xff]  }
 0x474   :  { %2637 = vmatprep.subr.bf16.mxu0 %v14363_v0  ;;  %v12822_v5 = vld [vmem:[%s16783_s11 + $0xb4] ss:$28 sps:$4 sm:$0xff]  }
 0x476   :  { %2527 = vmatpush1.bf16.msra.mxu1 %v12755_v6  ;;  %v12859_v6 = vld [vmem:[%s16783_s11 + $0x230] ss:$28 sps:$4 sm:$0xff]  }
 0x477   :  { %2638 = vmatpush1.bf16.msra.mxu0 %v12758_v11  ;;  %2528 = vmatprep.subr.bf16.mxu1 %v12761_v13  ;;  %v12867_v11 = vld [vmem:[%s16783_s11 + $0x26c] ss:$28 sps:$4 sm:$0xff]  }
 0x478   :  { %2639 = vmatprep.subr.bf16.mxu0 %v14363_v0  ;;  %v12820_v13 = vld [vmem:[%s16783_s11 + $0xb0] ss:$28 sps:$4 sm:$0xff]  }
 0x47a   :  { %2529 = vmatpush1.bf16.msra.mxu1 %v12759_v14  ;;  %v12828_v14 = vld [vmem:[%s16783_s11 + $0xec] ss:$28 sps:$4 sm:$0xff]  }
 0x47b   :  { %2640 = vmatpush1.bf16.msra.mxu0 %v12762_v15  ;;  %2530 = vmatprep.subr.bf16.mxu1 %v12765_v16  ;;  %v12865_v15 = vld [vmem:[%s16783_s11 + $0x268] ss:$28 sps:$4 sm:$0xff]  }
 0x47c   :  { %2641 = vmatprep.subr.bf16.mxu0 %v14363_v0  ;;  %v12873_v16 = vld [vmem:[%s16783_s11 + $0x2a4] ss:$28 sps:$4 sm:$0xff]  }
 0x47e   :  { %2531 = vmatpush1.bf16.msra.mxu1 %v12763_v17  ;;  %v12826_v17 = vld [vmem:[%s16783_s11 + $0xe8] ss:$28 sps:$4 sm:$0xff]  }
 0x47f   :  { %2642 = vmatpush1.bf16.msra.mxu0 %v12766_v18  ;;  %2532 = vmatprep.subr.bf16.mxu1 %v12769_v19  ;;  %v12834_v18 = vld [vmem:[%s16783_s11 + $0x124] ss:$28 sps:$4 sm:$0xff]  }
 0x480   :  { %2643 = vmatprep.subr.bf16.mxu0 %v14363_v0  ;;  %v12871_v19 = vld [vmem:[%s16783_s11 + $0x2a0] ss:$28 sps:$4 sm:$0xff]  }
 0x482   :  { %2533 = vmatpush1.bf16.msra.mxu1 %v12767_v20  ;;  %v12879_v20 = vld [vmem:[%s16783_s11 + $0x2dc] ss:$28 sps:$4 sm:$0xff]  }
 0x483   :  { %2644 = vmatpush1.bf16.msra.mxu0 %v12770_v21  ;;  %2545 = vmatprep.subr.bf16.mxu1 %v12773_v22  ;;  %v12832_v21 = vld [vmem:[%s16783_s11 + $0x120] ss:$28 sps:$4 sm:$0xff]  }
 0x484   :  { %2645 = vmatprep.subr.bf16.mxu0 %v14363_v0  ;;  %v12840_v22 = vld [vmem:[%s16783_s11 + $0x15c] ss:$28 sps:$4 sm:$0xff]  }
 0x485   :  { %2535 = vmatmul.mubr.bf16.vlgmr.msra.gmra.mrb[16].mxu1 %v14817_v41  ;;  %v12778_v41 = vld [vmem:[#allocation7 + $0x400] ss:$28 sps:$4 sm:$0xff]  }
 0x486   :  { %2546 = vmatpush1.bf16.msra.mxu1 %v12771_v23  ;;  %11043 = vmatprep.mubr.msk.bf16.mxu1 %vm2326_vm2, %v14823_v44  ;;  %v12805_v44 = vld [vmem:[%s16783_s11 + $0x38] ss:$28 sps:$4 sm:$0xff]  }
 0x487   :  { %2646 = vmatpush1.bf16.msra.mxu0 %v12774_v24  ;;  %2547 = vmatprep.subr.bf16.mxu1 %v12777_v25  ;;  %v12877_v23 = vld [vmem:[%s16783_s11 + $0x2d8] ss:$28 sps:$4 sm:$0xff]  }
 0x488   :  { %4932 = vmatprep.subr.bf16.mxu0 %v12801_v26  ;;  %v12885_v24 = vld [vmem:[%s16783_s11 + $0x314] ss:$28 sps:$4 sm:$0xff]  }
 0x489   :  { %v12838_v25 = vld [vmem:[%s16783_s11 + $0x158] ss:$28 sps:$4 sm:$0xff]  }
 0x48a   :  { %2662 = vmatmul.mubr.bf16.vlgmr.msra.gmra.mrb[16].mxu0 %v14819_v42  ;;  %2548 = vmatpush1.bf16.msra.mxu1 %v12775_v27  ;;  %v12846_v26 = vld [vmem:[%s16783_s11 + $0x194] ss:$28 sps:$4 sm:$0xff]  }
 0x48b   :  { %2549 = vmatprep.subr.bf16.mxu1 %v12780_v28  ;;  %4933 = vmatpush1.bf16.msra.mxu0 %v12799_v29  ;;  %v12883_v27 = vld [vmem:[%s16783_s11 + $0x310] ss:$28 sps:$4 sm:$0xff]  }
 0x48c   :  { %4934 = vmatprep.subr.bf16.mxu0 %v12807_v30  ;;  %v12891_v28 = vld [vmem:[%s16783_s11 + $0x34c] ss:$28 sps:$4 sm:$0xff]  }
 0x48d   :  { %v12844_v29 = vld [vmem:[%s16783_s11 + $0x190] ss:$28 sps:$4 sm:$0xff]  }
 0x48e   :  { %2550 = vmatpush1.bf16.msra.mxu1 %v12778_v41  ;;  %v12852_v30 = vld [vmem:[%s16783_s11 + $0x1cc] ss:$28 sps:$4 sm:$0xff]  }
 0x48f   :  { %2551 = vmatprep.subr.bf16.mxu1 %v12783_v31  ;;  %4935 = vmatpush1.bf16.msra.mxu0 %v12805_v44  ;;  %v12889_v41 = vld [vmem:[%s16783_s11 + $0x348] ss:$28 sps:$4 sm:$0xff]  }
 0x490   :  { %4936 = vmatprep.subr.bf16.mxu0 %v12813_v32  ;;  %v12897_v31 = vld [vmem:[%s16783_s11 + $0x384] ss:$28 sps:$4 sm:$0xff]  }
 0x491   :  { %v12850_v44 = vld [vmem:[%s16783_s11 + $0x1c8] ss:$28 sps:$4 sm:$0xff]  }
 0x492   :  { %2552 = vmatpush1.bf16.msra.mxu1 %v12781_v33  ;;  %v12858_v32 = vld [vmem:[%s16783_s11 + $0x204] ss:$28 sps:$4 sm:$0xff]  }
 0x493   :  { %2553 = vmatprep.subr.bf16.mxu1 %v12786_v34  ;;  %4937 = vmatpush1.bf16.msra.mxu0 %v12811_v35  ;;  %v12856_v33 = vld [vmem:[%s16783_s11 + $0x200] ss:$28 sps:$4 sm:$0xff]   ;;  %v12862_v35 = vld [vmem:[%s16783_s11 + $0x238] ss:$28 sps:$4 sm:$0xff]  }
 0x494   :  { %4938 = vmatprep.subr.bf16.mxu0 %v12819_v36  ;;  %v12864_v34 = vld [vmem:[%s16783_s11 + $0x23c] ss:$28 sps:$4 sm:$0xff]   ;;  %v12870_v36 = vld [vmem:[%s16783_s11 + $0x274] ss:$28 sps:$4 sm:$0xff]  }
 0x496   :  { %2554 = vmatpush1.bf16.msra.mxu1 %v12784_v37  ;;  %v12868_v37 = vld [vmem:[%s16783_s11 + $0x270] ss:$28 sps:$4 sm:$0xff]  }
 0x497   :  { %2555 = vmatprep.subr.bf16.mxu1 %v12789_v38  ;;  %4939 = vmatpush1.bf16.msra.mxu0 %v12817_v39  ;;  %v12876_v38 = vld [vmem:[%s16783_s11 + $0x2ac] ss:$28 sps:$4 sm:$0xff]  }
 0x498   :  { %4940 = vmatprep.subr.bf16.mxu0 %v12825_v40  ;;  %v12874_v39 = vld [vmem:[%s16783_s11 + $0x2a8] ss:$28 sps:$4 sm:$0xff]  }
 0x499   :  { %v12882_v40 = vld [vmem:[%s16783_s11 + $0x2e4] ss:$28 sps:$4 sm:$0xff]  }
 0x49a   :  { %2556 = vmatpush1.bf16.msra.mxu1 %v12787_v43  ;;  %v12880_v43 = vld [vmem:[%s16783_s11 + $0x2e0] ss:$28 sps:$4 sm:$0xff]  }
 0x49b   :  { %2557 = vmatprep.subr.bf16.mxu1 %v12792_v45  ;;  %4941 = vmatpush1.bf16.msra.mxu0 %v12823_v46  ;;  %v12888_v45 = vld [vmem:[%s16783_s11 + $0x31c] ss:$28 sps:$4 sm:$0xff]  }
 0x49c   :  { %4942 = vmatprep.subr.bf16.mxu0 %v12831_v47  ;;  %v12886_v46 = vld [vmem:[%s16783_s11 + $0x318] ss:$28 sps:$4 sm:$0xff]  }
 0x49d   :  { %v12894_v47 = vld [vmem:[%s16783_s11 + $0x354] ss:$28 sps:$4 sm:$0xff]  }
 0x49e   :  { %2558 = vmatpush1.bf16.msra.mxu1 %v12790_v48  ;;  %v12892_v48 = vld [vmem:[%s16783_s11 + $0x350] ss:$28 sps:$4 sm:$0xff]  }
 0x49f   :  { %2559 = vmatprep.subr.bf16.mxu1 %v12795_v49  ;;  %4943 = vmatpush1.bf16.msra.mxu0 %v12829_v50  ;;  %v12900_v49 = vld [vmem:[%s16783_s11 + $0x38c] ss:$28 sps:$4 sm:$0xff]   ;;  %v15055_v50 = vld [vmem:[%s16782_s10] sm:$0x7f] }
 0x4a0   :  { %4944 = vmatprep.subr.bf16.mxu0 %v12837_v51  ;;  %v1394_v51 = vrot.slane %v15055_v50, %v14627_v9 }
 0x4a2   :  { %2560 = vmatpush1.bf16.msra.mxu1 %v12793_v52  ;;  %v1402_v52 = vrot.slane %v15055_v50, %v14805_v8 }
 0x4a3   :  { %2561 = vmatprep.subr.bf16.mxu1 %v12798_v53  ;;  %4945 = vmatpush1.bf16.msra.mxu0 %v12835_v54  ;;  %v1398_v53 = vrot.slane %v15055_v50, %v14630_v10  ;;  %v1406_v54 = vrot.slane %v15055_v50, %v14811_v12 }
 0x4a4   :  { %4946 = vmatprep.subr.bf16.mxu0 %v12843_v55 }
 0x4a6   :  { %2562 = vmatpush1.bf16.msra.mxu1 %v12796_v56 }
 0x4a7   :  { %5104 = vmatprep.subr.bf16.mxu1 %v12804_v57  ;;  %4947 = vmatpush1.bf16.msra.mxu0 %v12841_v58 }
 0x4a8   :  { %4948 = vmatprep.subr.bf16.mxu0 %v12849_v59 }
 0x4a9   :  { %2578 = vmatmul.mubr.bf16.vlgmr.msra.gmra.mrb[16].mxu1 %v14819_v42  ;;  %v12861_v42 = vld [vmem:[%s16783_s11 + $0x234] ss:$28 sps:$4 sm:$0xff]  }
 0x4aa   :  { %5105 = vmatpush1.bf16.msra.mxu1 %v12802_v60 }
 0x4ab   :  { %5106 = vmatprep.subr.bf16.mxu1 %v12810_v61  ;;  %4949 = vmatpush1.bf16.msra.mxu0 %v12847_v62 }
 0x4ac   :  { %4950 = vmatprep.subr.bf16.mxu0 %v12855_v63 }
 0x4ae   :  { %5107 = vmatpush1.bf16.msra.mxu1 %v12808_v1 }
 0x4af   :  { %5108 = vmatprep.subr.bf16.mxu1 %v12816_v2  ;;  %4951 = vmatpush1.bf16.msra.mxu0 %v12853_v3 }
 0x4b0   :  { %4952 = vmatprep.subr.bf16.mxu0 %v12861_v42 }
 0x4b2   :  { %5109 = vmatpush1.bf16.msra.mxu1 %v12814_v4 }
 0x4b3   :  { %5110 = vmatprep.subr.bf16.mxu1 %v12822_v5  ;;  %4953 = vmatpush1.bf16.msra.mxu0 %v12859_v6 }
 0x4b4   :  { %4954 = vmatprep.subr.bf16.mxu0 %v12867_v11 }
 0x4b6   :  { %5111 = vmatpush1.bf16.msra.mxu1 %v12820_v13 }
 0x4b7   :  { %5112 = vmatprep.subr.bf16.mxu1 %v12828_v14  ;;  %4955 = vmatpush1.bf16.msra.mxu0 %v12865_v15 }
 0x4b8   :  { %4956 = vmatprep.subr.bf16.mxu0 %v12873_v16 }
 0x4ba   :  { %5113 = vmatpush1.bf16.msra.mxu1 %v12826_v17 }
 0x4bb   :  { %5114 = vmatprep.subr.bf16.mxu1 %v12834_v18  ;;  %4957 = vmatpush1.bf16.msra.mxu0 %v12871_v19 }
 0x4bc   :  { %4958 = vmatprep.subr.bf16.mxu0 %v12879_v20 }
 0x4be   :  { %5115 = vmatpush1.bf16.msra.mxu1 %v12832_v21 }
 0x4bf   :  { %5116 = vmatprep.subr.bf16.mxu1 %v12840_v22  ;;  %4959 = vmatpush1.bf16.msra.mxu0 %v12877_v23 }
 0x4c0   :  { %4960 = vmatprep.subr.bf16.mxu0 %v12885_v24  ;;  %v12895_v24 = vld [vmem:[%s16783_s11 + $0x380] ss:$28 sps:$4 sm:$0xff]  }
 0x4c2   :  { %5117 = vmatpush1.bf16.msra.mxu1 %v12838_v25  ;;  %v12898_v25 = vld [vmem:[%s16783_s11 + $0x388] ss:$28 sps:$4 sm:$0xff]  }
 0x4c3   :  { %5118 = vmatprep.subr.bf16.mxu1 %v12846_v26  ;;  %4961 = vmatpush1.bf16.msra.mxu0 %v12883_v27  ;;  %v12903_v26 = vld [vmem:[%s16783_s11 + $0x3bc] ss:$28 sps:$4 sm:$0xff]   ;;  %v12906_v27 = vld [vmem:[%s16783_s11 + $0x3c4] ss:$28 sps:$4 sm:$0xff]  }
 0x4c4   :  { %4962 = vmatprep.subr.bf16.mxu0 %v12891_v28  ;;  %v12901_v28 = vld [vmem:[%s16783_s11 + $0x3b8] ss:$28 sps:$4 sm:$0xff]  }
 0x4c6   :  { %5119 = vmatpush1.bf16.msra.mxu1 %v12844_v29  ;;  %v12904_v29 = vld [vmem:[%s16783_s11 + $0x3c0] ss:$28 sps:$4 sm:$0xff]  }
 0x4c7   :  { %5120 = vmatprep.subr.bf16.mxu1 %v12852_v30  ;;  %4963 = vmatpush1.bf16.msra.mxu0 %v12889_v41  ;;  %v12909_v30 = vld [vmem:[%s16783_s11 + $0x3f4] ss:$28 sps:$4 sm:$0xff]   ;;  %v12912_v41 = vld [vmem:[%s16783_s11 + $0x3fc] ss:$28 sps:$4 sm:$0xff]  }
 0x4c8   :  { %4975 = vmatprep.subr.bf16.mxu0 %v12897_v31  ;;  %v12907_v31 = vld [vmem:[%s16783_s11 + $0x3f0] ss:$28 sps:$4 sm:$0xff]  }
 0x4ca   :  { %5121 = vmatpush1.bf16.msra.mxu1 %v12850_v44  ;;  %v12910_v44 = vld [vmem:[%s16783_s11 + $0x3f8] ss:$28 sps:$4 sm:$0xff]  }
 0x4cb   :  { %5122 = vmatprep.subr.bf16.mxu1 %v12858_v32  ;;  %v12915_v32 = vld [vmem:[%s16783_s11 + $0x42c] ss:$28 sps:$4 sm:$0xff]  }
 0x4ce   :  { %5123 = vmatpush1.bf16.msra.mxu1 %v12856_v33  ;;  %v12918_v33 = vld [vmem:[%s16783_s11 + $0x434] ss:$28 sps:$4 sm:$0xff]  }
 0x4cf   :  { %5124 = vmatprep.subr.bf16.mxu1 %v12864_v34  ;;  %v12913_v34 = vld [vmem:[%s16783_s11 + $0x428] ss:$28 sps:$4 sm:$0xff]  }
 0x4d2   :  { %5125 = vmatpush1.bf16.msra.mxu1 %v12862_v35  ;;  %v12916_v35 = vld [vmem:[%s16783_s11 + $0x430] ss:$28 sps:$4 sm:$0xff]  }
 0x4d3   :  { %5126 = vmatprep.subr.bf16.mxu1 %v12870_v36  ;;  %v12921_v36 = vld [vmem:[%s16783_s11 + $0x464] ss:$28 sps:$4 sm:$0xff]  }
 0x4d6   :  { %5127 = vmatpush1.bf16.msra.mxu1 %v12868_v37  ;;  %v12924_v37 = vld [vmem:[%s16783_s11 + $0x46c] ss:$28 sps:$4 sm:$0xff]  }
 0x4d7   :  { %5128 = vmatprep.subr.bf16.mxu1 %v12876_v38  ;;  %v12919_v38 = vld [vmem:[%s16783_s11 + $0x460] ss:$28 sps:$4 sm:$0xff]  }
 0x4da   :  { %5129 = vmatpush1.bf16.msra.mxu1 %v12874_v39  ;;  %v12922_v39 = vld [vmem:[%s16783_s11 + $0x468] ss:$28 sps:$4 sm:$0xff]  }
 0x4db   :  { %5130 = vmatprep.subr.bf16.mxu1 %v12882_v40  ;;  %v12927_v40 = vld [vmem:[%s16783_s11 + $0x49c] ss:$28 sps:$4 sm:$0xff]  }
 0x4de   :  { %5131 = vmatpush1.bf16.msra.mxu1 %v12880_v43  ;;  %v12930_v43 = vld [vmem:[%s16783_s11 + $0x4a4] ss:$28 sps:$4 sm:$0xff]  }
 0x4df   :  { %5132 = vmatprep.subr.bf16.mxu1 %v12888_v45  ;;  %v12925_v45 = vld [vmem:[%s16783_s11 + $0x498] ss:$28 sps:$4 sm:$0xff]  }
 0x4e2   :  { %5133 = vmatpush1.bf16.msra.mxu1 %v12886_v46  ;;  %v12928_v46 = vld [vmem:[%s16783_s11 + $0x4a0] ss:$28 sps:$4 sm:$0xff]  }
 0x4e3   :  { %5134 = vmatprep.subr.bf16.mxu1 %v12894_v47  ;;  %v12933_v47 = vld [vmem:[%s16783_s11 + $0x4d4] ss:$28 sps:$4 sm:$0xff]  }
 0x4e6   :  { %5135 = vmatpush1.bf16.msra.mxu1 %v12892_v48  ;;  %v12936_v48 = vld [vmem:[%s16783_s11 + $0x4dc] ss:$28 sps:$4 sm:$0xff]  }
 0x4e7   :  { %5147 = vmatprep.subr.bf16.mxu1 %v12900_v49  ;;  %v12931_v49 = vld [vmem:[%s16783_s11 + $0x4d0] ss:$28 sps:$4 sm:$0xff]  }
 0x518   :  { %v2407_v55 = vpop.f32.mrb[12].mxu1  ;;  %v2493_v56 = vpop.f32.mrb[8].mxu0 }
 0x519   :  { %v12197_v57 = vadd.f32 %v2407_v55, %v1394_v51  ;;  %v12201_v58 = vadd.f32 %v2493_v56, %v1402_v52  ;;  %v2409_v59 = vpop.f32.mrb[13].mxu1  ;;  %v2495_v60 = vpop.f32.mrb[9].mxu0 }
 0x51a   :  { %v12198_v61 = vadd.f32 %v2409_v59, %v1398_v53  ;;  %v12202_v62 = vadd.f32 %v2495_v60, %v1406_v54  ;;  %v2411_v63 = vpop.f32.mrb[14].mxu1  ;;  %v2497_v1 = vpop.f32.mrb[10].mxu0  ;;  %v12937_v59 = vld [vmem:[%s16783_s11 + $0x508] ss:$28 sps:$4 sm:$0xff]   ;;  %v12940_v60 = vld [vmem:[%s16783_s11 + $0x510] ss:$28 sps:$4 sm:$0xff]  }
 0x51b   :  { %v12199_v2 = vadd.f32 %v2411_v63, %v1394_v51  ;;  %v12203_v3 = vadd.f32 %v2497_v1, %v1402_v52  ;;  %v2413_v42 = vpop.f32.mrb[15].mxu1  ;;  %v2499_v4 = vpop.f32.mrb[11].mxu0  ;;  %v2670_v11 = vmax.f32 %v12197_v57, 0.0  ;;  %v2672_v13 = vmax.f32 %v12201_v58, 0.0  ;;  %v12934_v51 = vld [vmem:[%s16783_s11 + $0x4d8] ss:$28 sps:$4 sm:$0xff]  }
 0x51c   :  { %v12200_v5 = vadd.f32 %v2413_v42, %v1398_v53  ;;  %v12204_v6 = vadd.f32 %v2499_v4, %v1406_v54  ;;  %v2671_v16 = vmax.f32 %v12198_v61, 0.0  ;;  %v2673_v17 = vmax.f32 %v12202_v62, 0.0  ;;  %v12939_v53 = vld [vmem:[%s16783_s11 + $0x50c] ss:$28 sps:$4 sm:$0xff]   ;;  %v12942_v54 = vld [vmem:[%s16783_s11 + $0x514] ss:$28 sps:$4 sm:$0xff]  }
 0x51d   :  { %v2677_v14 = vmax.f32 %v12199_v2, 0.0  ;;  %v2679_v15 = vmax.f32 %v12203_v3, 0.0  ;;  %v12945_v62 = vld [vmem:[%s16783_s11 + $0x544] ss:$28 sps:$4 sm:$0xff]   ;;  %v12948_v63 = vld [vmem:[%s16783_s11 + $0x54c] ss:$28 sps:$4 sm:$0xff]  }
 0x51e   :  { %v2678_v18 = vmax.f32 %v12200_v5, 0.0  ;;  %v2680_v19 = vmax.f32 %v12204_v6, 0.0  ;;  %v12943_v1 = vld [vmem:[%s16783_s11 + $0x540] ss:$28 sps:$4 sm:$0xff]   ;;  %v12946_v2 = vld [vmem:[%s16783_s11 + $0x548] ss:$28 sps:$4 sm:$0xff]  }
 0x51f   :  { %v15065_v20 = vpack.c.bf16 %v2677_v14, %v2670_v11  ;;  %v15067_v21 = vpack.c.bf16 %v2679_v15, %v2672_v13  ;;  %v12951_v3 = vld [vmem:[%s16783_s11 + $0x57c] ss:$28 sps:$4 sm:$0xff]   ;;  %v12954_v42 = vld [vmem:[%s16783_s11 + $0x584] ss:$28 sps:$4 sm:$0xff]   ;;  %v12957_v6 = vld [vmem:[%s16783_s11 + $0x5b4] ss:$28 sps:$4 sm:$0xff]  }
 0x520   :  { %v15069_v22 = vpack.c.bf16 %v2678_v18, %v2671_v16  ;;  %v15071_v23 = vpack.c.bf16 %v2680_v19, %v2673_v17  ;;  %v12949_v4 = vld [vmem:[%s16783_s11 + $0x578] ss:$28 sps:$4 sm:$0xff]   ;;  %v12952_v5 = vld [vmem:[%s16783_s11 + $0x580] ss:$28 sps:$4 sm:$0xff]   ;;  %v12955_v13 = vld [vmem:[%s16783_s11 + $0x5b0] ss:$28 sps:$4 sm:$0xff]  }
 0x521   :  { %v12960_v11 = vld [vmem:[%s16783_s11 + $0x5bc] ss:$28 sps:$4 sm:$0xff]   ;;  %v12963_v15 = vld [vmem:[%s16783_s11 + $0x5ec] ss:$28 sps:$4 sm:$0xff]   ;;  %v12966_v16 = vld [vmem:[%s16783_s11 + $0x5f4] ss:$28 sps:$4 sm:$0xff]  }
 0x522   :  { %4964 = vmatprep.mubr.bf16.mxu0 %v15069_v22  ;;  %5136 = vmatprep.mubr.bf16.mxu1 %v15069_v22  ;;  %v12958_v14 = vld [vmem:[%s16783_s11 + $0x5b8] ss:$28 sps:$4 sm:$0xff]   ;;  %v12961_v17 = vld [vmem:[%s16783_s11 + $0x5e8] ss:$28 sps:$4 sm:$0xff]   ;;  %v12964_v18 = vld [vmem:[%s16783_s11 + $0x5f0] ss:$28 sps:$4 sm:$0xff]  }
 0x523   :  { %4965 = vmatmul.mubr.bf16.vlgmr.msra.gmra.mrb[20].mxu0 %v15065_v20  ;;  %5137 = vmatmul.mubr.bf16.vlgmr.msra.gmra.mrb[20].mxu1 %v15065_v20  ;;  %v12969_v19 = vld [vmem:[%s16783_s11 + $0x624] ss:$28 sps:$4 sm:$0xff]  }
 0x524   :  { %4976 = vmatpush1.bf16.msra.mxu0 %v12895_v24  ;;  %5148 = vmatpush1.bf16.msra.mxu1 %v12898_v25  ;;  %v12972_v24 = vld [vmem:[%s16783_s11 + $0x62c] ss:$28 sps:$4 sm:$0xff]   ;;  %v12967_v25 = vld [vmem:[%s16783_s11 + $0x620] ss:$28 sps:$4 sm:$0xff]  }
 0x525   :  { %5007 = vmatprep.mubr.bf16.mxu0 %v15071_v23  ;;  %5179 = vmatprep.mubr.bf16.mxu1 %v15071_v23 }
 0x526   :  { %4977 = vmatprep.subr.bf16.mxu0 %v12903_v26  ;;  %5149 = vmatprep.subr.bf16.mxu1 %v12906_v27  ;;  %v12970_v26 = vld [vmem:[%s16783_s11 + $0x628] ss:$28 sps:$4 sm:$0xff]   ;;  %v12975_v27 = vld [vmem:[%s16783_s11 + $0x65c] ss:$28 sps:$4 sm:$0xff]  }
 0x528   :  { %4978 = vmatpush1.bf16.msra.mxu0 %v12901_v28  ;;  %5150 = vmatpush1.bf16.msra.mxu1 %v12904_v29  ;;  %v12978_v28 = vld [vmem:[%s16783_s11 + $0x664] ss:$28 sps:$4 sm:$0xff]   ;;  %v12973_v29 = vld [vmem:[%s16783_s11 + $0x658] ss:$28 sps:$4 sm:$0xff]  }
 0x529   :  { %4979 = vmatprep.subr.bf16.mxu0 %v12909_v30  ;;  %5151 = vmatprep.subr.bf16.mxu1 %v12912_v41  ;;  %v12976_v30 = vld [vmem:[%s16783_s11 + $0x660] ss:$28 sps:$4 sm:$0xff]   ;;  %v15246_v41 = vsub.s32 6, %v14621_v7 }
 0x52c   :  { %4980 = vmatpush1.bf16.msra.mxu0 %v12907_v31  ;;  %5152 = vmatpush1.bf16.msra.mxu1 %v12910_v44  ;;  %v12981_v31 = vld [vmem:[%s16783_s11 + $0x694] ss:$28 sps:$4 sm:$0xff]   ;;  %v12984_v44 = vld [vmem:[%s16783_s11 + $0x69c] ss:$28 sps:$4 sm:$0xff]  }
 0x52d   :  { %4981 = vmatprep.subr.bf16.mxu0 %v12915_v32  ;;  %5153 = vmatprep.subr.bf16.mxu1 %v12918_v33  ;;  %v12979_v32 = vld [vmem:[%s16783_s11 + $0x690] ss:$28 sps:$4 sm:$0xff]   ;;  %v12982_v33 = vld [vmem:[%s16783_s11 + $0x698] ss:$28 sps:$4 sm:$0xff]  }
 0x530   :  { %4982 = vmatpush1.bf16.msra.mxu0 %v12913_v34  ;;  %5154 = vmatpush1.bf16.msra.mxu1 %v12916_v35  ;;  %v1418_v34 = vrot.slane %v15055_v50, %v15246_v41  ;;  %v12987_v35 = vld [vmem:[%s16783_s11 + $0x6cc] ss:$28 sps:$4 sm:$0xff]  }
 0x531   :  { %4983 = vmatprep.subr.bf16.mxu0 %v12921_v36  ;;  %5155 = vmatprep.subr.bf16.mxu1 %v12924_v37  ;;  %v12990_v36 = vld [vmem:[%s16783_s11 + $0x6d4] ss:$28 sps:$4 sm:$0xff]  }
 0x534   :  { %4984 = vmatpush1.bf16.msra.mxu0 %v12919_v38  ;;  %5156 = vmatpush1.bf16.msra.mxu1 %v12922_v39  ;;  %v12985_v38 = vld [vmem:[%s16783_s11 + $0x6c8] ss:$28 sps:$4 sm:$0xff]   ;;  %v12988_v39 = vld [vmem:[%s16783_s11 + $0x6d0] ss:$28 sps:$4 sm:$0xff]  }
 0x535   :  { %4985 = vmatprep.subr.bf16.mxu0 %v12927_v40  ;;  %5157 = vmatprep.subr.bf16.mxu1 %v12930_v43  ;;  %v12993_v43 = vld [vmem:[%s16783_s11 + $0x704] ss:$28 sps:$4 sm:$0xff]  }
 0x538   :  { %4986 = vmatpush1.bf16.msra.mxu0 %v12925_v45  ;;  %5158 = vmatpush1.bf16.msra.mxu1 %v12928_v46  ;;  %v12996_v45 = vld [vmem:[%s16783_s11 + $0x70c] ss:$28 sps:$4 sm:$0xff]  }
 0x539   :  { %v12037_v52 = vpop.f32.mrb[12].mxu0  ;;  %4987 = vmatprep.subr.bf16.mxu0 %v12933_v47  ;;  %5159 = vmatprep.subr.bf16.mxu1 %v12936_v48 }
 0x53a   :  { %v12038_v55 = vpop.f32.mrb[13].mxu0 }
 0x53b   :  { %v15163_v56 = vadd.f32 %v12038_v55, %v12037_v52  ;;  %v12040_v57 = vpop.f32.mrb[14].mxu0  ;;  %v12999_v55 = vld [vmem:[%s16783_s11 + $0x73c] ss:$28 sps:$4 sm:$0xff]  }
 0x53c   :  { %v12041_v58 = vpop.f32.mrb[15].mxu0  ;;  %4988 = vmatpush1.bf16.msra.mxu0 %v12931_v49  ;;  %5160 = vmatpush1.bf16.msra.mxu1 %v12934_v51 }
 0x53d   :  { %v15171_v61 = vadd.f32 %v12041_v58, %v12040_v57  ;;  %4989 = vmatprep.subr.bf16.mxu0 %v12939_v53  ;;  %5161 = vmatprep.subr.bf16.mxu1 %v12942_v54  ;;  %v2623_v37 = vadd.f32 %v15163_v56, %v1418_v34  ;;  %v12991_v53 = vld [vmem:[%s16783_s11 + $0x700] ss:$28 sps:$4 sm:$0xff]   ;;  %v12994_v54 = vld [vmem:[%s16783_s11 + $0x708] ss:$28 sps:$4 sm:$0xff]  }
 0x53e   :  { %v13002_v56 = vld [vmem:[%s16783_s11 + $0x744] ss:$28 sps:$4 sm:$0xff]  }
 0x53f   :  { %v2626_v48 = vadd.f32 %v15171_v61, %v1418_v34  ;;  %v13000_v61 = vld [vmem:[%s16783_s11 + $0x740] ss:$28 sps:$4 sm:$0xff]  }
 0x540   :  { %4990 = vmatpush1.bf16.msra.mxu0 %v12937_v59  ;;  %5162 = vmatpush1.bf16.msra.mxu1 %v12940_v60  ;;  %v12997_v60 = vld [vmem:[%s16783_s11 + $0x738] ss:$28 sps:$4 sm:$0xff]  }
 0x541   :  { %4991 = vmatprep.subr.bf16.mxu0 %v12945_v62  ;;  %5163 = vmatprep.subr.bf16.mxu1 %v12948_v63  ;;  %v13005_v62 = vld [vmem:[%s16783_s11 + $0x774] ss:$28 sps:$4 sm:$0xff]   ;;  %v13008_v63 = vld [vmem:[%s16783_s11 + $0x77c] ss:$28 sps:$4 sm:$0xff]  }
 0x544   :  { %4992 = vmatpush1.bf16.msra.mxu0 %v12943_v1  ;;  %5164 = vmatpush1.bf16.msra.mxu1 %v12946_v2  ;;  %v13003_v1 = vld [vmem:[%s16783_s11 + $0x770] ss:$28 sps:$4 sm:$0xff]   ;;  %v13006_v2 = vld [vmem:[%s16783_s11 + $0x778] ss:$28 sps:$4 sm:$0xff]  }
 0x545   :  { %4993 = vmatprep.subr.bf16.mxu0 %v12951_v3  ;;  %5165 = vmatprep.subr.bf16.mxu1 %v12954_v42  ;;  %v13011_v3 = vld [vmem:[%s16783_s11 + $0x7ac] ss:$28 sps:$4 sm:$0xff]   ;;  %v13014_v42 = vld [vmem:[%s16783_s11 + $0x7b4] ss:$28 sps:$4 sm:$0xff]  }
 0x548   :  { %4994 = vmatpush1.bf16.msra.mxu0 %v12949_v4  ;;  %5166 = vmatpush1.bf16.msra.mxu1 %v12952_v5  ;;  %v13009_v4 = vld [vmem:[%s16783_s11 + $0x7a8] ss:$28 sps:$4 sm:$0xff]   ;;  %v13012_v5 = vld [vmem:[%s16783_s11 + $0x7b0] ss:$28 sps:$4 sm:$0xff]  }
 0x549   :  { %4995 = vmatprep.subr.bf16.mxu0 %v12957_v6  ;;  %5167 = vmatprep.subr.bf16.mxu1 %v12960_v11  ;;  %v13017_v6 = vld [vmem:[%s16783_s11 + $0x7e4] ss:$28 sps:$4 sm:$0xff]   ;;  %v13020_v11 = vld [vmem:[%s16783_s11 + $0x7ec] ss:$28 sps:$4 sm:$0xff]  }
 0x54c   :  { %4996 = vmatpush1.bf16.msra.mxu0 %v12955_v13  ;;  %5168 = vmatpush1.bf16.msra.mxu1 %v12958_v14  ;;  %v13015_v13 = vld [vmem:[%s16783_s11 + $0x7e0] ss:$28 sps:$4 sm:$0xff]   ;;  %v13018_v14 = vld [vmem:[%s16783_s11 + $0x7e8] ss:$28 sps:$4 sm:$0xff]  }
 0x54d   :  { %4997 = vmatprep.subr.bf16.mxu0 %v12963_v15  ;;  %5169 = vmatprep.subr.bf16.mxu1 %v12966_v16  ;;  %v13023_v15 = vld [vmem:[%s16783_s11 + $0x81c] ss:$28 sps:$4 sm:$0xff]   ;;  %v13026_v16 = vld [vmem:[%s16783_s11 + $0x824] ss:$28 sps:$4 sm:$0xff]  }
 0x550   :  { %4998 = vmatpush1.bf16.msra.mxu0 %v12961_v17  ;;  %5170 = vmatpush1.bf16.msra.mxu1 %v12964_v18  ;;  %v13021_v17 = vld [vmem:[%s16783_s11 + $0x818] ss:$28 sps:$4 sm:$0xff]   ;;  %v13024_v18 = vld [vmem:[%s16783_s11 + $0x820] ss:$28 sps:$4 sm:$0xff]  }
 0x551   :  { %4999 = vmatprep.subr.bf16.mxu0 %v12969_v19  ;;  %5171 = vmatprep.subr.bf16.mxu1 %v12972_v24  ;;  %v13029_v19 = vld [vmem:[%s16783_s11 + $0x854] ss:$28 sps:$4 sm:$0xff]   ;;  %v13032_v24 = vld [vmem:[%s16783_s11 + $0x85c] ss:$28 sps:$4 sm:$0xff]  }
 0x554   :  { %5000 = vmatpush1.bf16.msra.mxu0 %v12967_v25  ;;  %5172 = vmatpush1.bf16.msra.mxu1 %v12970_v26  ;;  %v15359_v25 = vsub.s32 4, %v14621_v7  ;;  %v15362_v26 = vsub.s32 5, %v14621_v7  ;;  %v13035_v7 = vld [vmem:[%s16783_s11 + $0x88c] ss:$28 sps:$4 sm:$0xff]  }
 0x555   :  { %5001 = vmatprep.subr.bf16.mxu0 %v12975_v27  ;;  %5173 = vmatprep.subr.bf16.mxu1 %v12978_v28  ;;  %v13027_v27 = vld [vmem:[%s16783_s11 + $0x850] ss:$28 sps:$4 sm:$0xff]   ;;  %v13030_v28 = vld [vmem:[%s16783_s11 + $0x858] ss:$28 sps:$4 sm:$0xff]  }
 0x558   :  { %5002 = vmatpush1.bf16.msra.mxu0 %v12973_v29  ;;  %5174 = vmatpush1.bf16.msra.mxu1 %v12976_v30  ;;  %v1410_v29 = vrot.slane %v15055_v50, %v15359_v25  ;;  %v13038_v30 = vld [vmem:[%s16783_s11 + $0x894] ss:$28 sps:$4 sm:$0xff]  }
 0x559   :  { %5003 = vmatprep.subr.bf16.mxu0 %v12981_v31  ;;  %5175 = vmatprep.subr.bf16.mxu1 %v12984_v44  ;;  %v1414_v31 = vrot.slane %v15055_v50, %v15362_v26  ;;  %v13044_v50 = vld [vmem:[%s16783_s11 + $0x8cc] ss:$28 sps:$4 sm:$0xff]  }
 0x55c   :  { %5004 = vmatpush1.bf16.msra.mxu0 %v12979_v32  ;;  %5176 = vmatpush1.bf16.msra.mxu1 %v12982_v33  ;;  %v13033_v32 = vld [vmem:[%s16783_s11 + $0x888] ss:$28 sps:$4 sm:$0xff]   ;;  %v13036_v33 = vld [vmem:[%s16783_s11 + $0x890] ss:$28 sps:$4 sm:$0xff]  }
 0x55d   :  { %v2663_v40 = vpop.f32.mrb[16].mxu0  ;;  %5005 = vmatprep.subr.bf16.mxu0 %v12987_v35  ;;  %5177 = vmatprep.subr.bf16.mxu1 %v12990_v36  ;;  %v13041_v36 = vld [vmem:[%s16783_s11 + $0x8c4] ss:$28 sps:$4 sm:$0xff]  }
 0x55e   :  { %v2664_v46 = vadd.f32 %v2663_v40, %v2623_v37  ;;  %v2665_v47 = vpop.f32.mrb[17].mxu0 }
 0x55f   :  { %v2666_v49 = vpop.f32.mrb[18].mxu0 }
 0x560   :  { %v2667_v51 = vadd.f32 %v2666_v49, %v2626_v48  ;;  %v2668_v52 = vpop.f32.mrb[19].mxu0  ;;  %5006 = vmatpush1.bf16.msra.mxu0 %v12985_v38  ;;  %5178 = vmatpush1.bf16.msra.mxu1 %v12988_v39  ;;  %v2676_v57 = vmax.f32 %v2664_v46, 0.0  ;;  %v13042_v46 = vld [vmem:[%s16783_s11 + $0x8c8] ss:$28 sps:$4 sm:$0xff]   ;;  %v13047_v49 = vld [vmem:[%s16783_s11 + $0x8fc] ss:$28 sps:$4 sm:$0xff]  }
 0x561   :  { %5018 = vmatprep.subr.bf16.mxu0 %v12993_v43  ;;  %5190 = vmatprep.subr.bf16.mxu1 %v12996_v45  ;;  %v13039_v45 = vld [vmem:[%s16783_s11 + $0x8c0] ss:$28 sps:$4 sm:$0xff]  }
 0x562   :  { %v2683_v58 = vmax.f32 %v2667_v51, 0.0  ;;  %v13050_v51 = vld [vmem:[%s16783_s11 + $0x904] ss:$28 sps:$4 sm:$0xff]  }
 0x563   :  { %5008 = vmatmul.mubr.bf16.vlgmr.msra.gmra.mrb[20].mxu0 %v15067_v21  ;;  %5180 = vmatmul.mubr.bf16.vlgmr.msra.gmra.mrb[20].mxu1 %v15067_v21 }
 0x564   :  { %v15296_v59 = vpack.c.bf16 %v2683_v58, %v2676_v57  ;;  %5019 = vmatpush1.bf16.msra.mxu0 %v12991_v53  ;;  %5191 = vmatpush1.bf16.msra.mxu1 %v12994_v54  ;;  %v13048_v57 = vld [vmem:[%s16783_s11 + $0x900] ss:$28 sps:$4 sm:$0xff]   ;;  %v13053_v58 = vld [vmem:[%s16783_s11 + $0x934] ss:$28 sps:$4 sm:$0xff]  }
 0x565   :  { %5020 = vmatprep.subr.bf16.mxu0 %v12999_v55  ;;  %5192 = vmatprep.subr.bf16.mxu1 %v13002_v56  ;;  %v13045_v56 = vld [vmem:[%s16783_s11 + $0x8f8] ss:$28 sps:$4 sm:$0xff]  }
 0x568   :  { %5021 = vmatpush1.bf16.msra.mxu0 %v12997_v60  ;;  %5193 = vmatpush1.bf16.msra.mxu1 %v13000_v61  ;;  %v13056_v60 = vld [vmem:[%s16783_s11 + $0x93c] ss:$28 sps:$4 sm:$0xff]   ;;  %v13051_v61 = vld [vmem:[%s16783_s11 + $0x930] ss:$28 sps:$4 sm:$0xff]  }
 0x569   :  { %5022 = vmatprep.subr.bf16.mxu0 %v13005_v62  ;;  %5194 = vmatprep.subr.bf16.mxu1 %v13008_v63  ;;  %v13054_v62 = vld [vmem:[%s16783_s11 + $0x938] ss:$28 sps:$4 sm:$0xff]   ;;  %v13059_v63 = vld [vmem:[%s16783_s11 + $0x96c] ss:$28 sps:$4 sm:$0xff]  }
 0x56c   :  { %5023 = vmatpush1.bf16.msra.mxu0 %v13003_v1  ;;  %5195 = vmatpush1.bf16.msra.mxu1 %v13006_v2  ;;  %v13062_v1 = vld [vmem:[%s16783_s11 + $0x974] ss:$28 sps:$4 sm:$0xff]   ;;  %v13057_v2 = vld [vmem:[%s16783_s11 + $0x968] ss:$28 sps:$4 sm:$0xff]  }
 0x56d   :  { %5024 = vmatprep.subr.bf16.mxu0 %v13011_v3  ;;  %5196 = vmatprep.subr.bf16.mxu1 %v13014_v42  ;;  %v13060_v3 = vld [vmem:[%s16783_s11 + $0x970] ss:$28 sps:$4 sm:$0xff]   ;;  %v13065_v42 = vld [vmem:[%s16783_s11 + $0x9a4] ss:$28 sps:$4 sm:$0xff]  }
 0x570   :  { %5025 = vmatpush1.bf16.msra.mxu0 %v13009_v4  ;;  %5197 = vmatpush1.bf16.msra.mxu1 %v13012_v5  ;;  %v13068_v4 = vld [vmem:[%s16783_s11 + $0x9ac] ss:$28 sps:$4 sm:$0xff]   ;;  %v13063_v5 = vld [vmem:[%s16783_s11 + $0x9a0] ss:$28 sps:$4 sm:$0xff]  }
 0x571   :  { %5026 = vmatprep.subr.bf16.mxu0 %v13017_v6  ;;  %5198 = vmatprep.subr.bf16.mxu1 %v13020_v11  ;;  %v13066_v6 = vld [vmem:[%s16783_s11 + $0x9a8] ss:$28 sps:$4 sm:$0xff]   ;;  %v13071_v11 = vld [vmem:[%s16783_s11 + $0x9dc] ss:$28 sps:$4 sm:$0xff]  }
 0x574   :  { %5027 = vmatpush1.bf16.msra.mxu0 %v13015_v13  ;;  %5199 = vmatpush1.bf16.msra.mxu1 %v13018_v14  ;;  %v13074_v13 = vld [vmem:[%s16783_s11 + $0x9e4] ss:$28 sps:$4 sm:$0xff]   ;;  %v13069_v14 = vld [vmem:[%s16783_s11 + $0x9d8] ss:$28 sps:$4 sm:$0xff]  }
 0x575   :  { %5028 = vmatprep.subr.bf16.mxu0 %v13023_v15  ;;  %5200 = vmatprep.subr.bf16.mxu1 %v13026_v16  ;;  %v13072_v15 = vld [vmem:[%s16783_s11 + $0x9e0] ss:$28 sps:$4 sm:$0xff]   ;;  %v13077_v16 = vld [vmem:[%s16783_s11 + $0xa14] ss:$28 sps:$4 sm:$0xff]  }
 0x578   :  { %5029 = vmatpush1.bf16.msra.mxu0 %v13021_v17  ;;  %5201 = vmatpush1.bf16.msra.mxu1 %v13024_v18  ;;  %v13080_v17 = vld [vmem:[%s16783_s11 + $0xa1c] ss:$28 sps:$4 sm:$0xff]   ;;  %v13075_v18 = vld [vmem:[%s16783_s11 + $0xa10] ss:$28 sps:$4 sm:$0xff]  }
 0x579   :  { %5030 = vmatprep.subr.bf16.mxu0 %v13029_v19  ;;  %5202 = vmatprep.subr.bf16.mxu1 %v13032_v24  ;;  %v13078_v19 = vld [vmem:[%s16783_s11 + $0xa18] ss:$28 sps:$4 sm:$0xff]   ;;  %v13083_v24 = vld [vmem:[%s16783_s11 + $0xa4c] ss:$28 sps:$4 sm:$0xff]  }
 0x57c   :  { %5031 = vmatpush1.bf16.msra.mxu0 %v13027_v27  ;;  %5203 = vmatpush1.bf16.msra.mxu1 %v13030_v28  ;;  %v2579_v44 = vpop.f32.mrb[16].mxu1  ;;  %v13086_v27 = vld [vmem:[%s16783_s11 + $0xa54] ss:$28 sps:$4 sm:$0xff]   ;;  %v13081_v28 = vld [vmem:[%s16783_s11 + $0xa48] ss:$28 sps:$4 sm:$0xff]  }
 0x57d   :  { %v12205_v34 = vadd.f32 %v2579_v44, %v1410_v29  ;;  %v2581_v35 = vpop.f32.mrb[17].mxu1  ;;  %5032 = vmatprep.subr.bf16.mxu0 %v13035_v7  ;;  %5204 = vmatprep.subr.bf16.mxu1 %v13038_v30  ;;  %v13089_v7 = vld [vmem:[%s16783_s11 + $0xa84] ss:$28 sps:$4 sm:$0xff]   ;;  %v13090_v30 = vld [vmem:[%s16783_s11 + $0x1d8] ss:$28 sps:$4 sm:$0xff]  }
 0x57e   :  { %v12206_v37 = vadd.f32 %v2581_v35, %v1414_v31  ;;  %v2583_v38 = vpop.f32.mrb[18].mxu1  ;;  %v13091_v44 = vld [vmem:[%s16783_s11 + $0x18] ss:$28 sps:$4 sm:$0xff]  }
 0x57f   :  { %v12207_v39 = vadd.f32 %v2583_v38, %v1410_v29  ;;  %v2585_v40 = vpop.f32.mrb[19].mxu1  ;;  %v2674_v47 = vmax.f32 %v12205_v34, 0.0  ;;  %v13084_v29 = vld [vmem:[%s16783_s11 + $0xa50] ss:$28 sps:$4 sm:$0xff]   ;;  %v13094_v35 = vld [vmem:[%s16783_s11 + $0xab8] ss:$28 sps:$4 sm:$0xff]  }
 0x580   :  { %v12208_v43 = vadd.f32 %v2585_v40, %v1414_v31  ;;  %5033 = vmatpush1.bf16.msra.mxu0 %v13033_v32  ;;  %5205 = vmatpush1.bf16.msra.mxu1 %v13036_v33  ;;  %v2675_v52 = vmax.f32 %v12206_v37, 0.0  ;;  %v13087_v31 = vld [vmem:[%s16783_s11 + $0xa80] ss:$28 sps:$4 sm:$0xff]   ;;  %v13092_v32 = vld [vmem:[%s16783_s11 + $0x210] ss:$28 sps:$4 sm:$0xff]  }
 0x581   :  { %v2681_v48 = vmax.f32 %v12207_v39, 0.0  ;;  %5034 = vmatprep.subr.bf16.mxu0 %v13041_v36  ;;  %5206 = vmatprep.subr.bf16.mxu1 %v13044_v50  ;;  %v13096_v33 = vld [vmem:[%s16783_s11 + $0xabc] ss:$28 sps:$4 sm:$0xff]   ;;  %v13093_v34 = vld [vmem:[%s16783_s11 + $0x50] ss:$28 sps:$4 sm:$0xff]  }
 0x582   :  { %v2682_v53 = vmax.f32 %v12208_v43, 0.0  ;;  %v13097_v36 = vld [vmem:[%s16783_s11 + $0x248] ss:$28 sps:$4 sm:$0xff]   ;;  %v13102_v38 = vld [vmem:[%s16783_s11 + $0x280] ss:$28 sps:$4 sm:$0xff]  }
 0x583   :  { %v15404_v54 = vpack.c.bf16 %v2681_v48, %v2674_v47  ;;  %v13101_v50 = vld [vmem:[%s16783_s11 + $0xa8c] ss:$28 sps:$4 sm:$0xff]   ;;  %v13103_v40 = vld [vmem:[%s16783_s11 + $0xc0] ss:$28 sps:$4 sm:$0xff]   ;;  %v13108_v47 = vld [vmem:[%s16783_s11 + $0xf8] ss:$28 sps:$4 sm:$0xff]  }
 0x584   :  { %v15406_v55 = vpack.c.bf16 %v2682_v53, %v2675_v52  ;;  %5035 = vmatpush1.bf16.msra.mxu0 %v13039_v45  ;;  %5207 = vmatpush1.bf16.msra.mxu1 %v13042_v46  ;;  %v13098_v37 = vld [vmem:[%s16783_s11 + $0x88] ss:$28 sps:$4 sm:$0xff]   ;;  %v13107_v45 = vld [vmem:[%s16783_s11 + $0x2b8] ss:$28 sps:$4 sm:$0xff]   ;;  %v13104_v46 = vld [vmem:[%s16783_s11 + $0xac0] ss:$28 sps:$4 sm:$0xff]  }
 0x585   :  { %5036 = vmatprep.subr.bf16.mxu0 %v13047_v49  ;;  %5208 = vmatprep.subr.bf16.mxu1 %v13050_v51  ;;  %v13099_v39 = vld [vmem:[%s16783_s11 + $0xa88] ss:$28 sps:$4 sm:$0xff]   ;;  %v13111_v48 = vld [vmem:[%s16783_s11 + $0x14] ss:$28 sps:$4 sm:$0xff]  }
 0x586   :  { %5050 = vmatprep.mubr.bf16.mxu0 %v15406_v55  ;;  %5222 = vmatprep.mubr.bf16.mxu1 %v15406_v55  ;;  %v13106_v43 = vld [vmem:[%s16783_s11 + $0xac4] ss:$28 sps:$4 sm:$0xff]   ;;  %v13112_v49 = vld [vmem:[%s16783_s11 + $0x2f0] ss:$28 sps:$4 sm:$0xff]  }
 0x587   :  { %v13109_v51 = vld [vmem:[%s16783_s11 + $0x10] ss:$28 sps:$4 sm:$0xff]  }
 0x588   :  { %5037 = vmatpush1.bf16.msra.mxu0 %v13045_v56  ;;  %5209 = vmatpush1.bf16.msra.mxu1 %v13048_v57  ;;  %v13113_v52 = vld [vmem:[%s16783_s11 + $0x130] ss:$28 sps:$4 sm:$0xff]   ;;  %v13117_v56 = vld [vmem:[%s16783_s11 + $0x328] ss:$28 sps:$4 sm:$0xff]  }
 0x589   :  { %5038 = vmatprep.subr.bf16.mxu0 %v13053_v58  ;;  %5210 = vmatprep.subr.bf16.mxu1 %v13056_v60  ;;  %v13116_v53 = vld [vmem:[%s16783_s11 + $0x4c] ss:$28 sps:$4 sm:$0xff]   ;;  %v13121_v60 = vld [vmem:[%s16783_s11 + $0x84] ss:$28 sps:$4 sm:$0xff]  }
 0x58a   :  { %v13114_v57 = vld [vmem:[%s16783_s11 + $0x48] ss:$28 sps:$4 sm:$0xff]  }
 0x58b   :  { %v13118_v58 = vld [vmem:[%s16783_s11 + $0x168] ss:$28 sps:$4 sm:$0xff]  }
 0x58c   :  { %5039 = vmatpush1.bf16.msra.mxu0 %v13051_v61  ;;  %5211 = vmatpush1.bf16.msra.mxu1 %v13054_v62  ;;  %v13122_v61 = vld [vmem:[%s16783_s11 + $0x360] ss:$28 sps:$4 sm:$0xff]  }
 0x58d   :  { %5040 = vmatprep.subr.bf16.mxu0 %v13059_v63  ;;  %5212 = vmatprep.subr.bf16.mxu1 %v13062_v1  ;;  %v13123_v62 = vld [vmem:[%s16783_s11 + $0x1a0] ss:$28 sps:$4 sm:$0xff]   ;;  %v13127_v1 = vld [vmem:[%s16783_s11 + $0x558] ss:$28 sps:$4 sm:$0xff]  }
 0x58e   :  { %v13126_v63 = vld [vmem:[%s16783_s11 + $0xbc] ss:$28 sps:$4 sm:$0xff]  }
 0x590   :  { %5041 = vmatpush1.bf16.msra.mxu0 %v13057_v2  ;;  %5213 = vmatpush1.bf16.msra.mxu1 %v13060_v3  ;;  %v13124_v2 = vld [vmem:[%s16783_s11 + $0xb8] ss:$28 sps:$4 sm:$0xff]  }
 0x591   :  { %5042 = vmatprep.subr.bf16.mxu0 %v13065_v42  ;;  %5214 = vmatprep.subr.bf16.mxu1 %v13068_v4  ;;  %v13128_v3 = vld [vmem:[%s16783_s11 + $0x398] ss:$28 sps:$4 sm:$0xff]   ;;  %v13132_v4 = vld [vmem:[%s16783_s11 + $0x590] ss:$28 sps:$4 sm:$0xff]  }
 0x592   :  { %v13131_v42 = vld [vmem:[%s16783_s11 + $0xf4] ss:$28 sps:$4 sm:$0xff]  }
 0x594   :  { %5043 = vmatpush1.bf16.msra.mxu0 %v13063_v5  ;;  %5215 = vmatpush1.bf16.msra.mxu1 %v13066_v6  ;;  %v13129_v5 = vld [vmem:[%s16783_s11 + $0xf0] ss:$28 sps:$4 sm:$0xff]  }
 0x595   :  { %5044 = vmatprep.subr.bf16.mxu0 %v13071_v11  ;;  %5216 = vmatprep.subr.bf16.mxu1 %v13074_v13  ;;  %v13133_v6 = vld [vmem:[%s16783_s11 + $0x3d0] ss:$28 sps:$4 sm:$0xff]   ;;  %v13137_v13 = vld [vmem:[%s16783_s11 + $0x5c8] ss:$28 sps:$4 sm:$0xff]  }
 0x596   :  { %v13136_v11 = vld [vmem:[%s16783_s11 + $0x12c] ss:$28 sps:$4 sm:$0xff]  }
 0x598   :  { %5045 = vmatpush1.bf16.msra.mxu0 %v13069_v14  ;;  %5217 = vmatpush1.bf16.msra.mxu1 %v13072_v15  ;;  %v13134_v14 = vld [vmem:[%s16783_s11 + $0x128] ss:$28 sps:$4 sm:$0xff]  }
 0x599   :  { %5046 = vmatprep.subr.bf16.mxu0 %v13077_v16  ;;  %5218 = vmatprep.subr.bf16.mxu1 %v13080_v17  ;;  %v13138_v15 = vld [vmem:[%s16783_s11 + $0x408] ss:$28 sps:$4 sm:$0xff]   ;;  %v13142_v17 = vld [vmem:[%s16783_s11 + $0x600] ss:$28 sps:$4 sm:$0xff]  }
 0x59a   :  { %v13141_v16 = vld [vmem:[%s16783_s11 + $0x164] ss:$28 sps:$4 sm:$0xff]  }
 0x59c   :  { %5047 = vmatpush1.bf16.msra.mxu0 %v13075_v18  ;;  %5219 = vmatpush1.bf16.msra.mxu1 %v13078_v19  ;;  %v13139_v18 = vld [vmem:[%s16783_s11 + $0x160] ss:$28 sps:$4 sm:$0xff]  }
 0x59d   :  { %5048 = vmatprep.subr.bf16.mxu0 %v13083_v24  ;;  %5220 = vmatprep.subr.bf16.mxu1 %v13086_v27  ;;  %v13143_v19 = vld [vmem:[%s16783_s11 + $0x440] ss:$28 sps:$4 sm:$0xff]   ;;  %v13147_v27 = vld [vmem:[%s16783_s11 + $0x638] ss:$28 sps:$4 sm:$0xff]  }
 0x59e   :  { %v13146_v24 = vld [vmem:[%s16783_s11 + $0x19c] ss:$28 sps:$4 sm:$0xff]  }
 0x5a0   :  { %5049 = vmatpush1.bf16.msra.mxu0 %v13081_v28  ;;  %5221 = vmatpush1.bf16.msra.mxu1 %v13084_v29  ;;  %v13144_v28 = vld [vmem:[%s16783_s11 + $0x198] ss:$28 sps:$4 sm:$0xff]  }
 0x5a1   :  { %5061 = vmatprep.subr.bf16.mxu0 %v13089_v7  ;;  %12043 = vmatprep.subr.bf16.mxu1 %v13090_v30  ;;  %v13148_v29 = vld [vmem:[%s16783_s11 + $0x478] ss:$28 sps:$4 sm:$0xff]   ;;  %v13152_v30 = vld [vmem:[%s16783_s11 + $0x670] ss:$28 sps:$4 sm:$0xff]  }
 0x5a2   :  { %v13151_v7 = vld [vmem:[%s16783_s11 + $0x1d4] ss:$28 sps:$4 sm:$0xff]  }
 0x5a3   :  { %5051 = vmatmul.mubr.bf16.vlgmr.msra.gmra.mrb[20].mxu0 %v15404_v54  ;;  %5223 = vmatmul.mubr.bf16.vlgmr.msra.gmra.mrb[20].mxu1 %v15404_v54 }
 0x5a4   :  { %5062 = vmatpush1.bf16.msra.mxu0 %v13087_v31  ;;  %12044 = vmatpush3.bf16.msra.mxu1 %v13091_v44  ;;  %v13149_v31 = vld [vmem:[%s16783_s11 + $0x1d0] ss:$28 sps:$4 sm:$0xff]  }
 0x5a5   :  { %5480 = vmatprep.mubr.bf16.mxu1 %v15069_v22  ;;  %12045 = vmatprep.subr.bf16.mxu1 %v13092_v32  ;;  %v13153_v44 = vld [vmem:[%s16783_s11 + $0x4b0] ss:$28 sps:$4 sm:$0xff]  }
 0x5a6   :  { %5063 = vmatprep.subr.bf16.mxu0 %v13096_v33  ;;  %5093 = vmatprep.mubr.bf16.mxu0 %v14363_v0  ;;  %v13156_v32 = vld [vmem:[%s16783_s11 + $0x20c] ss:$28 sps:$4 sm:$0xff]  }
 0x5a7   :  { %v13157_v33 = vld [vmem:[%s16783_s11 + $0x6a8] ss:$28 sps:$4 sm:$0xff]  }
 0x5a8   :  { %12046 = vmatpush3.bf16.msra.mxu1 %v13093_v34  ;;  %5064 = vmatpush1.bf16.msra.mxu0 %v13094_v35  ;;  %v13154_v34 = vld [vmem:[%s16783_s11 + $0x208] ss:$28 sps:$4 sm:$0xff]  }
 0x5a9   :  { %12047 = vmatprep.subr.bf16.mxu1 %v13097_v36  ;;  %5233 = vmatprep.subr.bf16.mxu0 %v13101_v50  ;;  %v13158_v35 = vld [vmem:[%s16783_s11 + $0x4e8] ss:$28 sps:$4 sm:$0xff]   ;;  %v13162_v50 = vld [vmem:[%s16783_s11 + $0x6e0] ss:$28 sps:$4 sm:$0xff]  }
 0x5aa   :  { %v13161_v36 = vld [vmem:[%s16783_s11 + $0x244] ss:$28 sps:$4 sm:$0xff]  }
 0x5ac   :  { %12048 = vmatpush3.bf16.msra.mxu1 %v13098_v37  ;;  %v13159_v37 = vld [vmem:[%s16783_s11 + $0x240] ss:$28 sps:$4 sm:$0xff]  }
 0x5ad   :  { %12049 = vmatprep.subr.bf16.mxu1 %v13102_v38  ;;  %v13163_v38 = vld [vmem:[%s16783_s11 + $0x520] ss:$28 sps:$4 sm:$0xff]  }
 0x5af   :  { %11395 = vmatmul.mubr.msk.bf16.vlgmr.msra.gmra.mrb[20].mxu0 %vm4928_vm3, %v15296_v59 }
 0x5b0   :  { %5234 = vmatpush1.bf16.msra.mxu0 %v13099_v39  ;;  %12050 = vmatpush3.bf16.msra.mxu1 %v13103_v40  ;;  %v13166_v39 = vld [vmem:[%s16783_s11 + $0x27c] ss:$28 sps:$4 sm:$0xff]  }
 0x5b1   :  { %5235 = vmatprep.subr.bf16.mxu0 %v13106_v43  ;;  %12051 = vmatprep.subr.bf16.mxu1 %v13107_v45  ;;  %v13167_v40 = vld [vmem:[%s16783_s11 + $0x8d8] ss:$28 sps:$4 sm:$0xff]  }
 0x5b2   :  { %5265 = vmatprep.mubr.bf16.mxu0 %v14363_v0  ;;  %v13164_v43 = vld [vmem:[%s16783_s11 + $0x278] ss:$28 sps:$4 sm:$0xff]  }
 0x5b3   :  { %v13168_v45 = vld [vmem:[%s16783_s11 + $0x718] ss:$28 sps:$4 sm:$0xff]  }
 0x5b4   :  { %5236 = vmatpush1.bf16.msra.mxu0 %v13104_v46  ;;  %12052 = vmatpush3.bf16.msra.mxu1 %v13108_v47  ;;  %v13171_v46 = vld [vmem:[%s16783_s11 + $0x2b4] ss:$28 sps:$4 sm:$0xff]  }
 0x5b5   :  { %5276 = vmatprep.subr.bf16.mxu0 %v13111_v48  ;;  %12053 = vmatprep.subr.bf16.mxu1 %v13112_v49  ;;  %v13172_v47 = vld [vmem:[%s16783_s11 + $0x910] ss:$28 sps:$4 sm:$0xff]  }
 0x5b6   :  { %v13169_v48 = vld [vmem:[%s16783_s11 + $0x2b0] ss:$28 sps:$4 sm:$0xff]  }
 0x5b7   :  { %11396 = vmatmul.mubr.msk.bf16.vlgmr.msra.gmra.mrb[24].mxu0 %vm4928_vm3, %v15296_v59  ;;  %v13173_v49 = vld [vmem:[%s16783_s11 + $0x750] ss:$28 sps:$4 sm:$0xff]  }
 0x5b8   :  { %5277 = vmatpush1.bf16.msra.mxu0 %v13109_v51  ;;  %5308 = vmatprep.mubr.bf16.mxu0 %v15069_v22  ;;  %v13119_v22 = vld [vmem:[%s16783_s11 + $0x80] ss:$28 sps:$4 sm:$0xff]   ;;  %v13176_v51 = vld [vmem:[%s16783_s11 + $0x2ec] ss:$28 sps:$4 sm:$0xff]  }
 0x5b9   :  { %12054 = vmatpush3.bf16.msra.mxu1 %v13113_v52  ;;  %5278 = vmatprep.subr.bf16.mxu0 %v13116_v53  ;;  %v13177_v52 = vld [vmem:[%s16783_s11 + $0x948] ss:$28 sps:$4 sm:$0xff]  }
 0x5ba   :  { %12055 = vmatprep.subr.bf16.mxu1 %v13117_v56  ;;  %v13174_v53 = vld [vmem:[%s16783_s11 + $0x2e8] ss:$28 sps:$4 sm:$0xff]  }
 0x5bb   :  { %v13178_v56 = vld [vmem:[%s16783_s11 + $0x788] ss:$28 sps:$4 sm:$0xff]  }
 0x5bc   :  { %5279 = vmatpush1.bf16.msra.mxu0 %v13114_v57  ;;  %v13181_v57 = vld [vmem:[%s16783_s11 + $0x324] ss:$28 sps:$4 sm:$0xff]  }
 0x5bd   :  { %12056 = vmatpush3.bf16.msra.mxu1 %v13118_v58  ;;  %5280 = vmatprep.subr.bf16.mxu0 %v13121_v60  ;;  %v13182_v58 = vld [vmem:[%s16783_s11 + $0x980] ss:$28 sps:$4 sm:$0xff]  }
 0x5be   :  { %12057 = vmatprep.subr.bf16.mxu1 %v13122_v61  ;;  %v13179_v60 = vld [vmem:[%s16783_s11 + $0x320] ss:$28 sps:$4 sm:$0xff]  }
 0x5bf   :  { %v13183_v61 = vld [vmem:[%s16783_s11 + $0x7c0] ss:$28 sps:$4 sm:$0xff]  }
 0x5c0   :  { %5281 = vmatpush1.bf16.msra.mxu0 %v13119_v22  ;;  %v13186_v22 = vld [vmem:[%s16783_s11 + $0x35c] ss:$28 sps:$4 sm:$0xff]  }
 0x5c1   :  { %12058 = vmatpush3.bf16.msra.mxu1 %v13123_v62  ;;  %5282 = vmatprep.subr.bf16.mxu0 %v13126_v63  ;;  %v13187_v62 = vld [vmem:[%s16783_s11 + $0x9b8] ss:$28 sps:$4 sm:$0xff]  }
 0x5c2   :  { %12065 = vmatprep.subr.bf16.mxu1 %v13127_v1  ;;  %v13184_v63 = vld [vmem:[%s16783_s11 + $0x358] ss:$28 sps:$4 sm:$0xff]  }
 0x5c3   :  { %v13188_v1 = vld [vmem:[%s16783_s11 + $0x7f8] ss:$28 sps:$4 sm:$0xff]  }
 0x5c4   :  { %5283 = vmatpush1.bf16.msra.mxu0 %v13124_v2  ;;  %5481 = vmatmul.mubr.bf16.vlgmr.msra.gmra.mrb[24].mxu1 %v15065_v20  ;;  %v13191_v2 = vld [vmem:[%s16783_s11 + $0x394] ss:$28 sps:$4 sm:$0xff]  }
 0x5c5   :  { %12066 = vmatpush3.bf16.msra.mxu1 %v13128_v3  ;;  %5521 = vmatprep.mubr.bf16.mxu1 %v15071_v23  ;;  %v13192_v3 = vld [vmem:[%s16783_s11 + $0x9f0] ss:$28 sps:$4 sm:$0xff]  }
 0x5c6   :  { %5284 = vmatprep.subr.bf16.mxu0 %v13131_v42  ;;  %12067 = vmatprep.subr.bf16.mxu1 %v13132_v4  ;;  %v13189_v42 = vld [vmem:[%s16783_s11 + $0x390] ss:$28 sps:$4 sm:$0xff]  }
 0x5c7   :  { %v13193_v4 = vld [vmem:[%s16783_s11 + $0x830] ss:$28 sps:$4 sm:$0xff]  }
 0x5c8   :  { %5285 = vmatpush1.bf16.msra.mxu0 %v13129_v5  ;;  %v13196_v5 = vld [vmem:[%s16783_s11 + $0x3cc] ss:$28 sps:$4 sm:$0xff]  }
 0x5c9   :  { %12068 = vmatpush3.bf16.msra.mxu1 %v13133_v6  ;;  %5286 = vmatprep.subr.bf16.mxu0 %v13136_v11  ;;  %v13197_v6 = vld [vmem:[%s16783_s11 + $0xa28] ss:$28 sps:$4 sm:$0xff]  }
 0x5ca   :  { %12069 = vmatprep.subr.bf16.mxu1 %v13137_v13  ;;  %v13194_v11 = vld [vmem:[%s16783_s11 + $0x3c8] ss:$28 sps:$4 sm:$0xff]  }
 0x5cb   :  { %v13198_v13 = vld [vmem:[%s16783_s11 + $0x868] ss:$28 sps:$4 sm:$0xff]  }
 0x5cc   :  { %5287 = vmatpush1.bf16.msra.mxu0 %v13134_v14  ;;  %v13201_v14 = vld [vmem:[%s16783_s11 + $0x404] ss:$28 sps:$4 sm:$0xff]  }
 0x5cd   :  { %12070 = vmatpush3.bf16.msra.mxu1 %v13138_v15  ;;  %5288 = vmatprep.subr.bf16.mxu0 %v13141_v16  ;;  %v13203_v15 = vld [vmem:[%s16783_s11 + $0x8a0] ss:$28 sps:$4 sm:$0xff]  }
 0x5ce   :  { %12071 = vmatprep.subr.bf16.mxu1 %v13142_v17  ;;  %v13206_v16 = vld [vmem:[%s16783_s11 + $0x43c] ss:$28 sps:$4 sm:$0xff]  }
 0x5cf   :  { %v13204_v17 = vld [vmem:[%s16783_s11 + $0x438] ss:$28 sps:$4 sm:$0xff]  }
 0x5d0   :  { %5289 = vmatpush1.bf16.msra.mxu0 %v13139_v18  ;;  %v13207_v18 = vld [vmem:[%s16783_s11 + $0xa98] ss:$28 sps:$4 sm:$0xff]  }
 0x5d1   :  { %12072 = vmatpush3.bf16.msra.mxu1 %v13143_v19  ;;  %5290 = vmatprep.subr.bf16.mxu0 %v13146_v24  ;;  %v13210_v19 = vld [vmem:[%s16783_s11 + $0x474] ss:$28 sps:$4 sm:$0xff]   ;;  %v14364_v24 = vmov 0.0  }
 0x5d2   :  { %12073 = vmatprep.subr.bf16.mxu1 %v13147_v27  ;;  %v13208_v27 = vld [vmem:[%s16783_s11 + $0x470] ss:$28 sps:$4 sm:$0xff]  }
 0x5d4   :  { %5291 = vmatpush1.bf16.msra.mxu0 %v13144_v28  ;;  %v13211_v28 = vld [vmem:[%s16783_s11 + $0xad0] ss:$28 sps:$4 sm:$0xff]  }
 0x5d5   :  { %12074 = vmatpush3.bf16.msra.mxu1 %v13148_v29  ;;  %5292 = vmatprep.subr.bf16.mxu0 %v13151_v7  ;;  %v13214_v29 = vld [vmem:[%s16783_s11 + $0x4ac] ss:$28 sps:$4 sm:$0xff]  }
 0x5d6   :  { %12075 = vmatprep.subr.bf16.mxu1 %v13152_v30  ;;  %v13265_v7 = vld [vmem:[#allocation8 + $0x4] ss:$28 sps:$4 sm:$0xff]  }
 0x5d7   :  { %v13212_v30 = vld [vmem:[%s16783_s11 + $0x4a8] ss:$28 sps:$4 sm:$0xff]  }
 0x5d8   :  { %5293 = vmatpush1.bf16.msra.mxu0 %v13149_v31  ;;  %v13217_v31 = vld [vmem:[%s16783_s11 + $0x4e4] ss:$28 sps:$4 sm:$0xff]  }
 0x5d9   :  { %12076 = vmatpush3.bf16.msra.mxu1 %v13153_v44  ;;  %5294 = vmatprep.subr.bf16.mxu0 %v13156_v32  ;;  %v13263_v44 = vld [vmem:[#allocation8] ss:$28 sps:$4 sm:$0xff]  }
 0x5da   :  { %12077 = vmatprep.subr.bf16.mxu1 %v13157_v33  ;;  %v13271_v32 = vld [vmem:[#allocation8 + $0x3c] ss:$28 sps:$4 sm:$0xff]  }
 0x5db   :  { %v13215_v33 = vld [vmem:[%s16783_s11 + $0x4e0] ss:$28 sps:$4 sm:$0xff]  }
 0x5dc   :  { %5295 = vmatpush1.bf16.msra.mxu0 %v13154_v34  ;;  %v13220_v34 = vld [vmem:[%s16783_s11 + $0x51c] ss:$28 sps:$4 sm:$0xff]  }
 0x5dd   :  { %12078 = vmatpush3.bf16.msra.mxu1 %v13158_v35  ;;  %5296 = vmatprep.subr.bf16.mxu0 %v13161_v36  ;;  %v13269_v35 = vld [vmem:[#allocation8 + $0x38] ss:$28 sps:$4 sm:$0xff]  }
 0x5de   :  { %12079 = vmatprep.subr.bf16.mxu1 %v13162_v50  ;;  %v13277_v36 = vld [vmem:[#allocation8 + $0x74] ss:$28 sps:$4 sm:$0xff]  }
 0x5df   :  { %v13218_v50 = vld [vmem:[%s16783_s11 + $0x518] ss:$28 sps:$4 sm:$0xff]  }
 0x5e0   :  { %5297 = vmatpush1.bf16.msra.mxu0 %v13159_v37  ;;  %v13223_v37 = vld [vmem:[%s16783_s11 + $0x554] ss:$28 sps:$4 sm:$0xff]  }
 0x5e1   :  { %12080 = vmatpush3.bf16.msra.mxu1 %v13163_v38  ;;  %5298 = vmatprep.subr.bf16.mxu0 %v13166_v39  ;;  %v13275_v38 = vld [vmem:[#allocation8 + $0x70] ss:$28 sps:$4 sm:$0xff]  }
 0x5e2   :  { %12087 = vmatprep.subr.bf16.mxu1 %v13167_v40  ;;  %v13283_v39 = vld [vmem:[#allocation8 + $0xac] ss:$28 sps:$4 sm:$0xff]  }
 0x5e3   :  { %v13221_v40 = vld [vmem:[%s16783_s11 + $0x550] ss:$28 sps:$4 sm:$0xff]  }
 0x5e4   :  { %5299 = vmatpush1.bf16.msra.mxu0 %v13164_v43  ;;  %5522 = vmatmul.mubr.bf16.vlgmr.msra.gmra.mrb[28].mxu1 %v15067_v21  ;;  %v13226_v43 = vld [vmem:[%s16783_s11 + $0x58c] ss:$28 sps:$4 sm:$0xff]  }
 0x5e5   :  { %12088 = vmatpush3.bf16.msra.mxu1 %v13168_v45  ;;  %5562 = vmatprep.mubr.bf16.mxu1 %v15406_v55  ;;  %v13281_v45 = vld [vmem:[#allocation8 + $0xa8] ss:$28 sps:$4 sm:$0xff]  }
 0x5e6   :  { %5300 = vmatprep.subr.bf16.mxu0 %v13171_v46  ;;  %12089 = vmatprep.subr.bf16.mxu1 %v13172_v47  ;;  %v13289_v46 = vld [vmem:[#allocation8 + $0xe4] ss:$28 sps:$4 sm:$0xff]  }
 0x5e7   :  { %v13224_v47 = vld [vmem:[%s16783_s11 + $0x588] ss:$28 sps:$4 sm:$0xff]  }
 0x5e8   :  { %5301 = vmatpush1.bf16.msra.mxu0 %v13169_v48  ;;  %v13229_v48 = vld [vmem:[%s16783_s11 + $0x5c4] ss:$28 sps:$4 sm:$0xff]  }
 0x5e9   :  { %12090 = vmatpush3.bf16.msra.mxu1 %v13173_v49  ;;  %5302 = vmatprep.subr.bf16.mxu0 %v13176_v51  ;;  %v13287_v49 = vld [vmem:[#allocation8 + $0xe0] ss:$28 sps:$4 sm:$0xff]  }
 0x5ea   :  { %12091 = vmatprep.subr.bf16.mxu1 %v13177_v52  ;;  %v13295_v51 = vld [vmem:[#allocation8 + $0x11c] ss:$28 sps:$4 sm:$0xff]  }
 0x5eb   :  { %v13227_v52 = vld [vmem:[%s16783_s11 + $0x5c0] ss:$28 sps:$4 sm:$0xff]  }
 0x5ec   :  { %5303 = vmatpush1.bf16.msra.mxu0 %v13174_v53  ;;  %v13232_v53 = vld [vmem:[%s16783_s11 + $0x5fc] ss:$28 sps:$4 sm:$0xff]  }
 0x5ed   :  { %12092 = vmatpush3.bf16.msra.mxu1 %v13178_v56  ;;  %5304 = vmatprep.subr.bf16.mxu0 %v13181_v57  ;;  %v13293_v56 = vld [vmem:[#allocation8 + $0x118] ss:$28 sps:$4 sm:$0xff]  }
 0x5ee   :  { %12093 = vmatprep.subr.bf16.mxu1 %v13182_v58  ;;  %v13301_v57 = vld [vmem:[#allocation8 + $0x154] ss:$28 sps:$4 sm:$0xff]  }
 0x5ef   :  { %v13230_v58 = vld [vmem:[%s16783_s11 + $0x5f8] ss:$28 sps:$4 sm:$0xff]  }
 0x5f0   :  { %5305 = vmatpush1.bf16.msra.mxu0 %v13179_v60  ;;  %v13235_v60 = vld [vmem:[%s16783_s11 + $0x634] ss:$28 sps:$4 sm:$0xff]  }
 0x5f1   :  { %12094 = vmatpush3.bf16.msra.mxu1 %v13183_v61  ;;  %5306 = vmatprep.subr.bf16.mxu0 %v13186_v22  ;;  %v13299_v61 = vld [vmem:[#allocation8 + $0x150] ss:$28 sps:$4 sm:$0xff]  }
 0x5f2   :  { %12095 = vmatprep.subr.bf16.mxu1 %v13187_v62  ;;  %v13307_v22 = vld [vmem:[#allocation8 + $0x18c] ss:$28 sps:$4 sm:$0xff]  }
 0x5f3   :  { %v13233_v62 = vld [vmem:[%s16783_s11 + $0x630] ss:$28 sps:$4 sm:$0xff]  }
 0x5f4   :  { %5307 = vmatpush1.bf16.msra.mxu0 %v13184_v63  ;;  %v13238_v63 = vld [vmem:[%s16783_s11 + $0x66c] ss:$28 sps:$4 sm:$0xff]  }
 0x5f5   :  { %12096 = vmatpush3.bf16.msra.mxu1 %v13188_v1  ;;  %5319 = vmatprep.subr.bf16.mxu0 %v13191_v2  ;;  %v13305_v1 = vld [vmem:[#allocation8 + $0x188] ss:$28 sps:$4 sm:$0xff]  }
 0x5f6   :  { %12097 = vmatprep.subr.bf16.mxu1 %v13192_v3  ;;  %v13313_v2 = vld [vmem:[#allocation8 + $0x1c4] ss:$28 sps:$4 sm:$0xff]  }
 0x5f7   :  { %5309 = vmatmul.mubr.bf16.vlgmr.msra.gmra.mrb[28].mxu0 %v15065_v20  ;;  %v13202_v20 = vld [vmem:[%s16783_s11 + $0xa60] ss:$28 sps:$4 sm:$0xff]   ;;  %v13236_v3 = vld [vmem:[%s16783_s11 + $0x668] ss:$28 sps:$4 sm:$0xff]  }
 0x5f8   :  { %5320 = vmatpush1.bf16.msra.mxu0 %v13189_v42  ;;  %5351 = vmatprep.mubr.bf16.mxu0 %v15071_v23  ;;  %v13199_v23 = vld [vmem:[%s16783_s11 + $0x400] ss:$28 sps:$4 sm:$0xff]  }
 0x5f9   :  { %12098 = vmatpush3.bf16.msra.mxu1 %v13193_v4  ;;  %5321 = vmatprep.subr.bf16.mxu0 %v13196_v5  ;;  %v13241_v42 = vld [vmem:[%s16783_s11 + $0x6a4] ss:$28 sps:$4 sm:$0xff]  }
 0x5fa   :  { %12099 = vmatprep.subr.bf16.mxu1 %v13197_v6  ;;  %v13311_v4 = vld [vmem:[#allocation8 + $0x1c0] ss:$28 sps:$4 sm:$0xff]   ;;  %v13239_v6 = vld [vmem:[%s16783_s11 + $0x6a0] ss:$28 sps:$4 sm:$0xff]  }
 0x5fb   :  { %v13319_v5 = vld [vmem:[#allocation8 + $0x1fc] ss:$28 sps:$4 sm:$0xff]  }
 0x5fc   :  { %5322 = vmatpush1.bf16.msra.mxu0 %v13194_v11  ;;  %v13244_v11 = vld [vmem:[%s16783_s11 + $0x6dc] ss:$28 sps:$4 sm:$0xff]  }
 0x5fd   :  { %12100 = vmatpush3.bf16.msra.mxu1 %v13198_v13  ;;  %5323 = vmatprep.subr.bf16.mxu0 %v13201_v14  ;;  %v13317_v13 = vld [vmem:[#allocation8 + $0x1f8] ss:$28 sps:$4 sm:$0xff]  }
 0x5fe   :  { %12101 = vmatprep.subr.bf16.mxu1 %v13202_v20  ;;  %v13325_v14 = vld [vmem:[#allocation8 + $0x234] ss:$28 sps:$4 sm:$0xff]  }
 0x5ff   :  { %v13242_v20 = vld [vmem:[%s16783_s11 + $0x6d8] ss:$28 sps:$4 sm:$0xff]  }
 0x600   :  { %5324 = vmatpush1.bf16.msra.mxu0 %v13199_v23  ;;  %v13247_v23 = vld [vmem:[%s16783_s11 + $0x714] ss:$28 sps:$4 sm:$0xff]  }
 0x601   :  { %12102 = vmatpush3.bf16.msra.mxu1 %v13203_v15  ;;  %5325 = vmatprep.subr.bf16.mxu0 %v13206_v16  ;;  %v13323_v15 = vld [vmem:[#allocation8 + $0x230] ss:$28 sps:$4 sm:$0xff]  }
 0x602   :  { %12181 = vmatprep.subr.bf16.mxu1 %v14364_v24  ;;  %v13331_v16 = vld [vmem:[#allocation8 + $0x26c] ss:$28 sps:$4 sm:$0xff]  }
 0x604   :  { %5326 = vmatpush1.bf16.msra.mxu0 %v13204_v17  ;;  %5563 = vmatmul.mubr.bf16.vlgmr.msra.gmra.mrb[32].mxu1 %v15404_v54  ;;  %v13245_v17 = vld [vmem:[%s16783_s11 + $0x710] ss:$28 sps:$4 sm:$0xff]  }
 0x605   :  { %12182 = vmatpush3.bf16.msra.mxu1 %v13207_v18  ;;  %5327 = vmatprep.subr.bf16.mxu0 %v13210_v19  ;;  %v13250_v18 = vld [vmem:[%s16783_s11 + $0x74c] ss:$28 sps:$4 sm:$0xff]  }
 0x606   :  { %12183 = vmatprep.subr.bf16.mxu1 %v14364_v24  ;;  %12185 = vmatprep.mubr.msk.bf16.mxu1 %vm14365_vm4, %v14364_v24  ;;  %v13329_v19 = vld [vmem:[#allocation8 + $0x268] ss:$28 sps:$4 sm:$0xff]  }
 0x608   :  { %5328 = vmatpush1.bf16.msra.mxu0 %v13208_v27  ;;  %v13337_v27 = vld [vmem:[#allocation8 + $0x2a4] ss:$28 sps:$4 sm:$0xff]  }
 0x609   :  { %12184 = vmatpush3.bf16.msra.mxu1 %v13211_v28  ;;  %5329 = vmatprep.subr.bf16.mxu0 %v13214_v29  ;;  %v13248_v28 = vld [vmem:[%s16783_s11 + $0x748] ss:$28 sps:$4 sm:$0xff]  }
 0x60a   :  { %7873 = vmatprep.subr.bf16.mxu1 %v13265_v7  ;;  %v13253_v29 = vld [vmem:[%s16783_s11 + $0x784] ss:$28 sps:$4 sm:$0xff]  }
 0x60b   :  { %v13335_v7 = vld [vmem:[#allocation8 + $0x2a0] ss:$28 sps:$4 sm:$0xff]  }
 0x60c   :  { %5330 = vmatpush1.bf16.msra.mxu0 %v13212_v30  ;;  %12186 = vmatmul.mubr.msk.bf16.vlgmr.msra.gmra.mrb[36].mxu1 %vm4928_vm3, %v15296_v59  ;;  %v13340_v30 = vld [vmem:[#allocation8 + $0x2dc] ss:$28 sps:$4 sm:$0xff]  }
 0x60d   :  { %5331 = vmatprep.subr.bf16.mxu0 %v13217_v31  ;;  %7874 = vmatpush1.bf16.msra.mxu1 %v13263_v44  ;;  %v13338_v31 = vld [vmem:[#allocation8 + $0x2d8] ss:$28 sps:$4 sm:$0xff]  }
 0x60e   :  { %7875 = vmatprep.subr.bf16.mxu1 %v13271_v32  ;;  %v13346_v44 = vld [vmem:[#allocation8 + $0x314] ss:$28 sps:$4 sm:$0xff]  }
 0x60f   :  { %v13254_v32 = vld [vmem:[%s16783_s11 + $0x7b8] ss:$28 sps:$4 sm:$0xff]  }
 0x610   :  { %5332 = vmatpush1.bf16.msra.mxu0 %v13215_v33  ;;  %v13259_v33 = vld [vmem:[%s16783_s11 + $0x7f4] ss:$28 sps:$4 sm:$0xff]  }
 0x611   :  { %5333 = vmatprep.subr.bf16.mxu0 %v13220_v34  ;;  %7876 = vmatpush1.bf16.msra.mxu1 %v13269_v35  ;;  %v13344_v34 = vld [vmem:[#allocation8 + $0x310] ss:$28 sps:$4 sm:$0xff]  }
 0x612   :  { %7877 = vmatprep.subr.bf16.mxu1 %v13277_v36  ;;  %v13352_v35 = vld [vmem:[#allocation8 + $0x34c] ss:$28 sps:$4 sm:$0xff]  }
 0x613   :  { %v13257_v36 = vld [vmem:[%s16783_s11 + $0x7f0] ss:$28 sps:$4 sm:$0xff]  }
 0x614   :  { %5334 = vmatpush1.bf16.msra.mxu0 %v13218_v50  ;;  %v13262_v50 = vld [vmem:[%s16783_s11 + $0x82c] ss:$28 sps:$4 sm:$0xff]  }
 0x615   :  { %5335 = vmatprep.subr.bf16.mxu0 %v13223_v37  ;;  %7878 = vmatpush1.bf16.msra.mxu1 %v13275_v38  ;;  %v13350_v37 = vld [vmem:[#allocation8 + $0x348] ss:$28 sps:$4 sm:$0xff]  }
 0x616   :  { %7879 = vmatprep.subr.bf16.mxu1 %v13283_v39  ;;  %v13358_v38 = vld [vmem:[#allocation8 + $0x384] ss:$28 sps:$4 sm:$0xff]  }
 0x617   :  { %v13260_v39 = vld [vmem:[%s16783_s11 + $0x828] ss:$28 sps:$4 sm:$0xff]  }
 0x618   :  { %5336 = vmatpush1.bf16.msra.mxu0 %v13221_v40  ;;  %v13268_v40 = vld [vmem:[%s16783_s11 + $0x864] ss:$28 sps:$4 sm:$0xff]  }
 0x619   :  { %5337 = vmatprep.subr.bf16.mxu0 %v13226_v43  ;;  %7880 = vmatpush1.bf16.msra.mxu1 %v13281_v45  ;;  %v13266_v43 = vld [vmem:[%s16783_s11 + $0x860] ss:$28 sps:$4 sm:$0xff]  }
 0x61a   :  { %7881 = vmatprep.subr.bf16.mxu1 %v13289_v46  ;;  %v13274_v45 = vld [vmem:[%s16783_s11 + $0x89c] ss:$28 sps:$4 sm:$0xff]  }
 0x61b   :  { %v13272_v46 = vld [vmem:[%s16783_s11 + $0x898] ss:$28 sps:$4 sm:$0xff]  }
 0x61c   :  { %5338 = vmatpush1.bf16.msra.mxu0 %v13224_v47  ;;  %v13280_v47 = vld [vmem:[%s16783_s11 + $0x8d4] ss:$28 sps:$4 sm:$0xff]  }
 0x61d   :  { %5339 = vmatprep.subr.bf16.mxu0 %v13229_v48  ;;  %7882 = vmatpush1.bf16.msra.mxu1 %v13287_v49  ;;  %v13278_v48 = vld [vmem:[%s16783_s11 + $0x8d0] ss:$28 sps:$4 sm:$0xff]  }
 0x61e   :  { %7883 = vmatprep.subr.bf16.mxu1 %v13295_v51  ;;  %v13286_v49 = vld [vmem:[%s16783_s11 + $0x90c] ss:$28 sps:$4 sm:$0xff]  }
 0x61f   :  { %v13284_v51 = vld [vmem:[%s16783_s11 + $0x908] ss:$28 sps:$4 sm:$0xff]  }
 0x620   :  { %5340 = vmatpush1.bf16.msra.mxu0 %v13227_v52  ;;  %v13292_v52 = vld [vmem:[%s16783_s11 + $0x944] ss:$28 sps:$4 sm:$0xff]  }
 0x621   :  { %5341 = vmatprep.subr.bf16.mxu0 %v13232_v53  ;;  %7884 = vmatpush1.bf16.msra.mxu1 %v13293_v56  ;;  %v13290_v53 = vld [vmem:[%s16783_s11 + $0x940] ss:$28 sps:$4 sm:$0xff]  }
 0x622   :  { %7885 = vmatprep.subr.bf16.mxu1 %v13301_v57  ;;  %v13298_v56 = vld [vmem:[%s16783_s11 + $0x97c] ss:$28 sps:$4 sm:$0xff]  }
 0x623   :  { %v13296_v57 = vld [vmem:[%s16783_s11 + $0x978] ss:$28 sps:$4 sm:$0xff]  }
 0x624   :  { %5342 = vmatpush1.bf16.msra.mxu0 %v13230_v58  ;;  %v13304_v58 = vld [vmem:[%s16783_s11 + $0x9b4] ss:$28 sps:$4 sm:$0xff]  }
 0x625   :  { %5343 = vmatprep.subr.bf16.mxu0 %v13235_v60  ;;  %7886 = vmatpush1.bf16.msra.mxu1 %v13299_v61  ;;  %v13302_v60 = vld [vmem:[%s16783_s11 + $0x9b0] ss:$28 sps:$4 sm:$0xff]  }
 0x626   :  { %7887 = vmatprep.subr.bf16.mxu1 %v13307_v22  ;;  %v13310_v61 = vld [vmem:[%s16783_s11 + $0x9ec] ss:$28 sps:$4 sm:$0xff]  }
 0x627   :  { %v13308_v22 = vld [vmem:[%s16783_s11 + $0x9e8] ss:$28 sps:$4 sm:$0xff]  }
 0x628   :  { %5344 = vmatpush1.bf16.msra.mxu0 %v13233_v62  ;;  %v13316_v62 = vld [vmem:[%s16783_s11 + $0xa24] ss:$28 sps:$4 sm:$0xff]  }
 0x629   :  { %5345 = vmatprep.subr.bf16.mxu0 %v13238_v63  ;;  %7888 = vmatpush1.bf16.msra.mxu1 %v13305_v1  ;;  %v13314_v63 = vld [vmem:[%s16783_s11 + $0xa20] ss:$28 sps:$4 sm:$0xff]  }
 0x62a   :  { %7889 = vmatprep.subr.bf16.mxu1 %v13313_v2  ;;  %v13322_v1 = vld [vmem:[%s16783_s11 + $0xa5c] ss:$28 sps:$4 sm:$0xff]  }
 0x62b   :  { %v13320_v2 = vld [vmem:[%s16783_s11 + $0xa58] ss:$28 sps:$4 sm:$0xff]  }
 0x62c   :  { %5346 = vmatpush1.bf16.msra.mxu0 %v13236_v3  ;;  %v13328_v3 = vld [vmem:[%s16783_s11 + $0xa94] ss:$28 sps:$4 sm:$0xff]  }
 0x62d   :  { %5347 = vmatprep.subr.bf16.mxu0 %v13241_v42  ;;  %7890 = vmatpush1.bf16.msra.mxu1 %v13311_v4  ;;  %v13326_v42 = vld [vmem:[%s16783_s11 + $0xa90] ss:$28 sps:$4 sm:$0xff]  }
 0x62e   :  { %7891 = vmatprep.subr.bf16.mxu1 %v13319_v5  ;;  %v13334_v4 = vld [vmem:[%s16783_s11 + $0xacc] ss:$28 sps:$4 sm:$0xff]  }
 0x630   :  { %5348 = vmatpush1.bf16.msra.mxu0 %v13239_v6 }
 0x631   :  { %5349 = vmatprep.subr.bf16.mxu0 %v13244_v11  ;;  %7892 = vmatpush1.bf16.msra.mxu1 %v13317_v13  ;;  %v13332_v13 = vld [vmem:[%s16783_s11 + $0xac8] ss:$28 sps:$4 sm:$0xff]  }
 0x632   :  { %7893 = vmatprep.subr.bf16.mxu1 %v13325_v14 }
 0x634   :  { %5350 = vmatpush1.bf16.msra.mxu0 %v13242_v20  ;;  %v13343_v20 = vld [vmem:[#allocation8 + $0xc] ss:$28 sps:$4 sm:$0xff]  }
 0x635   :  { %5362 = vmatprep.subr.bf16.mxu0 %v13247_v23  ;;  %7894 = vmatpush1.bf16.msra.mxu1 %v13323_v15  ;;  %v15992_v23 = vld [vmem:[%s16784_s12] sm:$0x7f]  ;;  %v13341_v15 = vld [vmem:[#allocation8 + $0x8] ss:$28 sps:$4 sm:$0xff]  }
 0x636   :  { %7895 = vmatprep.subr.bf16.mxu1 %v13331_v16  ;;  %v3100_v16 = vrot.slane %v15992_v23, %v14630_v10 }
 0x637   :  { %5352 = vmatmul.mubr.bf16.vlgmr.msra.gmra.mrb[28].mxu0 %v15067_v21  ;;  %v13251_v21 = vld [vmem:[%s16783_s11 + $0x780] ss:$28 sps:$4 sm:$0xff]  }
 0x638   :  { %5363 = vmatpush1.bf16.msra.mxu0 %v13245_v17  ;;  %5394 = vmatprep.mubr.bf16.mxu0 %v15406_v55  ;;  %v13256_v55 = vld [vmem:[%s16783_s11 + $0x7bc] ss:$28 sps:$4 sm:$0xff]   ;;  %v13349_v17 = vld [vmem:[#allocation8 + $0x44] ss:$28 sps:$4 sm:$0xff]  }
 0x639   :  { %5364 = vmatprep.subr.bf16.mxu0 %v13250_v18  ;;  %7896 = vmatpush1.bf16.msra.mxu1 %v13329_v19 }
 0x63a   :  { %7897 = vmatprep.subr.bf16.mxu1 %v13337_v27 }
 0x63c   :  { %5365 = vmatpush1.bf16.msra.mxu0 %v13248_v28 }
 0x63d   :  { %5366 = vmatprep.subr.bf16.mxu0 %v13253_v29  ;;  %7898 = vmatpush1.bf16.msra.mxu1 %v13335_v7  ;;  %v13347_v7 = vld [vmem:[#allocation8 + $0x40] ss:$28 sps:$4 sm:$0xff]  }
 0x63e   :  { %7899 = vmatprep.subr.bf16.mxu1 %v13340_v30  ;;  %v3104_v30 = vrot.slane %v15992_v23, %v14805_v8 }
 0x640   :  { %5367 = vmatpush1.bf16.msra.mxu0 %v13251_v21 }
 0x641   :  { %5368 = vmatprep.subr.bf16.mxu0 %v13256_v55  ;;  %7900 = vmatpush1.bf16.msra.mxu1 %v13338_v31  ;;  %v13355_v31 = vld [vmem:[#allocation8 + $0x7c] ss:$28 sps:$4 sm:$0xff]  }
 0x642   :  { %7901 = vmatprep.subr.bf16.mxu1 %v13346_v44  ;;  %v3108_v44 = vrot.slane %v15992_v23, %v14811_v12 }
 0x644   :  { %5369 = vmatpush1.bf16.msra.mxu0 %v13254_v32 }
 0x645   :  { %5370 = vmatprep.subr.bf16.mxu0 %v13259_v33  ;;  %7902 = vmatpush1.bf16.msra.mxu1 %v13344_v34 }
 0x646   :  { %7903 = vmatprep.subr.bf16.mxu1 %v13352_v35 }
 0x648   :  { %5371 = vmatpush1.bf16.msra.mxu0 %v13257_v36  ;;  %v13353_v36 = vld [vmem:[#allocation8 + $0x78] ss:$28 sps:$4 sm:$0xff]  }
 0x649   :  { %5372 = vmatprep.subr.bf16.mxu0 %v13262_v50  ;;  %7904 = vmatpush1.bf16.msra.mxu1 %v13350_v37 }
 0x64a   :  { %7916 = vmatprep.subr.bf16.mxu1 %v13358_v38 }
 0x64c   :  { %5373 = vmatpush1.bf16.msra.mxu0 %v13260_v39 }
 0x64d   :  { %5374 = vmatprep.subr.bf16.mxu0 %v13268_v40 }
 0x650   :  { %5375 = vmatpush1.bf16.msra.mxu0 %v13266_v43  ;;  %v13356_v43 = vld [vmem:[#allocation8 + $0x380] ss:$28 sps:$4 sm:$0xff]  }
 0x651   :  { %5376 = vmatprep.subr.bf16.mxu0 %v13274_v45  ;;  %v13361_v45 = vld [vmem:[#allocation8 + $0xb4] ss:$28 sps:$4 sm:$0xff]  }
 0x654   :  { %5377 = vmatpush1.bf16.msra.mxu0 %v13272_v46 }
 0x655   :  { %5378 = vmatprep.subr.bf16.mxu0 %v13280_v47 }
 0x658   :  { %5379 = vmatpush1.bf16.msra.mxu0 %v13278_v48 }
 0x659   :  { %5380 = vmatprep.subr.bf16.mxu0 %v13286_v49  ;;  %v13364_v49 = vld [vmem:[#allocation8 + $0x3bc] ss:$28 sps:$4 sm:$0xff]  }
 0x65c   :  { %5381 = vmatpush1.bf16.msra.mxu0 %v13284_v51 }
 0x65d   :  { %5382 = vmatprep.subr.bf16.mxu0 %v13292_v52 }
 0x660   :  { %5383 = vmatpush1.bf16.msra.mxu0 %v13290_v53 }
 0x661   :  { %5384 = vmatprep.subr.bf16.mxu0 %v13298_v56  ;;  %v13359_v56 = vld [vmem:[#allocation8 + $0xb0] ss:$28 sps:$4 sm:$0xff]  }
 0x664   :  { %5385 = vmatpush1.bf16.msra.mxu0 %v13296_v57 }
 0x665   :  { %5386 = vmatprep.subr.bf16.mxu0 %v13304_v58 }
 0x668   :  { %5387 = vmatpush1.bf16.msra.mxu0 %v13302_v60  ;;  %v13367_v60 = vld [vmem:[#allocation8 + $0xec] ss:$28 sps:$4 sm:$0xff]  }
 0x669   :  { %5388 = vmatprep.subr.bf16.mxu0 %v13310_v61 }
 0x66c   :  { %5389 = vmatpush1.bf16.msra.mxu0 %v13308_v22  ;;  %v13362_v22 = vld [vmem:[#allocation8 + $0x3b8] ss:$28 sps:$4 sm:$0xff]  }
 0x66d   :  { %5390 = vmatprep.subr.bf16.mxu0 %v13316_v62 }
 0x670   :  { %5391 = vmatpush1.bf16.msra.mxu0 %v13314_v63 }
 0x671   :  { %5392 = vmatprep.subr.bf16.mxu0 %v13322_v1  ;;  %v13370_v1 = vld [vmem:[#allocation8 + $0x3f4] ss:$28 sps:$4 sm:$0xff]  }
 0x674   :  { %5393 = vmatpush1.bf16.msra.mxu0 %v13320_v2 }
 0x675   :  { %5405 = vmatprep.subr.bf16.mxu0 %v13328_v3 }
 0x676   :  { %v5224_v5 = vpop.f32.mrb[20].mxu1 }
 0x677   :  { %5395 = vmatmul.mubr.bf16.vlgmr.msra.gmra.mrb[28].mxu0 %v15404_v54  ;;  %v5226_v6 = vpop.f32.mrb[21].mxu1  ;;  %v3096_v54 = vrot.slane %v15992_v23, %v14627_v9  ;;  %v12213_v50 = vadd.f32 %v5224_v5, %v3104_v30  ;;  %v13373_v5 = vld [vmem:[#allocation8 + $0x124] ss:$28 sps:$4 sm:$0xff]  }
 0x678   :  { %5406 = vmatpush1.bf16.msra.mxu0 %v13326_v42  ;;  %v5228_v11 = vpop.f32.mrb[22].mxu1  ;;  %5437 = vmatprep.mubr.bf16.mxu0 %v14363_v0  ;;  %v12215_v38 = vadd.f32 %v5226_v6, %v3108_v44  ;;  %v13365_v42 = vld [vmem:[#allocation8 + $0xe8] ss:$28 sps:$4 sm:$0xff]  }
 0x679   :  { %v5230_v14 = vpop.f32.mrb[23].mxu1  ;;  %5407 = vmatprep.subr.bf16.mxu0 %v13334_v4  ;;  %v12217_v46 = vadd.f32 %v5228_v11, %v3104_v30  ;;  %v13368_v11 = vld [vmem:[#allocation8 + $0x3f0] ss:$28 sps:$4 sm:$0xff]  }
 0x67a   :  { %v12219_v51 = vadd.f32 %v5230_v14, %v3108_v44  ;;  %v13371_v14 = vld [vmem:[#allocation8 + $0x120] ss:$28 sps:$4 sm:$0xff]   ;;  %v13386_v44 = vld [vmem:[#allocation8 + $0x498] ss:$28 sps:$4 sm:$0xff]  }
 0x67c   :  { %5408 = vmatpush1.bf16.msra.mxu0 %v13332_v13  ;;  %v13376_v13 = vld [vmem:[#allocation8 + $0x42c] ss:$28 sps:$4 sm:$0xff]  }
 0x67d   :  { %8045 = vmatprep.subr.bf16.mxu0 %v13343_v20  ;;  %v13379_v20 = vld [vmem:[#allocation8 + $0x15c] ss:$28 sps:$4 sm:$0xff]  }
 0x682   :  { %v5095_v18 = vpop.f32.mrb[20].mxu0 }
 0x683   :  { %v12209_v19 = vadd.f32 %v5095_v18, %v3096_v54  ;;  %11397 = vmatmul.mubr.msk.bf16.vlgmr.msra.gmra.mrb[28].mxu0 %vm4928_vm3, %v15296_v59  ;;  %v5097_v27 = vpop.f32.mrb[21].mxu0  ;;  %v13377_v18 = vld [vmem:[#allocation8 + $0x158] ss:$28 sps:$4 sm:$0xff]  }
 0x684   :  { %8046 = vmatpush1.bf16.msra.mxu0 %v13341_v15  ;;  %v12210_v28 = vadd.f32 %v5097_v27, %v3100_v16  ;;  %v5099_v29 = vpop.f32.mrb[22].mxu0 }
 0x685   :  { %v12211_v21 = vadd.f32 %v5099_v29, %v3096_v54  ;;  %v5101_v55 = vpop.f32.mrb[23].mxu0  ;;  %8047 = vmatprep.subr.bf16.mxu0 %v13349_v17  ;;  %v5612_v33 = vmax.f32 %v12209_v19, 0.0  ;;  %v13374_v54 = vld [vmem:[#allocation8 + $0x428] ss:$28 sps:$4 sm:$0xff]  }
 0x686   :  { %v12212_v32 = vadd.f32 %v5101_v55, %v3100_v16  ;;  %v5613_v35 = vmax.f32 %v12210_v28, 0.0  ;;  %v13382_v16 = vld [vmem:[#allocation8 + $0x464] ss:$28 sps:$4 sm:$0xff]   ;;  %v13385_v28 = vld [vmem:[#allocation8 + $0x194] ss:$28 sps:$4 sm:$0xff]  }
 0x687   :  { %v5619_v34 = vmax.f32 %v12211_v21, 0.0  ;;  %v13388_v21 = vld [vmem:[#allocation8 + $0x49c] ss:$28 sps:$4 sm:$0xff]   ;;  %v13383_v55 = vld [vmem:[#allocation8 + $0x190] ss:$28 sps:$4 sm:$0xff]  }
 0x688   :  { %v5620_v59 = vmax.f32 %v12212_v32, 0.0  ;;  %8048 = vmatpush1.bf16.msra.mxu0 %v13347_v7  ;;  %v13380_v7 = vld [vmem:[#allocation8 + $0x460] ss:$28 sps:$4 sm:$0xff]   ;;  %v13394_v32 = vld [vmem:[#allocation8 + $0x4d4] ss:$28 sps:$4 sm:$0xff]  }
 0x689   :  { %v16004_v37 = vpack.c.bf16 %v5619_v34, %v5612_v33  ;;  %8049 = vmatprep.subr.bf16.mxu0 %v13355_v31  ;;  %v13391_v31 = vld [vmem:[#allocation8 + $0x1cc] ss:$28 sps:$4 sm:$0xff]   ;;  %v13397_v34 = vld [vmem:[#allocation8 + $0x204] ss:$28 sps:$4 sm:$0xff]  }
 0x68a   :  { %v16006_v39 = vpack.c.bf16 %v5620_v59, %v5613_v35  ;;  %v5267_v40 = vpop.f32.mrb[24].mxu0  ;;  %v13389_v33 = vld [vmem:[#allocation8 + $0x1c8] ss:$28 sps:$4 sm:$0xff]   ;;  %v13392_v35 = vld [vmem:[#allocation8 + $0x4d0] ss:$28 sps:$4 sm:$0xff]  }
 0x68b   :  { %v12214_v47 = vadd.f32 %v12213_v50, %v5267_v40  ;;  %v5269_v48 = vpop.f32.mrb[25].mxu0  ;;  %v13400_v59 = vld [vmem:[#allocation8 + $0x50c] ss:$28 sps:$4 sm:$0xff]   ;;  %v13403_v50 = vld [vmem:[#allocation8 + $0x23c] ss:$28 sps:$4 sm:$0xff]  }
 0x68c   :  { %8050 = vmatpush1.bf16.msra.mxu0 %v13353_v36  ;;  %v12216_v52 = vadd.f32 %v12215_v38, %v5269_v48  ;;  %v5271_v53 = vpop.f32.mrb[26].mxu0  ;;  %7905 = vmatprep.mubr.bf16.mxu1 %v16006_v39  ;;  %v13395_v36 = vld [vmem:[#allocation8 + $0x200] ss:$28 sps:$4 sm:$0xff]   ;;  %v13398_v38 = vld [vmem:[#allocation8 + $0x508] ss:$28 sps:$4 sm:$0xff]  }
 0x68d   :  { %v12218_v57 = vadd.f32 %v12217_v46, %v5271_v53  ;;  %8077 = vmatprep.mubr.bf16.mxu0 %v16006_v39  ;;  %v5273_v58 = vpop.f32.mrb[27].mxu0  ;;  %7906 = vmatmul.mubr.bf16.vlgmr.msra.gmra.mrb[40].mxu1 %v16004_v37  ;;  %v5614_v62 = vmax.f32 %v12214_v47, 0.0  ;;  %v13406_v40 = vld [vmem:[#allocation8 + $0x544] ss:$28 sps:$4 sm:$0xff]   ;;  %v13412_v47 = vld [vmem:[#allocation8 + $0x57c] ss:$28 sps:$4 sm:$0xff]  }
 0x68e   :  { %v12220_v61 = vadd.f32 %v12219_v51, %v5273_v58  ;;  %7917 = vmatpush1.bf16.msra.mxu1 %v13356_v43  ;;  %8051 = vmatprep.subr.bf16.mxu0 %v13361_v45  ;;  %v5615_v2 = vmax.f32 %v12216_v52, 0.0  ;;  %v13401_v43 = vld [vmem:[#allocation8 + $0x238] ss:$28 sps:$4 sm:$0xff]   ;;  %v13404_v46 = vld [vmem:[#allocation8 + $0x540] ss:$28 sps:$4 sm:$0xff]  }
 0x68f   :  { %v5621_v63 = vmax.f32 %v12218_v57, 0.0  ;;  %7918 = vmatprep.subr.bf16.mxu1 %v13364_v49  ;;  %v13409_v45 = vld [vmem:[#allocation8 + $0x274] ss:$28 sps:$4 sm:$0xff]   ;;  %v13415_v49 = vld [vmem:[#allocation8 + $0x2ac] ss:$28 sps:$4 sm:$0xff]  }
 0x690   :  { %v5622_v3 = vmax.f32 %v12220_v61, 0.0  ;;  %8052 = vmatpush1.bf16.msra.mxu0 %v13359_v56  ;;  %v13407_v48 = vld [vmem:[#allocation8 + $0x270] ss:$28 sps:$4 sm:$0xff]   ;;  %v13410_v51 = vld [vmem:[#allocation8 + $0x578] ss:$28 sps:$4 sm:$0xff]   ;;  %v3120_v61 = vrot.slane %v15992_v23, %v15246_v41 }
 0x691   :  { %v16011_v4 = vpack.c.bf16 %v5621_v63, %v5614_v62  ;;  %8053 = vmatprep.subr.bf16.mxu0 %v13367_v60  ;;  %v13418_v52 = vld [vmem:[#allocation8 + $0x5b4] ss:$28 sps:$4 sm:$0xff]   ;;  %v13413_v53 = vld [vmem:[#allocation8 + $0x2a8] ss:$28 sps:$4 sm:$0xff]   ;;  %v13419_v60 = vld [vmem:[#allocation8 + $0x2e0] ss:$28 sps:$4 sm:$0xff]  }
 0x692   :  { %v16013_v6 = vpack.c.bf16 %v5622_v3, %v5615_v2  ;;  %7919 = vmatpush1.bf16.msra.mxu1 %v13362_v22  ;;  %v13421_v56 = vld [vmem:[#allocation8 + $0x2e4] ss:$28 sps:$4 sm:$0xff]   ;;  %v13416_v57 = vld [vmem:[#allocation8 + $0x5b0] ss:$28 sps:$4 sm:$0xff]   ;;  %v13427_v22 = vld [vmem:[#allocation8 + $0x31c] ss:$28 sps:$4 sm:$0xff]  }
 0x693   :  { %7920 = vmatprep.subr.bf16.mxu1 %v13370_v1  ;;  %v13424_v58 = vld [vmem:[#allocation8 + $0x5ec] ss:$28 sps:$4 sm:$0xff]   ;;  %v13430_v1 = vld [vmem:[#allocation8 + $0x624] ss:$28 sps:$4 sm:$0xff]   ;;  %v13425_v3 = vld [vmem:[#allocation8 + $0x318] ss:$28 sps:$4 sm:$0xff]  }
 0x694   :  { %8054 = vmatpush1.bf16.msra.mxu0 %v13365_v42  ;;  %7948 = vmatprep.mubr.bf16.mxu1 %v16013_v6  ;;  %v13422_v62 = vld [vmem:[#allocation8 + $0x5e8] ss:$28 sps:$4 sm:$0xff]  }
 0x695   :  { %8055 = vmatprep.subr.bf16.mxu0 %v13373_v5 }
 0x696   :  { %7921 = vmatpush1.bf16.msra.mxu1 %v13368_v11 }
 0x697   :  { %v12059_v15 = vpop.f32.mrb[24].mxu1  ;;  %7922 = vmatprep.subr.bf16.mxu1 %v13376_v13  ;;  %v13433_v13 = vld [vmem:[#allocation8 + $0x354] ss:$28 sps:$4 sm:$0xff]  }
 0x698   :  { %8056 = vmatpush1.bf16.msra.mxu0 %v13371_v14  ;;  %v12060_v17 = vpop.f32.mrb[25].mxu1 }
 0x699   :  { %v16016_v19 = vadd.f32 %v12060_v17, %v12059_v15  ;;  %v12062_v27 = vpop.f32.mrb[26].mxu1  ;;  %8057 = vmatprep.subr.bf16.mxu0 %v13379_v20  ;;  %v13428_v20 = vld [vmem:[#allocation8 + $0x620] ss:$28 sps:$4 sm:$0xff]  }
 0x69a   :  { %v12063_v29 = vpop.f32.mrb[27].mxu1  ;;  %7923 = vmatpush1.bf16.msra.mxu1 %v13374_v54  ;;  %v13436_v17 = vld [vmem:[#allocation8 + $0x65c] ss:$28 sps:$4 sm:$0xff]  }
 0x69b   :  { %v16018_v30 = vadd.f32 %v12063_v29, %v12062_v27  ;;  %7924 = vmatprep.subr.bf16.mxu1 %v13382_v16  ;;  %v5483_v42 = vadd.f32 %v16016_v19, %v3120_v61  ;;  %v13439_v19 = vld [vmem:[#allocation8 + $0x38c] ss:$28 sps:$4 sm:$0xff]   ;;  %v13442_v29 = vld [vmem:[#allocation8 + $0x694] ss:$28 sps:$4 sm:$0xff]  }
 0x69c   :  { %8058 = vmatpush1.bf16.msra.mxu0 %v13377_v18  ;;  %v13431_v18 = vld [vmem:[#allocation8 + $0x350] ss:$28 sps:$4 sm:$0xff]  }
 0x69d   :  { %8059 = vmatprep.subr.bf16.mxu0 %v13385_v28  ;;  %v5486_v54 = vadd.f32 %v16018_v30, %v3120_v61  ;;  %v13434_v28 = vld [vmem:[#allocation8 + $0x658] ss:$28 sps:$4 sm:$0xff]   ;;  %v13440_v30 = vld [vmem:[#allocation8 + $0x690] ss:$28 sps:$4 sm:$0xff]  }
 0x69e   :  { %7925 = vmatpush1.bf16.msra.mxu1 %v13380_v7  ;;  %v13437_v7 = vld [vmem:[#allocation8 + $0x388] ss:$28 sps:$4 sm:$0xff]  }
 0x69f   :  { %7926 = vmatprep.subr.bf16.mxu1 %v13388_v21  ;;  %v13445_v21 = vld [vmem:[#allocation8 + $0x3c4] ss:$28 sps:$4 sm:$0xff]  }
 0x6a0   :  { %8060 = vmatpush1.bf16.msra.mxu0 %v13383_v55  ;;  %v13448_v55 = vld [vmem:[#allocation8 + $0x6cc] ss:$28 sps:$4 sm:$0xff]  }
 0x6a1   :  { %8061 = vmatprep.subr.bf16.mxu0 %v13391_v31  ;;  %v13443_v31 = vld [vmem:[#allocation8 + $0x3c0] ss:$28 sps:$4 sm:$0xff]  }
 0x6a2   :  { %7927 = vmatpush1.bf16.msra.mxu1 %v13386_v44  ;;  %v13451_v44 = vld [vmem:[#allocation8 + $0x3fc] ss:$28 sps:$4 sm:$0xff]  }
 0x6a3   :  { %7928 = vmatprep.subr.bf16.mxu1 %v13394_v32  ;;  %v13446_v32 = vld [vmem:[#allocation8 + $0x6c8] ss:$28 sps:$4 sm:$0xff]  }
 0x6a4   :  { %8062 = vmatpush1.bf16.msra.mxu0 %v13389_v33  ;;  %v13493_v33 = vld [vmem:[#allocation8 + $0x704] ss:$28 sps:$4 sm:$0xff]  }
 0x6a5   :  { %8063 = vmatprep.subr.bf16.mxu0 %v13397_v34  ;;  %v13449_v34 = vld [vmem:[#allocation8 + $0x3f8] ss:$28 sps:$4 sm:$0xff]  }
 0x6a6   :  { %7929 = vmatpush1.bf16.msra.mxu1 %v13392_v35  ;;  %v13454_v35 = vld [vmem:[#allocation8 + $0x434] ss:$28 sps:$4 sm:$0xff]  }
 0x6a7   :  { %7930 = vmatprep.subr.bf16.mxu1 %v13400_v59  ;;  %v13491_v59 = vld [vmem:[#allocation8 + $0x700] ss:$28 sps:$4 sm:$0xff]  }
 0x6a8   :  { %8064 = vmatpush1.bf16.msra.mxu0 %v13395_v36  ;;  %v13499_v36 = vld [vmem:[#allocation8 + $0x73c] ss:$28 sps:$4 sm:$0xff]  }
 0x6a9   :  { %8065 = vmatprep.subr.bf16.mxu0 %v13403_v50  ;;  %v13452_v50 = vld [vmem:[#allocation8 + $0x430] ss:$28 sps:$4 sm:$0xff]  }
 0x6aa   :  { %7931 = vmatpush1.bf16.msra.mxu1 %v13398_v38  ;;  %v13457_v38 = vld [vmem:[#allocation8 + $0x46c] ss:$28 sps:$4 sm:$0xff]  }
 0x6ab   :  { %7932 = vmatprep.subr.bf16.mxu1 %v13406_v40  ;;  %v13497_v40 = vld [vmem:[#allocation8 + $0x738] ss:$28 sps:$4 sm:$0xff]  }
 0x6ac   :  { %8066 = vmatpush1.bf16.msra.mxu0 %v13401_v43  ;;  %v13505_v43 = vld [vmem:[#allocation8 + $0x774] ss:$28 sps:$4 sm:$0xff]  }
 0x6ad   :  { %8067 = vmatprep.subr.bf16.mxu0 %v13409_v45  ;;  %v13455_v45 = vld [vmem:[#allocation8 + $0x468] ss:$28 sps:$4 sm:$0xff]  }
 0x6ae   :  { %7933 = vmatpush1.bf16.msra.mxu1 %v13404_v46  ;;  %v13460_v46 = vld [vmem:[#allocation8 + $0x4a4] ss:$28 sps:$4 sm:$0xff]  }
 0x6af   :  { %7934 = vmatprep.subr.bf16.mxu1 %v13412_v47  ;;  %v13503_v47 = vld [vmem:[#allocation8 + $0x770] ss:$28 sps:$4 sm:$0xff]  }
 0x6b0   :  { %8068 = vmatpush1.bf16.msra.mxu0 %v13407_v48  ;;  %v13511_v48 = vld [vmem:[#allocation8 + $0x7ac] ss:$28 sps:$4 sm:$0xff]  }
 0x6b1   :  { %8069 = vmatprep.subr.bf16.mxu0 %v13415_v49  ;;  %v13458_v49 = vld [vmem:[#allocation8 + $0x4a0] ss:$28 sps:$4 sm:$0xff]  }
 0x6b2   :  { %7935 = vmatpush1.bf16.msra.mxu1 %v13410_v51  ;;  %v13463_v51 = vld [vmem:[#allocation8 + $0x4dc] ss:$28 sps:$4 sm:$0xff]  }
 0x6b3   :  { %7936 = vmatprep.subr.bf16.mxu1 %v13418_v52  ;;  %v13509_v52 = vld [vmem:[#allocation8 + $0x7a8] ss:$28 sps:$4 sm:$0xff]  }
 0x6b4   :  { %8070 = vmatpush1.bf16.msra.mxu0 %v13413_v53 }
 0x6b5   :  { %8071 = vmatprep.subr.bf16.mxu0 %v13421_v56  ;;  %v13517_v56 = vld [vmem:[#allocation8 + $0x7e4] ss:$28 sps:$4 sm:$0xff]  }
 0x6b6   :  { %7937 = vmatpush1.bf16.msra.mxu1 %v13416_v57 }
 0x6b7   :  { %v12081_v63 = vpop.f32.mrb[28].mxu1  ;;  %7938 = vmatprep.subr.bf16.mxu1 %v13424_v58  ;;  %v13461_v58 = vld [vmem:[#allocation8 + $0x4d8] ss:$28 sps:$4 sm:$0xff]  }
 0x6b8   :  { %8072 = vmatpush1.bf16.msra.mxu0 %v13419_v60  ;;  %v12082_v2 = vpop.f32.mrb[29].mxu1 }
 0x6b9   :  { %v12083_v5 = vadd.f32 %v12082_v2, %v12081_v63  ;;  %v12084_v11 = vpop.f32.mrb[30].mxu1  ;;  %8073 = vmatprep.subr.bf16.mxu0 %v13427_v22  ;;  %v13466_v22 = vld [vmem:[#allocation8 + $0x514] ss:$28 sps:$4 sm:$0xff]   ;;  %v13515_v63 = vld [vmem:[#allocation8 + $0x7e0] ss:$28 sps:$4 sm:$0xff]  }
 0x6ba   :  { %v12085_v14 = vpop.f32.mrb[31].mxu1  ;;  %7939 = vmatpush1.bf16.msra.mxu1 %v13422_v62 }
 0x6bb   :  { %v16024_v15 = vadd.f32 %v12083_v5, %v5483_v42  ;;  %v12086_v16 = vadd.f32 %v12085_v14, %v12084_v11  ;;  %7940 = vmatprep.subr.bf16.mxu1 %v13430_v1  ;;  %v13464_v42 = vld [vmem:[#allocation8 + $0x510] ss:$28 sps:$4 sm:$0xff]  }
 0x6bc   :  { %8074 = vmatpush1.bf16.msra.mxu0 %v13425_v3  ;;  %v13523_v3 = vld [vmem:[#allocation8 + $0x81c] ss:$28 sps:$4 sm:$0xff]   ;;  %v13469_v11 = vld [vmem:[#allocation8 + $0x54c] ss:$28 sps:$4 sm:$0xff]  }
 0x6bd   :  { %v16026_v27 = vadd.f32 %v12086_v16, %v5486_v54  ;;  %8075 = vmatprep.subr.bf16.mxu0 %v13433_v13  ;;  %v13521_v13 = vld [vmem:[#allocation8 + $0x818] ss:$28 sps:$4 sm:$0xff]  }
 0x6be   :  { %7941 = vmatpush1.bf16.msra.mxu1 %v13428_v20  ;;  %v13529_v20 = vld [vmem:[#allocation8 + $0x854] ss:$28 sps:$4 sm:$0xff]  }
 0x6bf   :  { %7942 = vmatprep.subr.bf16.mxu1 %v13436_v17  ;;  %v13467_v17 = vld [vmem:[#allocation8 + $0x548] ss:$28 sps:$4 sm:$0xff]  }
 0x6c0   :  { %8076 = vmatpush1.bf16.msra.mxu0 %v13431_v18 }
 0x6c1   :  { %8088 = vmatprep.subr.bf16.mxu0 %v13439_v19 }
 0x6c2   :  { %7943 = vmatpush1.bf16.msra.mxu1 %v13434_v28 }
 0x6c3   :  { %8078 = vmatmul.mubr.bf16.vlgmr.msra.gmra.mrb[32].mxu0 %v16004_v37  ;;  %7944 = vmatprep.subr.bf16.mxu1 %v13442_v29  ;;  %v13527_v29 = vld [vmem:[#allocation8 + $0x850] ss:$28 sps:$4 sm:$0xff]  }
 0x6c4   :  { %8089 = vmatpush1.bf16.msra.mxu0 %v13437_v7  ;;  %8120 = vmatprep.mubr.bf16.mxu0 %v16013_v6  ;;  %v13535_v7 = vld [vmem:[#allocation8 + $0x88c] ss:$28 sps:$4 sm:$0xff]  }
 0x6c5   :  { %8090 = vmatprep.subr.bf16.mxu0 %v13445_v21 }
 0x6c6   :  { %7945 = vmatpush1.bf16.msra.mxu1 %v13440_v30  ;;  %v13470_v30 = vld [vmem:[#allocation8 + $0x580] ss:$28 sps:$4 sm:$0xff]  }
 0x6c7   :  { %7946 = vmatprep.subr.bf16.mxu1 %v13448_v55  ;;  %v13475_v55 = vld [vmem:[#allocation8 + $0x5bc] ss:$28 sps:$4 sm:$0xff]  }
 0x6c8   :  { %8091 = vmatpush1.bf16.msra.mxu0 %v13443_v31 }
 0x6c9   :  { %8092 = vmatprep.subr.bf16.mxu0 %v13451_v44  ;;  %v13533_v44 = vld [vmem:[#allocation8 + $0x888] ss:$28 sps:$4 sm:$0xff]  }
 0x6ca   :  { %7947 = vmatpush1.bf16.msra.mxu1 %v13446_v32  ;;  %v13541_v32 = vld [vmem:[#allocation8 + $0x8c4] ss:$28 sps:$4 sm:$0xff]  }
 0x6cb   :  { %7959 = vmatprep.subr.bf16.mxu1 %v13493_v33  ;;  %v13473_v33 = vld [vmem:[#allocation8 + $0x5b8] ss:$28 sps:$4 sm:$0xff]  }
 0x6cc   :  { %8093 = vmatpush1.bf16.msra.mxu0 %v13449_v34  ;;  %v13478_v34 = vld [vmem:[#allocation8 + $0x5f4] ss:$28 sps:$4 sm:$0xff]  }
 0x6cd   :  { %7949 = vmatmul.mubr.bf16.vlgmr.msra.gmra.mrb[40].mxu1 %v16011_v4  ;;  %8094 = vmatprep.subr.bf16.mxu0 %v13454_v35  ;;  %v13539_v35 = vld [vmem:[#allocation8 + $0x8c0] ss:$28 sps:$4 sm:$0xff]  }
 0x6ce   :  { %7960 = vmatpush1.bf16.msra.mxu1 %v13491_v59  ;;  %v13547_v59 = vld [vmem:[#allocation8 + $0x8fc] ss:$28 sps:$4 sm:$0xff]  }
 0x6cf   :  { %7961 = vmatprep.subr.bf16.mxu1 %v13499_v36  ;;  %v13476_v36 = vld [vmem:[#allocation8 + $0x5f0] ss:$28 sps:$4 sm:$0xff]  }
 0x6d0   :  { %8095 = vmatpush1.bf16.msra.mxu0 %v13452_v50  ;;  %v13481_v50 = vld [vmem:[#allocation8 + $0x62c] ss:$28 sps:$4 sm:$0xff]  }
 0x6d1   :  { %8096 = vmatprep.subr.bf16.mxu0 %v13457_v38  ;;  %v13545_v38 = vld [vmem:[#allocation8 + $0x8f8] ss:$28 sps:$4 sm:$0xff]  }
 0x6d2   :  { %7962 = vmatpush1.bf16.msra.mxu1 %v13497_v40  ;;  %v13553_v40 = vld [vmem:[#allocation8 + $0x934] ss:$28 sps:$4 sm:$0xff]  }
 0x6d3   :  { %7963 = vmatprep.subr.bf16.mxu1 %v13505_v43  ;;  %v13479_v43 = vld [vmem:[#allocation8 + $0x628] ss:$28 sps:$4 sm:$0xff]  }
 0x6d4   :  { %8097 = vmatpush1.bf16.msra.mxu0 %v13455_v45  ;;  %v13484_v45 = vld [vmem:[#allocation8 + $0x664] ss:$28 sps:$4 sm:$0xff]  }
 0x6d5   :  { %8098 = vmatprep.subr.bf16.mxu0 %v13460_v46  ;;  %v13551_v46 = vld [vmem:[#allocation8 + $0x930] ss:$28 sps:$4 sm:$0xff]  }
 0x6d6   :  { %7964 = vmatpush1.bf16.msra.mxu1 %v13503_v47  ;;  %v13559_v47 = vld [vmem:[#allocation8 + $0x96c] ss:$28 sps:$4 sm:$0xff]  }
 0x6d7   :  { %v12103_v53 = vpop.f32.mrb[32].mxu1  ;;  %7965 = vmatprep.subr.bf16.mxu1 %v13511_v48  ;;  %v13482_v48 = vld [vmem:[#allocation8 + $0x660] ss:$28 sps:$4 sm:$0xff]  }
 0x6d8   :  { %8099 = vmatpush1.bf16.msra.mxu0 %v13458_v49  ;;  %v12104_v57 = vpop.f32.mrb[33].mxu1  ;;  %v13487_v49 = vld [vmem:[#allocation8 + $0x69c] ss:$28 sps:$4 sm:$0xff]  }
 0x6d9   :  { %v12105_v60 = vadd.f32 %v12104_v57, %v12103_v53  ;;  %v12106_v61 = vpop.f32.mrb[34].mxu1  ;;  %8100 = vmatprep.subr.bf16.mxu0 %v13463_v51  ;;  %v13557_v51 = vld [vmem:[#allocation8 + $0x968] ss:$28 sps:$4 sm:$0xff]   ;;  %v13485_v53 = vld [vmem:[#allocation8 + $0x698] ss:$28 sps:$4 sm:$0xff]  }
 0x6da   :  { %v12107_v62 = vpop.f32.mrb[35].mxu1  ;;  %7966 = vmatpush1.bf16.msra.mxu1 %v13509_v52  ;;  %v13565_v52 = vld [vmem:[#allocation8 + $0x9a4] ss:$28 sps:$4 sm:$0xff]  }
 0x6db   :  { %v12108_v1 = vadd.f32 %v12107_v62, %v12106_v61  ;;  %v5565_v2 = vadd.f32 %v12105_v60, %v16024_v15  ;;  %7967 = vmatprep.subr.bf16.mxu1 %v13517_v56  ;;  %v13472_v15 = vld [vmem:[#allocation8 + $0x584] ss:$28 sps:$4 sm:$0xff]   ;;  %v13490_v56 = vld [vmem:[#allocation8 + $0x6d4] ss:$28 sps:$4 sm:$0xff]   ;;  %v13496_v61 = vld [vmem:[#allocation8 + $0x70c] ss:$28 sps:$4 sm:$0xff]  }
 0x6dc   :  { %8101 = vmatpush1.bf16.msra.mxu0 %v13461_v58  ;;  %v13563_v57 = vld [vmem:[#allocation8 + $0x9a0] ss:$28 sps:$4 sm:$0xff]   ;;  %v13488_v60 = vld [vmem:[#allocation8 + $0x6d0] ss:$28 sps:$4 sm:$0xff]  }
 0x6dd   :  { %8102 = vmatprep.subr.bf16.mxu0 %v13466_v22  ;;  %v5568_v5 = vadd.f32 %v12108_v1, %v16026_v27  ;;  %v13571_v58 = vld [vmem:[#allocation8 + $0x9dc] ss:$28 sps:$4 sm:$0xff]   ;;  %v13577_v62 = vld [vmem:[#allocation8 + $0xa14] ss:$28 sps:$4 sm:$0xff]   ;;  %v13502_v1 = vld [vmem:[#allocation8 + $0x744] ss:$28 sps:$4 sm:$0xff]  }
 0x6de   :  { %7968 = vmatpush1.bf16.msra.mxu1 %v13515_v63  ;;  %v13569_v22 = vld [vmem:[#allocation8 + $0x9d8] ss:$28 sps:$4 sm:$0xff]   ;;  %v13494_v63 = vld [vmem:[#allocation8 + $0x708] ss:$28 sps:$4 sm:$0xff]  }
 0x6df   :  { %v5605_v14 = vpop.f32.mrb[36].mxu1  ;;  %7969 = vmatprep.subr.bf16.mxu1 %v13523_v3  ;;  %v13583_v3 = vld [vmem:[#allocation8 + $0xa4c] ss:$28 sps:$4 sm:$0xff]  }
 0x6e0   :  { %v5606_v54 = vadd.f32 %v5605_v14, %v5565_v2  ;;  %8103 = vmatpush1.bf16.msra.mxu0 %v13464_v42  ;;  %v12187_v16 = vpop.f32.mrb[37].mxu1  ;;  %v13575_v2 = vld [vmem:[#allocation8 + $0xa10] ss:$28 sps:$4 sm:$0xff]   ;;  %v13500_v42 = vld [vmem:[#allocation8 + $0x740] ss:$28 sps:$4 sm:$0xff]  }
 0x6e1   :  { %v5608_v18 = vpop.f32.mrb[38].mxu1  ;;  %8104 = vmatprep.subr.bf16.mxu0 %v13469_v11  ;;  %v13581_v11 = vld [vmem:[#allocation8 + $0xa48] ss:$28 sps:$4 sm:$0xff]   ;;  %v13506_v14 = vld [vmem:[#allocation8 + $0x778] ss:$28 sps:$4 sm:$0xff]  }
 0x6e2   :  { %v5609_v19 = vadd.f32 %v5608_v18, %v5568_v5  ;;  %v12188_v28 = vpop.f32.mrb[39].mxu1  ;;  %7970 = vmatpush1.bf16.msra.mxu1 %v13521_v13  ;;  %v5618_v27 = vmax.f32 %v5606_v54, 0.0  ;;  %v13508_v5 = vld [vmem:[#allocation8 + $0x77c] ss:$28 sps:$4 sm:$0xff]   ;;  %v13589_v13 = vld [vmem:[#allocation8 + $0xa84] ss:$28 sps:$4 sm:$0xff]  }
 0x6e3   :  { %7971 = vmatprep.subr.bf16.mxu1 %v13529_v20  ;;  %v13514_v20 = vld [vmem:[#allocation8 + $0x7b4] ss:$28 sps:$4 sm:$0xff]   ;;  %v13520_v16 = vld [vmem:[#allocation8 + $0x7ec] ss:$28 sps:$4 sm:$0xff]   ;;  %v13526_v18 = vld [vmem:[#allocation8 + $0x824] ss:$28 sps:$4 sm:$0xff]  }
 0x6e4   :  { %v5625_v21 = vmax.f32 %v5609_v19, 0.0  ;;  %8105 = vmatpush1.bf16.msra.mxu0 %v13467_v17  ;;  %v13512_v54 = vld [vmem:[#allocation8 + $0x7b0] ss:$28 sps:$4 sm:$0xff]   ;;  %v13518_v17 = vld [vmem:[#allocation8 + $0x7e8] ss:$28 sps:$4 sm:$0xff]  }
 0x6e5   :  { %8106 = vmatprep.subr.bf16.mxu0 %v13472_v15  ;;  %v13524_v15 = vld [vmem:[#allocation8 + $0x820] ss:$28 sps:$4 sm:$0xff]   ;;  %v13530_v28 = vld [vmem:[#allocation8 + $0x858] ss:$28 sps:$4 sm:$0xff]  }
 0x6e6   :  { %v16033_v31 = vpack.c.bf16 %v5625_v21, %v5618_v27  ;;  %7972 = vmatpush1.bf16.msra.mxu1 %v13527_v29  ;;  %v13532_v19 = vld [vmem:[#allocation8 + $0x85c] ss:$28 sps:$4 sm:$0xff]   ;;  %v13538_v29 = vld [vmem:[#allocation8 + $0x894] ss:$28 sps:$4 sm:$0xff]   ;;  %v13544_v27 = vld [vmem:[#allocation8 + $0x8cc] ss:$28 sps:$4 sm:$0xff]  }
 0x6e7   :  { %7973 = vmatprep.subr.bf16.mxu1 %v13535_v7  ;;  %v13536_v7 = vld [vmem:[#allocation8 + $0x890] ss:$28 sps:$4 sm:$0xff]   ;;  %v13542_v21 = vld [vmem:[#allocation8 + $0x8c8] ss:$28 sps:$4 sm:$0xff]  }
 0x6e8   :  { %8107 = vmatpush1.bf16.msra.mxu0 %v13470_v30  ;;  %v13550_v30 = vld [vmem:[#allocation8 + $0x904] ss:$28 sps:$4 sm:$0xff]  }
 0x6e9   :  { %8108 = vmatprep.subr.bf16.mxu0 %v13475_v55  ;;  %v13548_v55 = vld [vmem:[#allocation8 + $0x900] ss:$28 sps:$4 sm:$0xff]  }
 0x6ea   :  { %7974 = vmatpush1.bf16.msra.mxu1 %v13533_v44  ;;  %v13556_v44 = vld [vmem:[#allocation8 + $0x93c] ss:$28 sps:$4 sm:$0xff]  }
 0x6eb   :  { %7975 = vmatprep.subr.bf16.mxu1 %v13541_v32  ;;  %v13554_v32 = vld [vmem:[#allocation8 + $0x938] ss:$28 sps:$4 sm:$0xff]  }
 0x6ec   :  { %8109 = vmatpush1.bf16.msra.mxu0 %v13473_v33  ;;  %v13562_v33 = vld [vmem:[#allocation8 + $0x974] ss:$28 sps:$4 sm:$0xff]  }
 0x6ed   :  { %8110 = vmatprep.subr.bf16.mxu0 %v13478_v34  ;;  %v13560_v34 = vld [vmem:[#allocation8 + $0x970] ss:$28 sps:$4 sm:$0xff]  }
 0x6ee   :  { %7976 = vmatpush1.bf16.msra.mxu1 %v13539_v35  ;;  %v13568_v35 = vld [vmem:[#allocation8 + $0x9ac] ss:$28 sps:$4 sm:$0xff]  }
 0x6ef   :  { %7977 = vmatprep.subr.bf16.mxu1 %v13547_v59  ;;  %v13566_v59 = vld [vmem:[#allocation8 + $0x9a8] ss:$28 sps:$4 sm:$0xff]  }
 0x6f0   :  { %8111 = vmatpush1.bf16.msra.mxu0 %v13476_v36  ;;  %v13574_v36 = vld [vmem:[#allocation8 + $0x9e4] ss:$28 sps:$4 sm:$0xff]  }
 0x6f1   :  { %8112 = vmatprep.subr.bf16.mxu0 %v13481_v50  ;;  %v13572_v50 = vld [vmem:[#allocation8 + $0x9e0] ss:$28 sps:$4 sm:$0xff]  }
 0x6f2   :  { %7978 = vmatpush1.bf16.msra.mxu1 %v13545_v38  ;;  %v13580_v38 = vld [vmem:[#allocation8 + $0xa1c] ss:$28 sps:$4 sm:$0xff]  }
 0x6f3   :  { %7979 = vmatprep.subr.bf16.mxu1 %v13553_v40  ;;  %v13578_v40 = vld [vmem:[#allocation8 + $0xa18] ss:$28 sps:$4 sm:$0xff]  }
 0x6f4   :  { %8113 = vmatpush1.bf16.msra.mxu0 %v13479_v43  ;;  %v13586_v43 = vld [vmem:[#allocation8 + $0xa54] ss:$28 sps:$4 sm:$0xff]  }
 0x6f5   :  { %8114 = vmatprep.subr.bf16.mxu0 %v13484_v45  ;;  %v13584_v45 = vld [vmem:[#allocation8 + $0xa50] ss:$28 sps:$4 sm:$0xff]  }
 0x6f6   :  { %7980 = vmatpush1.bf16.msra.mxu1 %v13551_v46  ;;  %v13592_v46 = vld [vmem:[#allocation8 + $0xa8c] ss:$28 sps:$4 sm:$0xff]  }
 0x6f7   :  { %7981 = vmatprep.subr.bf16.mxu1 %v13559_v47  ;;  %v3112_v47 = vrot.slane %v15992_v23, %v15359_v25 }
 0x6f8   :  { %8115 = vmatpush1.bf16.msra.mxu0 %v13482_v48  ;;  %v3116_v48 = vrot.slane %v15992_v23, %v15362_v26  ;;  %v13598_v23 = vld [vmem:[#allocation8 + $0xac4] ss:$28 sps:$4 sm:$0xff]  }
 0x6f9   :  { %8116 = vmatprep.subr.bf16.mxu0 %v13487_v49 }
 0x6fa   :  { %7982 = vmatpush1.bf16.msra.mxu1 %v13557_v51 }
 0x6fb   :  { %7983 = vmatprep.subr.bf16.mxu1 %v13565_v52 }
 0x6fc   :  { %8117 = vmatpush1.bf16.msra.mxu0 %v13485_v53 }
 0x6fd   :  { %8118 = vmatprep.subr.bf16.mxu0 %v13490_v56 }
 0x6fe   :  { %7984 = vmatpush1.bf16.msra.mxu1 %v13563_v57 }
 0x6ff   :  { %7985 = vmatprep.subr.bf16.mxu1 %v13571_v58 }
 0x700   :  { %8119 = vmatpush1.bf16.msra.mxu0 %v13488_v60 }
 0x701   :  { %8131 = vmatprep.subr.bf16.mxu0 %v13496_v61 }
 0x702   :  { %7986 = vmatpush1.bf16.msra.mxu1 %v13569_v22 }
 0x703   :  { %8121 = vmatmul.mubr.bf16.vlgmr.msra.gmra.mrb[32].mxu0 %v16011_v4  ;;  %7987 = vmatprep.subr.bf16.mxu1 %v13577_v62 }
 0x704   :  { %8132 = vmatpush1.bf16.msra.mxu0 %v13494_v63 }
 0x705   :  { %8133 = vmatprep.subr.bf16.mxu0 %v13502_v1 }
 0x706   :  { %7988 = vmatpush1.bf16.msra.mxu1 %v13575_v2 }
 0x707   :  { %7989 = vmatprep.subr.bf16.mxu1 %v13583_v3  ;;  %v13587_v3 = vld [vmem:[#allocation8 + $0xa80] ss:$28 sps:$4 sm:$0xff]  }
 0x708   :  { %8134 = vmatpush1.bf16.msra.mxu0 %v13500_v42  ;;  %v13590_v42 = vld [vmem:[#allocation8 + $0xa88] ss:$28 sps:$4 sm:$0xff]  }
 0x709   :  { %8135 = vmatprep.subr.bf16.mxu0 %v13508_v5  ;;  %v13595_v5 = vld [vmem:[#allocation8 + $0xabc] ss:$28 sps:$4 sm:$0xff]  }
 0x70a   :  { %7990 = vmatpush1.bf16.msra.mxu1 %v13581_v11  ;;  %v13593_v11 = vld [vmem:[#allocation8 + $0xab8] ss:$28 sps:$4 sm:$0xff]  }
 0x70b   :  { %8002 = vmatprep.subr.bf16.mxu1 %v13589_v13  ;;  %v13596_v13 = vld [vmem:[#allocation8 + $0xac0] ss:$28 sps:$4 sm:$0xff]  }
 0x70c   :  { %8136 = vmatpush1.bf16.msra.mxu0 %v13506_v14  ;;  %v13601_v14 = vld [vmem:[#allocation8 + $0x14] ss:$28 sps:$4 sm:$0xff]  }
 0x70d   :  { %8137 = vmatprep.subr.bf16.mxu0 %v13514_v20  ;;  %v13602_v20 = vld [vmem:[#allocation8 + $0x1d8] ss:$28 sps:$4 sm:$0xff]  }
 0x710   :  { %8138 = vmatpush1.bf16.msra.mxu0 %v13512_v54  ;;  %v13599_v54 = vld [vmem:[#allocation8 + $0x10] ss:$28 sps:$4 sm:$0xff]  }
 0x711   :  { %8139 = vmatprep.subr.bf16.mxu0 %v13520_v16  ;;  %v13603_v16 = vld [vmem:[#allocation8 + $0x18] ss:$28 sps:$4 sm:$0xff]  }
 0x714   :  { %8140 = vmatpush1.bf16.msra.mxu0 %v13518_v17  ;;  %v13606_v17 = vld [vmem:[#allocation8 + $0x4c] ss:$28 sps:$4 sm:$0xff]  }
 0x715   :  { %8141 = vmatprep.subr.bf16.mxu0 %v13526_v18  ;;  %v13607_v18 = vld [vmem:[#allocation8 + $0x210] ss:$28 sps:$4 sm:$0xff]  }
 0x718   :  { %8142 = vmatpush1.bf16.msra.mxu0 %v13524_v15  ;;  %v13604_v15 = vld [vmem:[#allocation8 + $0x48] ss:$28 sps:$4 sm:$0xff]  }
 0x719   :  { %8143 = vmatprep.subr.bf16.mxu0 %v13532_v19  ;;  %v13608_v19 = vld [vmem:[#allocation8 + $0x50] ss:$28 sps:$4 sm:$0xff]  }
 0x71c   :  { %8144 = vmatpush1.bf16.msra.mxu0 %v13530_v28  ;;  %v13611_v28 = vld [vmem:[#allocation8 + $0x84] ss:$28 sps:$4 sm:$0xff]  }
 0x71d   :  { %8145 = vmatprep.subr.bf16.mxu0 %v13538_v29  ;;  %v13612_v29 = vld [vmem:[#allocation8 + $0x248] ss:$28 sps:$4 sm:$0xff]  }
 0x720   :  { %8146 = vmatpush1.bf16.msra.mxu0 %v13536_v7  ;;  %v13609_v7 = vld [vmem:[#allocation8 + $0x80] ss:$28 sps:$4 sm:$0xff]  }
 0x721   :  { %8147 = vmatprep.subr.bf16.mxu0 %v13544_v27  ;;  %v13613_v27 = vld [vmem:[#allocation8 + $0x88] ss:$28 sps:$4 sm:$0xff]  }
 0x724   :  { %8148 = vmatpush1.bf16.msra.mxu0 %v13542_v21  ;;  %v13616_v21 = vld [vmem:[#allocation8 + $0xbc] ss:$28 sps:$4 sm:$0xff]  }
 0x725   :  { %8149 = vmatprep.subr.bf16.mxu0 %v13550_v30  ;;  %v13617_v30 = vld [vmem:[#allocation8 + $0x280] ss:$28 sps:$4 sm:$0xff]  }
 0x728   :  { %8150 = vmatpush1.bf16.msra.mxu0 %v13548_v55  ;;  %v13614_v55 = vld [vmem:[#allocation8 + $0xb8] ss:$28 sps:$4 sm:$0xff]  }
 0x729   :  { %8151 = vmatprep.subr.bf16.mxu0 %v13556_v44  ;;  %v13618_v44 = vld [vmem:[#allocation8 + $0xc0] ss:$28 sps:$4 sm:$0xff]  }
 0x72c   :  { %8152 = vmatpush1.bf16.msra.mxu0 %v13554_v32  ;;  %v13621_v32 = vld [vmem:[#allocation8 + $0xf4] ss:$28 sps:$4 sm:$0xff]  }
 0x72d   :  { %8153 = vmatprep.subr.bf16.mxu0 %v13562_v33  ;;  %v13619_v33 = vld [vmem:[#allocation8 + $0xf0] ss:$28 sps:$4 sm:$0xff]  }
 0x730   :  { %8154 = vmatpush1.bf16.msra.mxu0 %v13560_v34  ;;  %v13623_v34 = vld [vmem:[#allocation8 + $0xf8] ss:$28 sps:$4 sm:$0xff]  }
 0x731   :  { %8155 = vmatprep.subr.bf16.mxu0 %v13568_v35  ;;  %v13626_v35 = vld [vmem:[#allocation8 + $0x12c] ss:$28 sps:$4 sm:$0xff]  }
 0x734   :  { %8156 = vmatpush1.bf16.msra.mxu0 %v13566_v59  ;;  %v13627_v59 = vld [vmem:[#allocation8 + $0x2f0] ss:$28 sps:$4 sm:$0xff]  }
 0x735   :  { %8157 = vmatprep.subr.bf16.mxu0 %v13574_v36  ;;  %v13624_v36 = vld [vmem:[#allocation8 + $0x128] ss:$28 sps:$4 sm:$0xff]  }
 0x738   :  { %8158 = vmatpush1.bf16.msra.mxu0 %v13572_v50  ;;  %v13628_v50 = vld [vmem:[#allocation8 + $0x130] ss:$28 sps:$4 sm:$0xff]  }
 0x739   :  { %8159 = vmatprep.subr.bf16.mxu0 %v13580_v38  ;;  %v13631_v38 = vld [vmem:[#allocation8 + $0x164] ss:$28 sps:$4 sm:$0xff]  }
 0x73c   :  { %8160 = vmatpush1.bf16.msra.mxu0 %v13578_v40  ;;  %v13632_v40 = vld [vmem:[#allocation8 + $0x328] ss:$28 sps:$4 sm:$0xff]  }
 0x73d   :  { %8161 = vmatprep.subr.bf16.mxu0 %v13586_v43  ;;  %v13629_v43 = vld [vmem:[#allocation8 + $0x160] ss:$28 sps:$4 sm:$0xff]  }
 0x740   :  { %8162 = vmatpush1.bf16.msra.mxu0 %v13584_v45  ;;  %v13633_v45 = vld [vmem:[#allocation8 + $0x168] ss:$28 sps:$4 sm:$0xff]  }
 0x741   :  { %8174 = vmatprep.subr.bf16.mxu0 %v13592_v46  ;;  %v13636_v46 = vld [vmem:[#allocation8 + $0x19c] ss:$28 sps:$4 sm:$0xff]  }
 0x756   :  { %v5439_v49 = vpop.f32.mrb[28].mxu0 }
 0x757   :  { %v12221_v51 = vadd.f32 %v5439_v49, %v3112_v47  ;;  %v5441_v52 = vpop.f32.mrb[29].mxu0  ;;  %v13638_v49 = vld [vmem:[#allocation8 + $0x1a0] ss:$28 sps:$4 sm:$0xff]  }
 0x758   :  { %v12222_v53 = vadd.f32 %v5441_v52, %v3116_v48  ;;  %v5443_v56 = vpop.f32.mrb[30].mxu0  ;;  %v13642_v52 = vld [vmem:[#allocation8 + $0x558] ss:$28 sps:$4 sm:$0xff]  }
 0x759   :  { %v12223_v57 = vadd.f32 %v5443_v56, %v3112_v47  ;;  %v5445_v58 = vpop.f32.mrb[31].mxu0  ;;  %v5616_v61 = vmax.f32 %v12221_v51, 0.0  ;;  %v13637_v47 = vld [vmem:[#allocation8 + $0x360] ss:$28 sps:$4 sm:$0xff]   ;;  %v13641_v51 = vld [vmem:[#allocation8 + $0x1d4] ss:$28 sps:$4 sm:$0xff]  }
 0x75a   :  { %v12224_v60 = vadd.f32 %v5445_v58, %v3116_v48  ;;  %v5617_v62 = vmax.f32 %v12222_v53, 0.0  ;;  %v13634_v48 = vld [vmem:[#allocation8 + $0x198] ss:$28 sps:$4 sm:$0xff]   ;;  %v13639_v53 = vld [vmem:[#allocation8 + $0x1d0] ss:$28 sps:$4 sm:$0xff]  }
 0x75b   :  { %v5623_v22 = vmax.f32 %v12223_v57, 0.0  ;;  %v13643_v56 = vld [vmem:[#allocation8 + $0x398] ss:$28 sps:$4 sm:$0xff]   ;;  %v13646_v57 = vld [vmem:[#allocation8 + $0x20c] ss:$28 sps:$4 sm:$0xff]  }
 0x75c   :  { %v5624_v63 = vmax.f32 %v12224_v60, 0.0  ;;  %v13647_v58 = vld [vmem:[#allocation8 + $0x590] ss:$28 sps:$4 sm:$0xff]   ;;  %v13644_v60 = vld [vmem:[#allocation8 + $0x208] ss:$28 sps:$4 sm:$0xff]  }
 0x75d   :  { %v16040_v1 = vpack.c.bf16 %v5623_v22, %v5616_v61  ;;  %v13648_v61 = vld [vmem:[#allocation8 + $0x3d0] ss:$28 sps:$4 sm:$0xff]   ;;  %v13651_v22 = vld [vmem:[#allocation8 + $0x244] ss:$28 sps:$4 sm:$0xff]  }
 0x75e   :  { %v16042_v2 = vpack.c.bf16 %v5624_v63, %v5617_v62  ;;  %v13652_v62 = vld [vmem:[#allocation8 + $0x5c8] ss:$28 sps:$4 sm:$0xff]   ;;  %v13649_v63 = vld [vmem:[#allocation8 + $0x240] ss:$28 sps:$4 sm:$0xff]  }
 0x760   :  { %7991 = vmatprep.mubr.bf16.mxu1 %v16042_v2  ;;  %8163 = vmatprep.mubr.bf16.mxu0 %v16042_v2 }
 0x761   :  { %7992 = vmatmul.mubr.bf16.vlgmr.msra.gmra.mrb[40].mxu1 %v16040_v1  ;;  %8164 = vmatmul.mubr.bf16.vlgmr.msra.gmra.mrb[32].mxu0 %v16040_v1 }
 0x762   :  { %8003 = vmatpush1.bf16.msra.mxu1 %v13587_v3  ;;  %8175 = vmatpush1.bf16.msra.mxu0 %v13590_v42  ;;  %v13653_v3 = vld [vmem:[#allocation8 + $0x408] ss:$28 sps:$4 sm:$0xff]   ;;  %v13656_v42 = vld [vmem:[#allocation8 + $0x27c] ss:$28 sps:$4 sm:$0xff]  }
 0x763   :  { %8004 = vmatprep.subr.bf16.mxu1 %v13595_v5  ;;  %8176 = vmatprep.subr.bf16.mxu0 %v13598_v23  ;;  %v13657_v5 = vld [vmem:[#allocation8 + $0x600] ss:$28 sps:$4 sm:$0xff]   ;;  %v13654_v23 = vld [vmem:[#allocation8 + $0x278] ss:$28 sps:$4 sm:$0xff]  }
 0x764   :  { %8034 = vmatprep.mubr.bf16.mxu1 %v14363_v0  ;;  %8206 = vmatprep.mubr.bf16.mxu0 %v14363_v0 }
 0x766   :  { %8005 = vmatpush1.bf16.msra.mxu1 %v13593_v11  ;;  %8177 = vmatpush1.bf16.msra.mxu0 %v13596_v13  ;;  %v13658_v11 = vld [vmem:[#allocation8 + $0x440] ss:$28 sps:$4 sm:$0xff]   ;;  %v13661_v13 = vld [vmem:[#allocation8 + $0x2b4] ss:$28 sps:$4 sm:$0xff]  }
 0x767   :  { %8217 = vmatprep.subr.bf16.mxu1 %v13601_v14  ;;  %12112 = vmatprep.subr.bf16.mxu0 %v13602_v20  ;;  %v13662_v14 = vld [vmem:[#allocation8 + $0x638] ss:$28 sps:$4 sm:$0xff]   ;;  %v13659_v20 = vld [vmem:[#allocation8 + $0x2b0] ss:$28 sps:$4 sm:$0xff]  }
 0x76d   :  { %11749 = vmatmul.mubr.msk.bf16.vlgmr.msra.gmra.mrb[40].mxu1 %vm4928_vm3, %v16033_v31  ;;  %11750 = vmatmul.mubr.msk.bf16.vlgmr.msra.gmra.mrb[32].mxu0 %vm4928_vm3, %v16033_v31 }
 0x76e   :  { %8218 = vmatpush1.bf16.msra.mxu1 %v13599_v54  ;;  %12113 = vmatpush3.bf16.msra.mxu0 %v13603_v16  ;;  %v13663_v54 = vld [vmem:[#allocation8 + $0x478] ss:$28 sps:$4 sm:$0xff]   ;;  %v13666_v16 = vld [vmem:[#allocation8 + $0x2ec] ss:$28 sps:$4 sm:$0xff]  }
 0x76f   :  { %8249 = vmatprep.mubr.bf16.mxu1 %v16006_v39  ;;  %8421 = vmatprep.mubr.bf16.mxu0 %v16006_v39  ;;  %v13622_v39 = vld [vmem:[#allocation8 + $0x2b8] ss:$28 sps:$4 sm:$0xff]  }
 0x770   :  { %8219 = vmatprep.subr.bf16.mxu1 %v13606_v17  ;;  %12114 = vmatprep.subr.bf16.mxu0 %v13607_v18  ;;  %v13667_v17 = vld [vmem:[#allocation8 + $0x670] ss:$28 sps:$4 sm:$0xff]   ;;  %v13664_v18 = vld [vmem:[#allocation8 + $0x2e8] ss:$28 sps:$4 sm:$0xff]  }
 0x772   :  { %8220 = vmatpush1.bf16.msra.mxu1 %v13604_v15  ;;  %12115 = vmatpush3.bf16.msra.mxu0 %v13608_v19  ;;  %v13668_v15 = vld [vmem:[#allocation8 + $0x4b0] ss:$28 sps:$4 sm:$0xff]   ;;  %v13671_v19 = vld [vmem:[#allocation8 + $0x324] ss:$28 sps:$4 sm:$0xff]  }
 0x773   :  { %8221 = vmatprep.subr.bf16.mxu1 %v13611_v28  ;;  %12116 = vmatprep.subr.bf16.mxu0 %v13612_v29  ;;  %v13672_v28 = vld [vmem:[#allocation8 + $0x6a8] ss:$28 sps:$4 sm:$0xff]   ;;  %v13669_v29 = vld [vmem:[#allocation8 + $0x320] ss:$28 sps:$4 sm:$0xff]  }
 0x776   :  { %8222 = vmatpush1.bf16.msra.mxu1 %v13609_v7  ;;  %12117 = vmatpush3.bf16.msra.mxu0 %v13613_v27  ;;  %v13673_v7 = vld [vmem:[#allocation8 + $0x4e8] ss:$28 sps:$4 sm:$0xff]   ;;  %v13676_v27 = vld [vmem:[#allocation8 + $0x35c] ss:$28 sps:$4 sm:$0xff]  }
 0x777   :  { %8223 = vmatprep.subr.bf16.mxu1 %v13616_v21  ;;  %12118 = vmatprep.subr.bf16.mxu0 %v13617_v30  ;;  %v13677_v21 = vld [vmem:[#allocation8 + $0x6e0] ss:$28 sps:$4 sm:$0xff]   ;;  %v13674_v30 = vld [vmem:[#allocation8 + $0x358] ss:$28 sps:$4 sm:$0xff]  }
 0x77a   :  { %8224 = vmatpush1.bf16.msra.mxu1 %v13614_v55  ;;  %12119 = vmatpush3.bf16.msra.mxu0 %v13618_v44  ;;  %v13678_v55 = vld [vmem:[#allocation8 + $0x520] ss:$28 sps:$4 sm:$0xff]   ;;  %v13681_v44 = vld [vmem:[#allocation8 + $0x394] ss:$28 sps:$4 sm:$0xff]  }
 0x77b   :  { %8225 = vmatprep.subr.bf16.mxu1 %v13621_v32  ;;  %12120 = vmatprep.subr.bf16.mxu0 %v13622_v39  ;;  %v13682_v32 = vld [vmem:[#allocation8 + $0x8d8] ss:$28 sps:$4 sm:$0xff]   ;;  %v13679_v39 = vld [vmem:[#allocation8 + $0x390] ss:$28 sps:$4 sm:$0xff]  }
 0x77e   :  { %8226 = vmatpush1.bf16.msra.mxu1 %v13619_v33  ;;  %12121 = vmatpush3.bf16.msra.mxu0 %v13623_v34  ;;  %v13683_v33 = vld [vmem:[#allocation8 + $0x718] ss:$28 sps:$4 sm:$0xff]   ;;  %v13686_v34 = vld [vmem:[#allocation8 + $0x3cc] ss:$28 sps:$4 sm:$0xff]  }
 0x77f   :  { %8227 = vmatprep.subr.bf16.mxu1 %v13626_v35  ;;  %12122 = vmatprep.subr.bf16.mxu0 %v13627_v59  ;;  %v13687_v35 = vld [vmem:[#allocation8 + $0x910] ss:$28 sps:$4 sm:$0xff]   ;;  %v13684_v59 = vld [vmem:[#allocation8 + $0x3c8] ss:$28 sps:$4 sm:$0xff]  }
 0x782   :  { %8228 = vmatpush1.bf16.msra.mxu1 %v13624_v36  ;;  %12123 = vmatpush3.bf16.msra.mxu0 %v13628_v50  ;;  %v13688_v36 = vld [vmem:[#allocation8 + $0x750] ss:$28 sps:$4 sm:$0xff]   ;;  %v13691_v50 = vld [vmem:[#allocation8 + $0x404] ss:$28 sps:$4 sm:$0xff]  }
 0x783   :  { %8229 = vmatprep.subr.bf16.mxu1 %v13631_v38  ;;  %12124 = vmatprep.subr.bf16.mxu0 %v13632_v40  ;;  %v13692_v38 = vld [vmem:[#allocation8 + $0x948] ss:$28 sps:$4 sm:$0xff]   ;;  %v13689_v40 = vld [vmem:[#allocation8 + $0x400] ss:$28 sps:$4 sm:$0xff]  }
 0x786   :  { %8230 = vmatpush1.bf16.msra.mxu1 %v13629_v43  ;;  %12125 = vmatpush3.bf16.msra.mxu0 %v13633_v45  ;;  %v13693_v43 = vld [vmem:[#allocation8 + $0x788] ss:$28 sps:$4 sm:$0xff]   ;;  %v13697_v45 = vld [vmem:[#allocation8 + $0x980] ss:$28 sps:$4 sm:$0xff]  }
 0x787   :  { %8231 = vmatprep.subr.bf16.mxu1 %v13636_v46  ;;  %12126 = vmatprep.subr.bf16.mxu0 %v13637_v47  ;;  %v13694_v46 = vld [vmem:[#allocation8 + $0x438] ss:$28 sps:$4 sm:$0xff]  }
 0x788   :  { %v13701_v47 = vld [vmem:[#allocation8 + $0x474] ss:$28 sps:$4 sm:$0xff]  }
 0x78a   :  { %8232 = vmatpush1.bf16.msra.mxu1 %v13634_v48  ;;  %12127 = vmatpush3.bf16.msra.mxu0 %v13638_v49  ;;  %v13702_v48 = vld [vmem:[#allocation8 + $0x9b8] ss:$28 sps:$4 sm:$0xff]   ;;  %v13699_v49 = vld [vmem:[#allocation8 + $0x470] ss:$28 sps:$4 sm:$0xff]  }
 0x78b   :  { %8233 = vmatprep.subr.bf16.mxu1 %v13641_v51  ;;  %12134 = vmatprep.subr.bf16.mxu0 %v13642_v52  ;;  %v13703_v51 = vld [vmem:[#allocation8 + $0x7f8] ss:$28 sps:$4 sm:$0xff]   ;;  %v13706_v52 = vld [vmem:[#allocation8 + $0x4ac] ss:$28 sps:$4 sm:$0xff]  }
 0x78d   :  { %8422 = vmatmul.mubr.bf16.vlgmr.msra.gmra.mrb[36].mxu0 %v16004_v37 }
 0x78e   :  { %8234 = vmatpush1.bf16.msra.mxu1 %v13639_v53  ;;  %12135 = vmatpush3.bf16.msra.mxu0 %v13643_v56  ;;  %v13707_v53 = vld [vmem:[#allocation8 + $0x9f0] ss:$28 sps:$4 sm:$0xff]   ;;  %v13704_v56 = vld [vmem:[#allocation8 + $0x4a8] ss:$28 sps:$4 sm:$0xff]  }
 0x78f   :  { %8462 = vmatprep.mubr.bf16.mxu0 %v16013_v6  ;;  %8235 = vmatprep.subr.bf16.mxu1 %v13646_v57  ;;  %v13708_v57 = vld [vmem:[#allocation8 + $0x830] ss:$28 sps:$4 sm:$0xff]  }
 0x790   :  { %12136 = vmatprep.subr.bf16.mxu0 %v13647_v58  ;;  %v13711_v58 = vld [vmem:[#allocation8 + $0x4e4] ss:$28 sps:$4 sm:$0xff]  }
 0x792   :  { %8236 = vmatpush1.bf16.msra.mxu1 %v13644_v60  ;;  %12137 = vmatpush3.bf16.msra.mxu0 %v13648_v61  ;;  %v13712_v60 = vld [vmem:[#allocation8 + $0xa28] ss:$28 sps:$4 sm:$0xff]   ;;  %v13709_v61 = vld [vmem:[#allocation8 + $0x4e0] ss:$28 sps:$4 sm:$0xff]  }
 0x793   :  { %8237 = vmatprep.subr.bf16.mxu1 %v13651_v22  ;;  %12138 = vmatprep.subr.bf16.mxu0 %v13652_v62  ;;  %v13713_v22 = vld [vmem:[#allocation8 + $0x868] ss:$28 sps:$4 sm:$0xff]   ;;  %v13716_v62 = vld [vmem:[#allocation8 + $0x51c] ss:$28 sps:$4 sm:$0xff]  }
 0x796   :  { %8238 = vmatpush1.bf16.msra.mxu1 %v13649_v63  ;;  %12139 = vmatpush3.bf16.msra.mxu0 %v13653_v3  ;;  %v13717_v63 = vld [vmem:[#allocation8 + $0xa60] ss:$28 sps:$4 sm:$0xff]   ;;  %v13714_v3 = vld [vmem:[#allocation8 + $0x518] ss:$28 sps:$4 sm:$0xff]  }
 0x797   :  { %8239 = vmatprep.subr.bf16.mxu1 %v13656_v42  ;;  %12140 = vmatprep.subr.bf16.mxu0 %v13657_v5  ;;  %v13718_v42 = vld [vmem:[#allocation8 + $0x8a0] ss:$28 sps:$4 sm:$0xff]   ;;  %v13721_v5 = vld [vmem:[#allocation8 + $0x554] ss:$28 sps:$4 sm:$0xff]  }
 0x79a   :  { %8240 = vmatpush1.bf16.msra.mxu1 %v13654_v23  ;;  %12141 = vmatpush3.bf16.msra.mxu0 %v13658_v11  ;;  %v13719_v23 = vld [vmem:[#allocation8 + $0x550] ss:$28 sps:$4 sm:$0xff]   ;;  %v13722_v11 = vld [vmem:[#allocation8 + $0xa98] ss:$28 sps:$4 sm:$0xff]  }
 0x79b   :  { %8241 = vmatprep.subr.bf16.mxu1 %v13661_v13  ;;  %12142 = vmatprep.subr.bf16.mxu0 %v13662_v14  ;;  %v13725_v13 = vld [vmem:[#allocation8 + $0x58c] ss:$28 sps:$4 sm:$0xff]  }
 0x79c   :  { %v13723_v14 = vld [vmem:[#allocation8 + $0x588] ss:$28 sps:$4 sm:$0xff]  }
 0x79e   :  { %8242 = vmatpush1.bf16.msra.mxu1 %v13659_v20  ;;  %12143 = vmatpush3.bf16.msra.mxu0 %v13663_v54  ;;  %v13726_v20 = vld [vmem:[#allocation8 + $0xad0] ss:$28 sps:$4 sm:$0xff]   ;;  %v13729_v54 = vld [vmem:[#allocation8 + $0x5c4] ss:$28 sps:$4 sm:$0xff]  }
 0x79f   :  { %8243 = vmatprep.subr.bf16.mxu1 %v13666_v16  ;;  %12144 = vmatprep.subr.bf16.mxu0 %v13667_v17  ;;  %v13771_v16 = vld [vmem:[%s16787_s15 + $0x4] ss:$16 sps:$4 sm:$0xff]  }
 0x7a0   :  { %v13727_v17 = vld [vmem:[#allocation8 + $0x5c0] ss:$28 sps:$4 sm:$0xff]  }
 0x7a2   :  { %8244 = vmatpush1.bf16.msra.mxu1 %v13664_v18  ;;  %12145 = vmatpush3.bf16.msra.mxu0 %v13668_v15  ;;  %v13732_v18 = vld [vmem:[#allocation8 + $0x5fc] ss:$28 sps:$4 sm:$0xff]  }
 0x7a3   :  { %8245 = vmatprep.subr.bf16.mxu1 %v13671_v19  ;;  %12146 = vmatprep.subr.bf16.mxu0 %v13672_v28  ;;  %v13769_v15 = vld [vmem:[%s16787_s15] ss:$16 sps:$4 sm:$0xff]   ;;  %v13777_v19 = vld [vmem:[%s16787_s15 + $0x24] ss:$16 sps:$4 sm:$0xff]   ;;  %v13735_v28 = vld [vmem:[#allocation8 + $0x634] ss:$28 sps:$4 sm:$0xff]  }
 0x7a6   :  { %8246 = vmatpush1.bf16.msra.mxu1 %v13669_v29  ;;  %12147 = vmatpush3.bf16.msra.mxu0 %v13673_v7  ;;  %v13775_v29 = vld [vmem:[%s16787_s15 + $0x20] ss:$16 sps:$4 sm:$0xff]   ;;  %v13783_v7 = vld [vmem:[%s16787_s15 + $0x44] ss:$16 sps:$4 sm:$0xff]  }
 0x7a7   :  { %8247 = vmatprep.subr.bf16.mxu1 %v13676_v27  ;;  %12148 = vmatprep.subr.bf16.mxu0 %v13677_v21  ;;  %v13733_v27 = vld [vmem:[#allocation8 + $0x630] ss:$28 sps:$4 sm:$0xff]  }
 0x7a8   :  { %v13738_v21 = vld [vmem:[#allocation8 + $0x66c] ss:$28 sps:$4 sm:$0xff]  }
 0x7aa   :  { %8248 = vmatpush1.bf16.msra.mxu1 %v13674_v30  ;;  %12149 = vmatpush3.bf16.msra.mxu0 %v13678_v55  ;;  %v13781_v30 = vld [vmem:[%s16787_s15 + $0x40] ss:$16 sps:$4 sm:$0xff]   ;;  %v13789_v55 = vld [vmem:[%s16787_s15 + $0x64] ss:$16 sps:$4 sm:$0xff]  }
 0x7ab   :  { %8260 = vmatprep.subr.bf16.mxu1 %v13681_v44  ;;  %12156 = vmatprep.subr.bf16.mxu0 %v13682_v32  ;;  %v13736_v44 = vld [vmem:[#allocation8 + $0x668] ss:$28 sps:$4 sm:$0xff]  }
 0x7ac   :  { %v13741_v32 = vld [vmem:[#allocation8 + $0x6a4] ss:$28 sps:$4 sm:$0xff]  }
 0x7ad   :  { %8250 = vmatmul.mubr.bf16.vlgmr.msra.gmra.mrb[44].mxu1 %v16004_v37  ;;  %8463 = vmatmul.mubr.bf16.vlgmr.msra.gmra.mrb[40].mxu0 %v16011_v4  ;;  %v13696_v37 = vld [vmem:[#allocation8 + $0x43c] ss:$28 sps:$4 sm:$0xff]  }
 0x7ae   :  { %8261 = vmatpush1.bf16.msra.mxu1 %v13679_v39  ;;  %8292 = vmatprep.mubr.bf16.mxu1 %v16013_v6  ;;  %v13698_v6 = vld [vmem:[#allocation8 + $0x7c0] ss:$28 sps:$4 sm:$0xff]   ;;  %v13787_v39 = vld [vmem:[%s16787_s15 + $0x60] ss:$16 sps:$4 sm:$0xff]  }
 0x7af   :  { %12157 = vmatpush3.bf16.msra.mxu0 %v13683_v33  ;;  %8503 = vmatprep.mubr.bf16.mxu0 %v16042_v2  ;;  %v13795_v33 = vld [vmem:[%s16787_s15 + $0x84] ss:$16 sps:$4 sm:$0xff]  }
 0x7b0   :  { %8262 = vmatprep.subr.bf16.mxu1 %v13686_v34  ;;  %12158 = vmatprep.subr.bf16.mxu0 %v13687_v35  ;;  %v13739_v34 = vld [vmem:[#allocation8 + $0x6a0] ss:$28 sps:$4 sm:$0xff]  }
 0x7b1   :  { %v13744_v35 = vld [vmem:[#allocation8 + $0x6dc] ss:$28 sps:$4 sm:$0xff]  }
 0x7b2   :  { %8263 = vmatpush1.bf16.msra.mxu1 %v13684_v59  ;;  %v13793_v59 = vld [vmem:[%s16787_s15 + $0x80] ss:$16 sps:$4 sm:$0xff]  }
 0x7b3   :  { %12159 = vmatpush3.bf16.msra.mxu0 %v13688_v36  ;;  %8264 = vmatprep.subr.bf16.mxu1 %v13691_v50  ;;  %v13801_v36 = vld [vmem:[%s16787_s15 + $0xa4] ss:$16 sps:$4 sm:$0xff]   ;;  %v13742_v50 = vld [vmem:[#allocation8 + $0x6d8] ss:$28 sps:$4 sm:$0xff]  }
 0x7b4   :  { %12160 = vmatprep.subr.bf16.mxu0 %v13692_v38  ;;  %v13747_v38 = vld [vmem:[#allocation8 + $0x714] ss:$28 sps:$4 sm:$0xff]  }
 0x7b6   :  { %8265 = vmatpush1.bf16.msra.mxu1 %v13689_v40  ;;  %v13799_v40 = vld [vmem:[%s16787_s15 + $0xa0] ss:$16 sps:$4 sm:$0xff]  }
 0x7b7   :  { %12161 = vmatpush3.bf16.msra.mxu0 %v13693_v43  ;;  %8266 = vmatprep.subr.bf16.mxu1 %v13696_v37  ;;  %v13807_v43 = vld [vmem:[%s16787_s15 + $0xc4] ss:$16 sps:$4 sm:$0xff]  }
 0x7b8   :  { %12162 = vmatprep.subr.bf16.mxu0 %v13697_v45  ;;  %v13745_v37 = vld [vmem:[#allocation8 + $0x710] ss:$28 sps:$4 sm:$0xff]  }
 0x7b9   :  { %v13750_v45 = vld [vmem:[#allocation8 + $0x74c] ss:$28 sps:$4 sm:$0xff]  }
 0x7ba   :  { %8267 = vmatpush1.bf16.msra.mxu1 %v13694_v46  ;;  %v13805_v46 = vld [vmem:[%s16787_s15 + $0xc0] ss:$16 sps:$4 sm:$0xff]  }
 0x7bb   :  { %12163 = vmatpush3.bf16.msra.mxu0 %v13698_v6  ;;  %8268 = vmatprep.subr.bf16.mxu1 %v13701_v47  ;;  %v13813_v6 = vld [vmem:[%s16787_s15 + $0xe4] ss:$16 sps:$4 sm:$0xff]   ;;  %v13748_v47 = vld [vmem:[#allocation8 + $0x748] ss:$28 sps:$4 sm:$0xff]  }
 0x7bc   :  { %12164 = vmatprep.subr.bf16.mxu0 %v13702_v48  ;;  %v13753_v48 = vld [vmem:[#allocation8 + $0x784] ss:$28 sps:$4 sm:$0xff]  }
 0x7be   :  { %8269 = vmatpush1.bf16.msra.mxu1 %v13699_v49  ;;  %v13811_v49 = vld [vmem:[%s16787_s15 + $0xe0] ss:$16 sps:$4 sm:$0xff]  }
 0x7bf   :  { %12165 = vmatpush3.bf16.msra.mxu0 %v13703_v51  ;;  %8270 = vmatprep.subr.bf16.mxu1 %v13706_v52  ;;  %v13819_v51 = vld [vmem:[%s16787_s15 + $0x104] ss:$16 sps:$4 sm:$0xff]  }
 0x7c0   :  { %12166 = vmatprep.subr.bf16.mxu0 %v13707_v53  ;;  %v13751_v52 = vld [vmem:[#allocation8 + $0x780] ss:$28 sps:$4 sm:$0xff]  }
 0x7c1   :  { %v13825_v53 = vld [vmem:[%s16787_s15 + $0x124] ss:$16 sps:$4 sm:$0xff]  }
 0x7c2   :  { %8271 = vmatpush1.bf16.msra.mxu1 %v13704_v56  ;;  %v13754_v56 = vld [vmem:[#allocation8 + $0x7b8] ss:$28 sps:$4 sm:$0xff]  }
 0x7c3   :  { %12167 = vmatpush3.bf16.msra.mxu0 %v13708_v57  ;;  %8272 = vmatprep.subr.bf16.mxu1 %v13711_v58  ;;  %v13759_v57 = vld [vmem:[#allocation8 + $0x7f4] ss:$28 sps:$4 sm:$0xff]   ;;  %v13823_v58 = vld [vmem:[%s16787_s15 + $0x120] ss:$16 sps:$4 sm:$0xff]  }
 0x7c4   :  { %12168 = vmatprep.subr.bf16.mxu0 %v13712_v60  ;;  %v13831_v60 = vld [vmem:[%s16787_s15 + $0x144] ss:$16 sps:$4 sm:$0xff]  }
 0x7c6   :  { %8273 = vmatpush1.bf16.msra.mxu1 %v13709_v61  ;;  %v13757_v61 = vld [vmem:[#allocation8 + $0x7f0] ss:$28 sps:$4 sm:$0xff]  }
 0x7c7   :  { %12169 = vmatpush3.bf16.msra.mxu0 %v13713_v22  ;;  %8274 = vmatprep.subr.bf16.mxu1 %v13716_v62  ;;  %v13762_v22 = vld [vmem:[#allocation8 + $0x82c] ss:$28 sps:$4 sm:$0xff]  }
 0x7c8   :  { %12170 = vmatprep.subr.bf16.mxu0 %v13717_v63  ;;  %v13829_v62 = vld [vmem:[%s16787_s15 + $0x140] ss:$16 sps:$4 sm:$0xff]   ;;  %v13834_v63 = vld [vmem:[%s16787_s15 + $0x164] ss:$16 sps:$4 sm:$0xff]  }
 0x7ca   :  { %8275 = vmatpush1.bf16.msra.mxu1 %v13714_v3  ;;  %v13760_v3 = vld [vmem:[#allocation8 + $0x828] ss:$28 sps:$4 sm:$0xff]  }
 0x7cb   :  { %12171 = vmatpush3.bf16.msra.mxu0 %v13718_v42  ;;  %8276 = vmatprep.subr.bf16.mxu1 %v13721_v5  ;;  %v13765_v42 = vld [vmem:[#allocation8 + $0x864] ss:$28 sps:$4 sm:$0xff]   ;;  %v13832_v5 = vld [vmem:[%s16787_s15 + $0x160] ss:$16 sps:$4 sm:$0xff]  }
 0x7cc   :  { %12189 = vmatprep.subr.bf16.mxu0 %v14364_v24 }
 0x7ce   :  { %8504 = vmatmul.mubr.bf16.vlgmr.msra.gmra.mrb[44].mxu0 %v16040_v1  ;;  %8277 = vmatpush1.bf16.msra.mxu1 %v13719_v23  ;;  %v13840_v23 = vld [vmem:[%s16787_s15 + $0x184] ss:$16 sps:$4 sm:$0xff]  }
 0x7cf   :  { %12190 = vmatpush3.bf16.msra.mxu0 %v13722_v11  ;;  %8278 = vmatprep.subr.bf16.mxu1 %v13725_v13  ;;  %v13763_v11 = vld [vmem:[#allocation8 + $0x860] ss:$28 sps:$4 sm:$0xff]  }
 0x7d0   :  { %12191 = vmatprep.subr.bf16.mxu0 %v14364_v24  ;;  %12193 = vmatprep.mubr.msk.bf16.mxu0 %vm14365_vm4, %v14364_v24  ;;  %v13730_v24 = vld [vmem:[#allocation8 + $0x5f8] ss:$28 sps:$4 sm:$0xff]  }
 0x7d1   :  { %v13768_v13 = vld [vmem:[#allocation8 + $0x89c] ss:$28 sps:$4 sm:$0xff]  }
 0x7d2   :  { %8279 = vmatpush1.bf16.msra.mxu1 %v13723_v14  ;;  %v13838_v14 = vld [vmem:[%s16787_s15 + $0x180] ss:$16 sps:$4 sm:$0xff]  }
 0x7d3   :  { %12192 = vmatpush3.bf16.msra.mxu0 %v13726_v20  ;;  %8280 = vmatprep.subr.bf16.mxu1 %v13729_v54  ;;  %v13846_v20 = vld [vmem:[%s16787_s15 + $0x1a4] ss:$16 sps:$4 sm:$0xff]   ;;  %v13766_v54 = vld [vmem:[#allocation8 + $0x898] ss:$28 sps:$4 sm:$0xff]  }
 0x7d4   :  { %9799 = vmatprep.subr.bf16.mxu0 %v13771_v16  ;;  %v13774_v16 = vld [vmem:[#allocation8 + $0x8d4] ss:$28 sps:$4 sm:$0xff]  }
 0x7d6   :  { %12194 = vmatmul.mubr.msk.bf16.vlgmr.msra.gmra.mrb[48].mxu0 %vm4928_vm3, %v16033_v31  ;;  %8281 = vmatpush1.bf16.msra.mxu1 %v13727_v17  ;;  %v13844_v17 = vld [vmem:[%s16787_s15 + $0x1a0] ss:$16 sps:$4 sm:$0xff]  }
 0x7d7   :  { %8282 = vmatprep.subr.bf16.mxu1 %v13732_v18  ;;  %9800 = vmatpush1.bf16.msra.mxu0 %v13769_v15  ;;  %v13852_v18 = vld [vmem:[%s16787_s15 + $0x1c4] ss:$16 sps:$4 sm:$0xff]  }
 0x7d8   :  { %9801 = vmatprep.subr.bf16.mxu0 %v13777_v19  ;;  %v13772_v15 = vld [vmem:[#allocation8 + $0x8d0] ss:$28 sps:$4 sm:$0xff]  }
 0x7d9   :  { %v13780_v19 = vld [vmem:[#allocation8 + $0x90c] ss:$28 sps:$4 sm:$0xff]  }
 0x7da   :  { %8283 = vmatpush1.bf16.msra.mxu1 %v13730_v24  ;;  %v13850_v24 = vld [vmem:[%s16787_s15 + $0x1c0] ss:$16 sps:$4 sm:$0xff]  }
 0x7db   :  { %8284 = vmatprep.subr.bf16.mxu1 %v13735_v28  ;;  %9802 = vmatpush1.bf16.msra.mxu0 %v13775_v29  ;;  %v13858_v28 = vld [vmem:[%s16787_s15 + $0x1e4] ss:$16 sps:$4 sm:$0xff]   ;;  %v13778_v29 = vld [vmem:[#allocation8 + $0x908] ss:$28 sps:$4 sm:$0xff]  }
 0x7dc   :  { %9803 = vmatprep.subr.bf16.mxu0 %v13783_v7  ;;  %v13786_v7 = vld [vmem:[#allocation8 + $0x944] ss:$28 sps:$4 sm:$0xff]  }
 0x7de   :  { %8285 = vmatpush1.bf16.msra.mxu1 %v13733_v27  ;;  %v13856_v27 = vld [vmem:[%s16787_s15 + $0x1e0] ss:$16 sps:$4 sm:$0xff]  }
 0x7df   :  { %8286 = vmatprep.subr.bf16.mxu1 %v13738_v21  ;;  %9804 = vmatpush1.bf16.msra.mxu0 %v13781_v30  ;;  %v13864_v21 = vld [vmem:[%s16787_s15 + $0x204] ss:$16 sps:$4 sm:$0xff]  }
 0x7e0   :  { %9805 = vmatprep.subr.bf16.mxu0 %v13789_v55  ;;  %v13784_v30 = vld [vmem:[#allocation8 + $0x940] ss:$28 sps:$4 sm:$0xff]  }
 0x7e1   :  { %v13792_v55 = vld [vmem:[#allocation8 + $0x97c] ss:$28 sps:$4 sm:$0xff]  }
 0x7e2   :  { %8287 = vmatpush1.bf16.msra.mxu1 %v13736_v44  ;;  %v13790_v44 = vld [vmem:[#allocation8 + $0x978] ss:$28 sps:$4 sm:$0xff]  }
 0x7e3   :  { %8288 = vmatprep.subr.bf16.mxu1 %v13741_v32  ;;  %9806 = vmatpush1.bf16.msra.mxu0 %v13787_v39  ;;  %v13798_v32 = vld [vmem:[#allocation8 + $0x9b4] ss:$28 sps:$4 sm:$0xff]  }
 0x7e4   :  { %9807 = vmatprep.subr.bf16.mxu0 %v13795_v33  ;;  %v13796_v39 = vld [vmem:[#allocation8 + $0x9b0] ss:$28 sps:$4 sm:$0xff]  }
 0x7e5   :  { %v13804_v33 = vld [vmem:[#allocation8 + $0x9ec] ss:$28 sps:$4 sm:$0xff]  }
 0x7e6   :  { %8289 = vmatpush1.bf16.msra.mxu1 %v13739_v34  ;;  %v13802_v34 = vld [vmem:[#allocation8 + $0x9e8] ss:$28 sps:$4 sm:$0xff]  }
 0x7e7   :  { %8290 = vmatprep.subr.bf16.mxu1 %v13744_v35  ;;  %9808 = vmatpush1.bf16.msra.mxu0 %v13793_v59  ;;  %v13810_v35 = vld [vmem:[#allocation8 + $0xa24] ss:$28 sps:$4 sm:$0xff]  }
 0x7e8   :  { %9809 = vmatprep.subr.bf16.mxu0 %v13801_v36  ;;  %v13808_v59 = vld [vmem:[#allocation8 + $0xa20] ss:$28 sps:$4 sm:$0xff]  }
 0x7e9   :  { %v13816_v36 = vld [vmem:[#allocation8 + $0xa5c] ss:$28 sps:$4 sm:$0xff]  }
 0x7ea   :  { %8291 = vmatpush1.bf16.msra.mxu1 %v13742_v50  ;;  %v13814_v50 = vld [vmem:[#allocation8 + $0xa58] ss:$28 sps:$4 sm:$0xff]  }
 0x7eb   :  { %8303 = vmatprep.subr.bf16.mxu1 %v13747_v38  ;;  %9810 = vmatpush1.bf16.msra.mxu0 %v13799_v40  ;;  %v13822_v38 = vld [vmem:[#allocation8 + $0xa94] ss:$28 sps:$4 sm:$0xff]  }
 0x7ec   :  { %9811 = vmatprep.subr.bf16.mxu0 %v13807_v43  ;;  %v13820_v40 = vld [vmem:[#allocation8 + $0xa90] ss:$28 sps:$4 sm:$0xff]  }
 0x7ed   :  { %8293 = vmatmul.mubr.bf16.vlgmr.msra.gmra.mrb[44].mxu1 %v16011_v4  ;;  %v13756_v4 = vld [vmem:[#allocation8 + $0x7bc] ss:$28 sps:$4 sm:$0xff]   ;;  %v13828_v43 = vld [vmem:[#allocation8 + $0xacc] ss:$28 sps:$4 sm:$0xff]  }
 0x7ee   :  { %8304 = vmatpush1.bf16.msra.mxu1 %v13745_v37  ;;  %8335 = vmatprep.mubr.bf16.mxu1 %v16042_v2  ;;  %v13817_v2 = vld [vmem:[%s16787_s15 + $0x100] ss:$16 sps:$4 sm:$0xff]  }
 0x7ef   :  { %8305 = vmatprep.subr.bf16.mxu1 %v13750_v45  ;;  %9812 = vmatpush1.bf16.msra.mxu0 %v13805_v46  ;;  %v13826_v37 = vld [vmem:[#allocation8 + $0xac8] ss:$28 sps:$4 sm:$0xff]   ;;  %v13835_v46 = vld [vmem:[%s16787_s15 + $0x8] ss:$16 sps:$4 sm:$0xff]  }
 0x7f0   :  { %9813 = vmatprep.subr.bf16.mxu0 %v13813_v6  ;;  %v13837_v45 = vld [vmem:[%s16787_s15 + $0xc] ss:$16 sps:$4 sm:$0xff]  }
 0x7f1   :  { %v13843_v6 = vld [vmem:[%s16787_s15 + $0x2c] ss:$16 sps:$4 sm:$0xff]  }
 0x7f2   :  { %8306 = vmatpush1.bf16.msra.mxu1 %v13748_v47  ;;  %v16189_v47 = vld [vmem:[%s16786_s14] sm:$0x7f] }
 0x7f3   :  { %8307 = vmatprep.subr.bf16.mxu1 %v13753_v48  ;;  %9814 = vmatpush1.bf16.msra.mxu0 %v13811_v49  ;;  %v13849_v48 = vld [vmem:[%s16787_s15 + $0x4c] ss:$16 sps:$4 sm:$0xff]   ;;  %v6038_v49 = vrot.slane %v16189_v47, %v14627_v9 }
 0x7f4   :  { %9815 = vmatprep.subr.bf16.mxu0 %v13819_v51  ;;  %v13847_v51 = vld [vmem:[%s16787_s15 + $0x48] ss:$16 sps:$4 sm:$0xff]  }
 0x7f6   :  { %8308 = vmatpush1.bf16.msra.mxu1 %v13751_v52  ;;  %v6042_v52 = vrot.slane %v16189_v47, %v14630_v10 }
 0x7f7   :  { %8309 = vmatprep.subr.bf16.mxu1 %v13756_v4  ;;  %9816 = vmatpush1.bf16.msra.mxu0 %v13817_v2  ;;  %v6050_v4 = vrot.slane %v16189_v47, %v14811_v12  ;;  %v13855_v2 = vld [vmem:[%s16787_s15 + $0x6c] ss:$16 sps:$4 sm:$0xff]  }
 0x7f8   :  { %9817 = vmatprep.subr.bf16.mxu0 %v13825_v53 }
 0x7fa   :  { %8310 = vmatpush1.bf16.msra.mxu1 %v13754_v56 }
 0x7fb   :  { %8311 = vmatprep.subr.bf16.mxu1 %v13759_v57  ;;  %9818 = vmatpush1.bf16.msra.mxu0 %v13823_v58 }
 0x7fc   :  { %9819 = vmatprep.subr.bf16.mxu0 %v13831_v60 }
 0x7fe   :  { %8312 = vmatpush1.bf16.msra.mxu1 %v13757_v61 }
 0x7ff   :  { %8313 = vmatprep.subr.bf16.mxu1 %v13762_v22  ;;  %9820 = vmatpush1.bf16.msra.mxu0 %v13829_v62 }
 0x800   :  { %9821 = vmatprep.subr.bf16.mxu0 %v13834_v63 }
 0x802   :  { %8314 = vmatpush1.bf16.msra.mxu1 %v13760_v3 }
 0x803   :  { %8315 = vmatprep.subr.bf16.mxu1 %v13765_v42  ;;  %9822 = vmatpush1.bf16.msra.mxu0 %v13832_v5  ;;  %v13853_v42 = vld [vmem:[%s16787_s15 + $0x68] ss:$16 sps:$4 sm:$0xff]  }
 0x804   :  { %9823 = vmatprep.subr.bf16.mxu0 %v13840_v23 }
 0x806   :  { %8316 = vmatpush1.bf16.msra.mxu1 %v13763_v11 }
 0x807   :  { %8317 = vmatprep.subr.bf16.mxu1 %v13768_v13  ;;  %9824 = vmatpush1.bf16.msra.mxu0 %v13838_v14  ;;  %v13861_v14 = vld [vmem:[%s16787_s15 + $0x8c] ss:$16 sps:$4 sm:$0xff]  }
 0x808   :  { %9825 = vmatprep.subr.bf16.mxu0 %v13846_v20 }
 0x80a   :  { %8318 = vmatpush1.bf16.msra.mxu1 %v13766_v54 }
 0x80b   :  { %8319 = vmatprep.subr.bf16.mxu1 %v13774_v16  ;;  %9826 = vmatpush1.bf16.msra.mxu0 %v13844_v17 }
 0x80c   :  { %9827 = vmatprep.subr.bf16.mxu0 %v13852_v18 }
 0x80e   :  { %8320 = vmatpush1.bf16.msra.mxu1 %v13772_v15 }
 0x80f   :  { %8321 = vmatprep.subr.bf16.mxu1 %v13780_v19  ;;  %9828 = vmatpush1.bf16.msra.mxu0 %v13850_v24 }
 0x810   :  { %9829 = vmatprep.subr.bf16.mxu0 %v13858_v28 }
 0x812   :  { %8322 = vmatpush1.bf16.msra.mxu1 %v13778_v29 }
 0x813   :  { %8323 = vmatprep.subr.bf16.mxu1 %v13786_v7  ;;  %9830 = vmatpush1.bf16.msra.mxu0 %v13856_v27  ;;  %v13859_v7 = vld [vmem:[%s16787_s15 + $0x88] ss:$16 sps:$4 sm:$0xff]  }
 0x814   :  { %9842 = vmatprep.subr.bf16.mxu0 %v13864_v21 }
 0x816   :  { %8324 = vmatpush1.bf16.msra.mxu1 %v13784_v30 }
 0x817   :  { %8325 = vmatprep.subr.bf16.mxu1 %v13792_v55 }
 0x81a   :  { %8326 = vmatpush1.bf16.msra.mxu1 %v13790_v44  ;;  %v13862_v44 = vld [vmem:[%s16787_s15 + $0x200] ss:$16 sps:$4 sm:$0xff]  }
 0x81b   :  { %8327 = vmatprep.subr.bf16.mxu1 %v13798_v32  ;;  %v13867_v32 = vld [vmem:[%s16787_s15 + $0xac] ss:$16 sps:$4 sm:$0xff]  }
 0x81e   :  { %8328 = vmatpush1.bf16.msra.mxu1 %v13796_v39  ;;  %v13870_v39 = vld [vmem:[%s16787_s15 + $0x224] ss:$16 sps:$4 sm:$0xff]  }
 0x81f   :  { %8329 = vmatprep.subr.bf16.mxu1 %v13804_v33  ;;  %v13865_v33 = vld [vmem:[%s16787_s15 + $0xa8] ss:$16 sps:$4 sm:$0xff]  }
 0x822   :  { %8330 = vmatpush1.bf16.msra.mxu1 %v13802_v34  ;;  %v13873_v34 = vld [vmem:[%s16787_s15 + $0xcc] ss:$16 sps:$4 sm:$0xff]  }
 0x823   :  { %8331 = vmatprep.subr.bf16.mxu1 %v13810_v35  ;;  %v13868_v35 = vld [vmem:[%s16787_s15 + $0x220] ss:$16 sps:$4 sm:$0xff]  }
 0x826   :  { %8332 = vmatpush1.bf16.msra.mxu1 %v13808_v59  ;;  %v13876_v59 = vld [vmem:[%s16787_s15 + $0x244] ss:$16 sps:$4 sm:$0xff]  }
 0x827   :  { %8333 = vmatprep.subr.bf16.mxu1 %v13816_v36  ;;  %v13871_v36 = vld [vmem:[%s16787_s15 + $0xc8] ss:$16 sps:$4 sm:$0xff]  }
 0x82a   :  { %8334 = vmatpush1.bf16.msra.mxu1 %v13814_v50  ;;  %v13879_v50 = vld [vmem:[%s16787_s15 + $0xec] ss:$16 sps:$4 sm:$0xff]  }
 0x82b   :  { %8346 = vmatprep.subr.bf16.mxu1 %v13822_v38  ;;  %v13874_v38 = vld [vmem:[%s16787_s15 + $0x240] ss:$16 sps:$4 sm:$0xff]  }
 0x82d   :  { %8336 = vmatmul.mubr.bf16.vlgmr.msra.gmra.mrb[44].mxu1 %v16040_v1  ;;  %v13841_v1 = vld [vmem:[%s16787_s15 + $0x28] ss:$16 sps:$4 sm:$0xff]  }
 0x82e   :  { %8347 = vmatpush1.bf16.msra.mxu1 %v13820_v40  ;;  %8378 = vmatprep.mubr.bf16.mxu1 %v14363_v0  ;;  %v13882_v40 = vld [vmem:[%s16787_s15 + $0x264] ss:$16 sps:$4 sm:$0xff]  }
 0x82f   :  { %8348 = vmatprep.subr.bf16.mxu1 %v13828_v43  ;;  %v13877_v43 = vld [vmem:[%s16787_s15 + $0xe8] ss:$16 sps:$4 sm:$0xff]  }
 0x832   :  { %8349 = vmatpush1.bf16.msra.mxu1 %v13826_v37  ;;  %v13885_v37 = vld [vmem:[%s16787_s15 + $0x10c] ss:$16 sps:$4 sm:$0xff]  }
 0x833   :  { %9971 = vmatprep.subr.bf16.mxu1 %v13837_v45  ;;  %v13880_v45 = vld [vmem:[%s16787_s15 + $0x260] ss:$16 sps:$4 sm:$0xff]  }
 0x839   :  { %11751 = vmatmul.mubr.msk.bf16.vlgmr.msra.gmra.mrb[44].mxu1 %vm4928_vm3, %v16033_v31  ;;  %v6046_v31 = vrot.slane %v16189_v47, %v14805_v8 }
 0x83a   :  { %9972 = vmatpush1.bf16.msra.mxu1 %v13835_v46  ;;  %v13888_v46 = vld [vmem:[%s16787_s15 + $0x284] ss:$16 sps:$4 sm:$0xff]  }
 0x83b   :  { %9973 = vmatprep.subr.bf16.mxu1 %v13843_v6  ;;  %v13883_v6 = vld [vmem:[%s16787_s15 + $0x108] ss:$16 sps:$4 sm:$0xff]  }
 0x83e   :  { %9974 = vmatpush1.bf16.msra.mxu1 %v13841_v1  ;;  %v13891_v1 = vld [vmem:[%s16787_s15 + $0x12c] ss:$16 sps:$4 sm:$0xff]  }
 0x83f   :  { %9975 = vmatprep.subr.bf16.mxu1 %v13849_v48  ;;  %v13886_v48 = vld [vmem:[%s16787_s15 + $0x280] ss:$16 sps:$4 sm:$0xff]  }
 0x840   :  { %v8036_v53 = vpop.f32.mrb[40].mxu1  ;;  %v8208_v56 = vpop.f32.mrb[32].mxu0 }
 0x841   :  { %v12225_v57 = vadd.f32 %v8036_v53, %v6038_v49  ;;  %v12229_v58 = vadd.f32 %v8208_v56, %v6046_v31  ;;  %v8038_v60 = vpop.f32.mrb[41].mxu1  ;;  %v8210_v61 = vpop.f32.mrb[33].mxu0  ;;  %v13903_v53 = vld [vmem:[%s16787_s15 + $0x16c] ss:$16 sps:$4 sm:$0xff]  }
 0x842   :  { %9976 = vmatpush1.bf16.msra.mxu1 %v13847_v51  ;;  %v12226_v22 = vadd.f32 %v8038_v60, %v6042_v52  ;;  %v12230_v62 = vadd.f32 %v8210_v61, %v6050_v4  ;;  %v8040_v63 = vpop.f32.mrb[42].mxu1  ;;  %v8212_v3 = vpop.f32.mrb[34].mxu0  ;;  %v13897_v51 = vld [vmem:[%s16787_s15 + $0x14c] ss:$16 sps:$4 sm:$0xff]   ;;  %v13906_v60 = vld [vmem:[%s16787_s15 + $0x2e4] ss:$16 sps:$4 sm:$0xff]  }
 0x843   :  { %v12227_v5 = vadd.f32 %v8040_v63, %v6038_v49  ;;  %v12231_v23 = vadd.f32 %v8212_v3, %v6046_v31  ;;  %v8042_v11 = vpop.f32.mrb[43].mxu1  ;;  %v8214_v13 = vpop.f32.mrb[35].mxu0  ;;  %9977 = vmatprep.subr.bf16.mxu1 %v13855_v2  ;;  %v8553_v16 = vmax.f32 %v12225_v57, 0.0  ;;  %v8555_v17 = vmax.f32 %v12229_v58, 0.0  ;;  %v13894_v49 = vld [vmem:[%s16787_s15 + $0x2a4] ss:$16 sps:$4 sm:$0xff]  }
 0x844   :  { %v12228_v20 = vadd.f32 %v8042_v11, %v6042_v52  ;;  %v12232_v54 = vadd.f32 %v8214_v13, %v6050_v4  ;;  %v8554_v19 = vmax.f32 %v12226_v22, 0.0  ;;  %v8556_v24 = vmax.f32 %v12230_v62, 0.0  ;;  %v13889_v31 = vld [vmem:[%s16787_s15 + $0x128] ss:$16 sps:$4 sm:$0xff]   ;;  %v13892_v52 = vld [vmem:[%s16787_s15 + $0x2a0] ss:$16 sps:$4 sm:$0xff]  }
 0x845   :  { %v8560_v18 = vmax.f32 %v12227_v5, 0.0  ;;  %v8562_v15 = vmax.f32 %v12231_v23, 0.0  ;;  %v13900_v4 = vld [vmem:[%s16787_s15 + $0x2c4] ss:$16 sps:$4 sm:$0xff]   ;;  %v13895_v2 = vld [vmem:[%s16787_s15 + $0x148] ss:$16 sps:$4 sm:$0xff]  }
 0x846   :  { %v8561_v28 = vmax.f32 %v12228_v20, 0.0  ;;  %v8563_v29 = vmax.f32 %v12232_v54, 0.0  ;;  %9978 = vmatpush1.bf16.msra.mxu1 %v13853_v42  ;;  %v13898_v57 = vld [vmem:[%s16787_s15 + $0x2c0] ss:$16 sps:$4 sm:$0xff]   ;;  %v13901_v62 = vld [vmem:[%s16787_s15 + $0x168] ss:$16 sps:$4 sm:$0xff]  }
 0x847   :  { %v16217_v27 = vpack.c.bf16 %v8560_v18, %v8553_v16  ;;  %v16219_v21 = vpack.c.bf16 %v8562_v15, %v8555_v17  ;;  %9979 = vmatprep.subr.bf16.mxu1 %v13861_v14  ;;  %v13909_v3 = vld [vmem:[%s16787_s15 + $0x18c] ss:$16 sps:$4 sm:$0xff]   ;;  %v13904_v5 = vld [vmem:[%s16787_s15 + $0x2e0] ss:$16 sps:$4 sm:$0xff]   ;;  %v13912_v23 = vld [vmem:[%s16787_s15 + $0x304] ss:$16 sps:$4 sm:$0xff]  }
 0x848   :  { %v8568_v30 = vpack.c.bf16 %v8561_v28, %v8554_v19  ;;  %v16221_v55 = vpack.c.bf16 %v8563_v29, %v8556_v24  ;;  %v13907_v11 = vld [vmem:[%s16787_s15 + $0x188] ss:$16 sps:$4 sm:$0xff]   ;;  %v13915_v13 = vld [vmem:[%s16787_s15 + $0x1ac] ss:$16 sps:$4 sm:$0xff]   ;;  %v13910_v14 = vld [vmem:[%s16787_s15 + $0x300] ss:$16 sps:$4 sm:$0xff]  }
 0x849   :  { %v13918_v20 = vld [vmem:[%s16787_s15 + $0x324] ss:$16 sps:$4 sm:$0xff]   ;;  %v13913_v54 = vld [vmem:[%s16787_s15 + $0x1a8] ss:$16 sps:$4 sm:$0xff]   ;;  %v13921_v16 = vld [vmem:[%s16787_s15 + $0x1cc] ss:$16 sps:$4 sm:$0xff]  }
 0x84a   :  { %9980 = vmatpush1.bf16.msra.mxu1 %v13859_v7  ;;  %9831 = vmatprep.mubr.bf16.mxu0 %v8568_v30  ;;  %v13916_v17 = vld [vmem:[%s16787_s15 + $0x320] ss:$16 sps:$4 sm:$0xff]   ;;  %v13924_v18 = vld [vmem:[%s16787_s15 + $0x344] ss:$16 sps:$4 sm:$0xff]   ;;  %v13919_v15 = vld [vmem:[%s16787_s15 + $0x1c8] ss:$16 sps:$4 sm:$0xff]  }
 0x84b   :  { %10003 = vmatprep.mubr.bf16.mxu1 %v8568_v30  ;;  %9832 = vmatmul.mubr.bf16.vlgmr.msra.gmra.mrb[52].mxu0 %v16217_v27  ;;  %v13927_v19 = vld [vmem:[%s16787_s15 + $0x1ec] ss:$16 sps:$4 sm:$0xff]   ;;  %v13922_v24 = vld [vmem:[%s16787_s15 + $0x340] ss:$16 sps:$4 sm:$0xff]   ;;  %v13930_v28 = vld [vmem:[%s16787_s15 + $0x364] ss:$16 sps:$4 sm:$0xff]  }
 0x84c   :  { %9843 = vmatpush1.bf16.msra.mxu0 %v13862_v44  ;;  %9981 = vmatprep.subr.bf16.mxu1 %v13867_v32  ;;  %v13925_v29 = vld [vmem:[%s16787_s15 + $0x1e8] ss:$16 sps:$4 sm:$0xff]   ;;  %v13933_v7 = vld [vmem:[%s16787_s15 + $0x20c] ss:$16 sps:$4 sm:$0xff]   ;;  %v13928_v30 = vld [vmem:[%s16787_s15 + $0x360] ss:$16 sps:$4 sm:$0xff]  }
 0x84d   :  { %9874 = vmatprep.mubr.bf16.mxu0 %v16221_v55  ;;  %9844 = vmatprep.subr.bf16.mxu0 %v13870_v39  ;;  %v13936_v44 = vld [vmem:[%s16787_s15 + $0x384] ss:$16 sps:$4 sm:$0xff]   ;;  %v13931_v32 = vld [vmem:[%s16787_s15 + $0x208] ss:$16 sps:$4 sm:$0xff]   ;;  %v13939_v39 = vld [vmem:[%s16787_s15 + $0x22c] ss:$16 sps:$4 sm:$0xff]  }
 0x84e   :  { %9982 = vmatpush1.bf16.msra.mxu1 %v13865_v33  ;;  %v13934_v33 = vld [vmem:[%s16787_s15 + $0x380] ss:$16 sps:$4 sm:$0xff]  }
 0x84f   :  { %9983 = vmatprep.subr.bf16.mxu1 %v13873_v34  ;;  %v13942_v34 = vld [vmem:[%s16787_s15 + $0x3a4] ss:$16 sps:$4 sm:$0xff]  }
 0x850   :  { %9845 = vmatpush1.bf16.msra.mxu0 %v13868_v35  ;;  %v13937_v35 = vld [vmem:[%s16787_s15 + $0x228] ss:$16 sps:$4 sm:$0xff]  }
 0x851   :  { %9846 = vmatprep.subr.bf16.mxu0 %v13876_v59  ;;  %v13945_v59 = vld [vmem:[%s16787_s15 + $0x24c] ss:$16 sps:$4 sm:$0xff]  }
 0x852   :  { %9984 = vmatpush1.bf16.msra.mxu1 %v13871_v36  ;;  %v13948_v36 = vld [vmem:[%s16787_s15 + $0x3c4] ss:$16 sps:$4 sm:$0xff]  }
 0x853   :  { %9985 = vmatprep.subr.bf16.mxu1 %v13879_v50  ;;  %v13943_v50 = vld [vmem:[%s16787_s15 + $0x248] ss:$16 sps:$4 sm:$0xff]  }
 0x854   :  { %9847 = vmatpush1.bf16.msra.mxu0 %v13874_v38  ;;  %v13951_v38 = vld [vmem:[%s16787_s15 + $0x26c] ss:$16 sps:$4 sm:$0xff]  }
 0x855   :  { %9848 = vmatprep.subr.bf16.mxu0 %v13882_v40 }
 0x856   :  { %9986 = vmatpush1.bf16.msra.mxu1 %v13877_v43  ;;  %v13946_v43 = vld [vmem:[%s16787_s15 + $0x3c0] ss:$16 sps:$4 sm:$0xff]  }
 0x857   :  { %9987 = vmatprep.subr.bf16.mxu1 %v13885_v37 }
 0x858   :  { %9849 = vmatpush1.bf16.msra.mxu0 %v13880_v45 }
 0x859   :  { %9850 = vmatprep.subr.bf16.mxu0 %v13888_v46 }
 0x85a   :  { %9988 = vmatpush1.bf16.msra.mxu1 %v13883_v6 }
 0x85b   :  { %9989 = vmatprep.subr.bf16.mxu1 %v13891_v1  ;;  %v13949_v1 = vld [vmem:[%s16787_s15 + $0x268] ss:$16 sps:$4 sm:$0xff]  }
 0x85c   :  { %9851 = vmatpush1.bf16.msra.mxu0 %v13886_v48 }
 0x85d   :  { %9852 = vmatprep.subr.bf16.mxu0 %v13894_v49  ;;  %v13957_v49 = vld [vmem:[%s16787_s15 + $0x28c] ss:$16 sps:$4 sm:$0xff]  }
 0x85e   :  { %9990 = vmatpush1.bf16.msra.mxu1 %v13889_v31 }
 0x85f   :  { %9991 = vmatprep.subr.bf16.mxu1 %v13897_v51 }
 0x860   :  { %v12128_v56 = vpop.f32.mrb[36].mxu0  ;;  %9853 = vmatpush1.bf16.msra.mxu0 %v13892_v52 }
 0x861   :  { %v12129_v58 = vpop.f32.mrb[37].mxu0  ;;  %9854 = vmatprep.subr.bf16.mxu0 %v13900_v4  ;;  %v13952_v4 = vld [vmem:[%s16787_s15 + $0x3e0] ss:$16 sps:$4 sm:$0xff]  }
 0x862   :  { %v16306_v61 = vadd.f32 %v12129_v58, %v12128_v56  ;;  %9992 = vmatpush1.bf16.msra.mxu1 %v13895_v2  ;;  %v12131_v22 = vpop.f32.mrb[38].mxu0  ;;  %v13993_v2 = vld [vmem:[%s16787_s15 + $0x404] ss:$16 sps:$4 sm:$0xff]   ;;  %v13955_v56 = vld [vmem:[%s16787_s15 + $0x288] ss:$16 sps:$4 sm:$0xff]  }
 0x863   :  { %v12132_v63 = vpop.f32.mrb[39].mxu0  ;;  %9993 = vmatprep.subr.bf16.mxu1 %v13903_v53  ;;  %v13991_v58 = vld [vmem:[%s16787_s15 + $0x400] ss:$16 sps:$4 sm:$0xff]  }
 0x864   :  { %v16314_v42 = vadd.f32 %v12132_v63, %v12131_v22  ;;  %9855 = vmatpush1.bf16.msra.mxu0 %v13898_v57  ;;  %v13960_v57 = vld [vmem:[%s16787_s15 + $0x2ac] ss:$16 sps:$4 sm:$0xff]   ;;  %v14005_v63 = vld [vmem:[%s16787_s15 + $0x444] ss:$16 sps:$4 sm:$0xff]  }
 0x865   :  { %9856 = vmatprep.subr.bf16.mxu0 %v13906_v60  ;;  %v13999_v60 = vld [vmem:[%s16787_s15 + $0x424] ss:$16 sps:$4 sm:$0xff]   ;;  %v13963_v22 = vld [vmem:[%s16787_s15 + $0x2cc] ss:$16 sps:$4 sm:$0xff]  }
 0x866   :  { %9994 = vmatpush1.bf16.msra.mxu1 %v13901_v62  ;;  %v13997_v62 = vld [vmem:[%s16787_s15 + $0x420] ss:$16 sps:$4 sm:$0xff]  }
 0x867   :  { %9995 = vmatprep.subr.bf16.mxu1 %v13909_v3  ;;  %v13961_v3 = vld [vmem:[%s16787_s15 + $0x2c8] ss:$16 sps:$4 sm:$0xff]  }
 0x868   :  { %9857 = vmatpush1.bf16.msra.mxu0 %v13904_v5  ;;  %v14003_v5 = vld [vmem:[%s16787_s15 + $0x440] ss:$16 sps:$4 sm:$0xff]  }
 0x869   :  { %9858 = vmatprep.subr.bf16.mxu0 %v13912_v23  ;;  %v14011_v23 = vld [vmem:[%s16787_s15 + $0x464] ss:$16 sps:$4 sm:$0xff]  }
 0x86a   :  { %9996 = vmatpush1.bf16.msra.mxu1 %v13907_v11  ;;  %v13964_v11 = vld [vmem:[%s16787_s15 + $0x2e8] ss:$16 sps:$4 sm:$0xff]  }
 0x86b   :  { %9997 = vmatprep.subr.bf16.mxu1 %v13915_v13  ;;  %v13969_v13 = vld [vmem:[%s16787_s15 + $0x30c] ss:$16 sps:$4 sm:$0xff]  }
 0x86c   :  { %9859 = vmatpush1.bf16.msra.mxu0 %v13910_v14  ;;  %v14009_v14 = vld [vmem:[%s16787_s15 + $0x460] ss:$16 sps:$4 sm:$0xff]  }
 0x86d   :  { %9860 = vmatprep.subr.bf16.mxu0 %v13918_v20  ;;  %v14017_v20 = vld [vmem:[%s16787_s15 + $0x484] ss:$16 sps:$4 sm:$0xff]  }
 0x86e   :  { %9998 = vmatpush1.bf16.msra.mxu1 %v13913_v54  ;;  %v13967_v54 = vld [vmem:[%s16787_s15 + $0x308] ss:$16 sps:$4 sm:$0xff]  }
 0x86f   :  { %9999 = vmatprep.subr.bf16.mxu1 %v13921_v16  ;;  %v13972_v16 = vld [vmem:[%s16787_s15 + $0x32c] ss:$16 sps:$4 sm:$0xff]  }
 0x870   :  { %9861 = vmatpush1.bf16.msra.mxu0 %v13916_v17  ;;  %v14015_v17 = vld [vmem:[%s16787_s15 + $0x480] ss:$16 sps:$4 sm:$0xff]  }
 0x871   :  { %9862 = vmatprep.subr.bf16.mxu0 %v13924_v18  ;;  %v14023_v18 = vld [vmem:[%s16787_s15 + $0x4a4] ss:$16 sps:$4 sm:$0xff]  }
 0x872   :  { %10000 = vmatpush1.bf16.msra.mxu1 %v13919_v15  ;;  %v13970_v15 = vld [vmem:[%s16787_s15 + $0x328] ss:$16 sps:$4 sm:$0xff]  }
 0x873   :  { %10001 = vmatprep.subr.bf16.mxu1 %v13927_v19  ;;  %v13975_v19 = vld [vmem:[%s16787_s15 + $0x34c] ss:$16 sps:$4 sm:$0xff]  }
 0x874   :  { %9863 = vmatpush1.bf16.msra.mxu0 %v13922_v24  ;;  %v14021_v24 = vld [vmem:[%s16787_s15 + $0x4a0] ss:$16 sps:$4 sm:$0xff]  }
 0x875   :  { %9864 = vmatprep.subr.bf16.mxu0 %v13930_v28  ;;  %v14029_v28 = vld [vmem:[%s16787_s15 + $0x4c4] ss:$16 sps:$4 sm:$0xff]  }
 0x876   :  { %10002 = vmatpush1.bf16.msra.mxu1 %v13925_v29  ;;  %v13973_v29 = vld [vmem:[%s16787_s15 + $0x348] ss:$16 sps:$4 sm:$0xff]  }
 0x877   :  { %10014 = vmatprep.subr.bf16.mxu1 %v13933_v7  ;;  %v13978_v7 = vld [vmem:[%s16787_s15 + $0x36c] ss:$16 sps:$4 sm:$0xff]  }
 0x878   :  { %9865 = vmatpush1.bf16.msra.mxu0 %v13928_v30  ;;  %v14027_v30 = vld [vmem:[%s16787_s15 + $0x4c0] ss:$16 sps:$4 sm:$0xff]  }
 0x879   :  { %10004 = vmatmul.mubr.bf16.vlgmr.msra.gmra.mrb[48].mxu1 %v16217_v27  ;;  %9866 = vmatprep.subr.bf16.mxu0 %v13936_v44  ;;  %v13940_v27 = vld [vmem:[%s16787_s15 + $0x3a0] ss:$16 sps:$4 sm:$0xff]  }
 0x87a   :  { %10015 = vmatpush1.bf16.msra.mxu1 %v13931_v32  ;;  %10046 = vmatprep.mubr.bf16.mxu1 %v16221_v55  ;;  %v6062_v55 = vrot.slane %v16189_v47, %v15246_v41  ;;  %v13954_v41 = vld [vmem:[%s16787_s15 + $0x3e4] ss:$16 sps:$4 sm:$0xff]  }
 0x87b   :  { %10016 = vmatprep.subr.bf16.mxu1 %v13939_v39  ;;  %v14035_v32 = vld [vmem:[%s16787_s15 + $0x4e4] ss:$16 sps:$4 sm:$0xff]  }
 0x87c   :  { %9867 = vmatpush1.bf16.msra.mxu0 %v13934_v33  ;;  %v8424_v45 = vadd.f32 %v16306_v61, %v6062_v55  ;;  %v8427_v31 = vadd.f32 %v16314_v42, %v6062_v55  ;;  %v13958_v61 = vld [vmem:[%s16787_s15 + $0x2a8] ss:$16 sps:$4 sm:$0xff]   ;;  %v13966_v42 = vld [vmem:[%s16787_s15 + $0x2ec] ss:$16 sps:$4 sm:$0xff]  }
 0x87d   :  { %9868 = vmatprep.subr.bf16.mxu0 %v13942_v34  ;;  %v13976_v33 = vld [vmem:[%s16787_s15 + $0x368] ss:$16 sps:$4 sm:$0xff]  }
 0x87e   :  { %10017 = vmatpush1.bf16.msra.mxu1 %v13937_v35 }
 0x87f   :  { %10018 = vmatprep.subr.bf16.mxu1 %v13945_v59  ;;  %v13981_v59 = vld [vmem:[%s16787_s15 + $0x38c] ss:$16 sps:$4 sm:$0xff]  }
 0x880   :  { %v12150_v40 = vpop.f32.mrb[40].mxu0  ;;  %9869 = vmatpush1.bf16.msra.mxu0 %v13940_v27 }
 0x881   :  { %v12151_v37 = vpop.f32.mrb[41].mxu0  ;;  %9870 = vmatprep.subr.bf16.mxu0 %v13948_v36  ;;  %v14033_v36 = vld [vmem:[%s16787_s15 + $0x4e0] ss:$16 sps:$4 sm:$0xff]  }
 0x882   :  { %v12152_v46 = vadd.f32 %v12151_v37, %v12150_v40  ;;  %10019 = vmatpush1.bf16.msra.mxu1 %v13943_v50  ;;  %v12153_v6 = vpop.f32.mrb[42].mxu0  ;;  %v13979_v40 = vld [vmem:[%s16787_s15 + $0x388] ss:$16 sps:$4 sm:$0xff]   ;;  %v13984_v37 = vld [vmem:[%s16787_s15 + $0x3ac] ss:$16 sps:$4 sm:$0xff]  }
 0x883   :  { %v12154_v48 = vpop.f32.mrb[43].mxu0  ;;  %10020 = vmatprep.subr.bf16.mxu1 %v13951_v38  ;;  %v14041_v38 = vld [vmem:[%s16787_s15 + $0x504] ss:$16 sps:$4 sm:$0xff]  }
 0x884   :  { %v16418_v51 = vadd.f32 %v12152_v46, %v8424_v45  ;;  %v12155_v52 = vadd.f32 %v12154_v48, %v12153_v6  ;;  %9871 = vmatpush1.bf16.msra.mxu0 %v13946_v43  ;;  %v14047_v46 = vld [vmem:[%s16787_s15 + $0x524] ss:$16 sps:$4 sm:$0xff]   ;;  %v13982_v48 = vld [vmem:[%s16787_s15 + $0x3a8] ss:$16 sps:$4 sm:$0xff]  }
 0x885   :  { %9872 = vmatprep.subr.bf16.mxu0 %v13954_v41  ;;  %v14039_v41 = vld [vmem:[%s16787_s15 + $0x500] ss:$16 sps:$4 sm:$0xff]  }
 0x886   :  { %v16426_v53 = vadd.f32 %v12155_v52, %v8427_v31  ;;  %10021 = vmatpush1.bf16.msra.mxu1 %v13949_v1  ;;  %v13987_v31 = vld [vmem:[%s16787_s15 + $0x3cc] ss:$16 sps:$4 sm:$0xff]  }
 0x887   :  { %10022 = vmatprep.subr.bf16.mxu1 %v13957_v49 }
 0x888   :  { %9873 = vmatpush1.bf16.msra.mxu0 %v13952_v4  ;;  %v14045_v4 = vld [vmem:[%s16787_s15 + $0x520] ss:$16 sps:$4 sm:$0xff]  }
 0x889   :  { %9885 = vmatprep.subr.bf16.mxu0 %v13993_v2  ;;  %v14053_v2 = vld [vmem:[%s16787_s15 + $0x544] ss:$16 sps:$4 sm:$0xff]  }
 0x88a   :  { %10023 = vmatpush1.bf16.msra.mxu1 %v13955_v56 }
 0x88b   :  { %9875 = vmatmul.mubr.bf16.vlgmr.msra.gmra.mrb[52].mxu0 %v16219_v21  ;;  %10024 = vmatprep.subr.bf16.mxu1 %v13960_v57  ;;  %v13985_v57 = vld [vmem:[%s16787_s15 + $0x3c8] ss:$16 sps:$4 sm:$0xff]  }
 0x88c   :  { %9886 = vmatpush1.bf16.msra.mxu0 %v13991_v58  ;;  %v13990_v58 = vld [vmem:[%s16787_s15 + $0x3ec] ss:$16 sps:$4 sm:$0xff]  }
 0x88d   :  { %9887 = vmatprep.subr.bf16.mxu0 %v13999_v60 }
 0x88e   :  { %10025 = vmatpush1.bf16.msra.mxu1 %v13958_v61  ;;  %v14051_v61 = vld [vmem:[%s16787_s15 + $0x540] ss:$16 sps:$4 sm:$0xff]  }
 0x88f   :  { %10026 = vmatprep.subr.bf16.mxu1 %v13963_v22  ;;  %v14059_v22 = vld [vmem:[%s16787_s15 + $0x564] ss:$16 sps:$4 sm:$0xff]  }
 0x890   :  { %9888 = vmatpush1.bf16.msra.mxu0 %v13997_v62  ;;  %v13988_v62 = vld [vmem:[%s16787_s15 + $0x3e8] ss:$16 sps:$4 sm:$0xff]  }
 0x891   :  { %9889 = vmatprep.subr.bf16.mxu0 %v14005_v63  ;;  %v13996_v63 = vld [vmem:[%s16787_s15 + $0x40c] ss:$16 sps:$4 sm:$0xff]  }
 0x892   :  { %10027 = vmatpush1.bf16.msra.mxu1 %v13961_v3  ;;  %v14057_v3 = vld [vmem:[%s16787_s15 + $0x560] ss:$16 sps:$4 sm:$0xff]  }
 0x893   :  { %10028 = vmatprep.subr.bf16.mxu1 %v13966_v42  ;;  %v14065_v42 = vld [vmem:[%s16787_s15 + $0x584] ss:$16 sps:$4 sm:$0xff]  }
 0x894   :  { %9890 = vmatpush1.bf16.msra.mxu0 %v14003_v5  ;;  %v13994_v5 = vld [vmem:[%s16787_s15 + $0x408] ss:$16 sps:$4 sm:$0xff]  }
 0x895   :  { %9891 = vmatprep.subr.bf16.mxu0 %v14011_v23  ;;  %v14002_v23 = vld [vmem:[%s16787_s15 + $0x42c] ss:$16 sps:$4 sm:$0xff]  }
 0x896   :  { %10029 = vmatpush1.bf16.msra.mxu1 %v13964_v11  ;;  %v14063_v11 = vld [vmem:[%s16787_s15 + $0x580] ss:$16 sps:$4 sm:$0xff]  }
 0x897   :  { %10030 = vmatprep.subr.bf16.mxu1 %v13969_v13  ;;  %v14071_v13 = vld [vmem:[%s16787_s15 + $0x5a4] ss:$16 sps:$4 sm:$0xff]  }
 0x898   :  { %9892 = vmatpush1.bf16.msra.mxu0 %v14009_v14  ;;  %v14000_v14 = vld [vmem:[%s16787_s15 + $0x428] ss:$16 sps:$4 sm:$0xff]  }
 0x899   :  { %9893 = vmatprep.subr.bf16.mxu0 %v14017_v20  ;;  %v14008_v20 = vld [vmem:[%s16787_s15 + $0x44c] ss:$16 sps:$4 sm:$0xff]  }
 0x89a   :  { %10031 = vmatpush1.bf16.msra.mxu1 %v13967_v54  ;;  %v14077_v54 = vld [vmem:[%s16787_s15 + $0x5c4] ss:$16 sps:$4 sm:$0xff]  }
 0x89b   :  { %10032 = vmatprep.subr.bf16.mxu1 %v13972_v16  ;;  %v14006_v16 = vld [vmem:[%s16787_s15 + $0x448] ss:$16 sps:$4 sm:$0xff]  }
 0x89c   :  { %9894 = vmatpush1.bf16.msra.mxu0 %v14015_v17  ;;  %v14014_v17 = vld [vmem:[%s16787_s15 + $0x46c] ss:$16 sps:$4 sm:$0xff]  }
 0x89d   :  { %9895 = vmatprep.subr.bf16.mxu0 %v14023_v18  ;;  %v14075_v18 = vld [vmem:[%s16787_s15 + $0x5c0] ss:$16 sps:$4 sm:$0xff]  }
 0x89e   :  { %10033 = vmatpush1.bf16.msra.mxu1 %v13970_v15  ;;  %v14083_v15 = vld [vmem:[%s16787_s15 + $0x5e4] ss:$16 sps:$4 sm:$0xff]  }
 0x89f   :  { %10034 = vmatprep.subr.bf16.mxu1 %v13975_v19  ;;  %v14012_v19 = vld [vmem:[%s16787_s15 + $0x468] ss:$16 sps:$4 sm:$0xff]  }
 0x8a0   :  { %9896 = vmatpush1.bf16.msra.mxu0 %v14021_v24  ;;  %v14020_v24 = vld [vmem:[%s16787_s15 + $0x48c] ss:$16 sps:$4 sm:$0xff]  }
 0x8a1   :  { %v12172_v44 = vpop.f32.mrb[44].mxu0  ;;  %9897 = vmatprep.subr.bf16.mxu0 %v14029_v28  ;;  %v14081_v28 = vld [vmem:[%s16787_s15 + $0x5e0] ss:$16 sps:$4 sm:$0xff]  }
 0x8a2   :  { %v12173_v39 = vpop.f32.mrb[45].mxu0  ;;  %10035 = vmatpush1.bf16.msra.mxu1 %v13973_v29  ;;  %v14089_v29 = vld [vmem:[%s16787_s15 + $0x604] ss:$16 sps:$4 sm:$0xff]  }
 0x8a3   :  { %v12174_v34 = vadd.f32 %v12173_v39, %v12172_v44  ;;  %v12175_v35 = vpop.f32.mrb[46].mxu0  ;;  %10036 = vmatprep.subr.bf16.mxu1 %v13978_v7  ;;  %v14018_v7 = vld [vmem:[%s16787_s15 + $0x488] ss:$16 sps:$4 sm:$0xff]  }
 0x8a4   :  { %v12176_v27 = vpop.f32.mrb[47].mxu0  ;;  %9898 = vmatpush1.bf16.msra.mxu0 %v14027_v30  ;;  %v14026_v30 = vld [vmem:[%s16787_s15 + $0x4ac] ss:$16 sps:$4 sm:$0xff]   ;;  %v14024_v44 = vld [vmem:[%s16787_s15 + $0x4a8] ss:$16 sps:$4 sm:$0xff]  }
 0x8a5   :  { %v12177_v55 = vadd.f32 %v12176_v27, %v12175_v35  ;;  %v8506_v50 = vadd.f32 %v12174_v34, %v16418_v51  ;;  %9899 = vmatprep.subr.bf16.mxu0 %v14035_v32  ;;  %v14032_v32 = vld [vmem:[%s16787_s15 + $0x4cc] ss:$16 sps:$4 sm:$0xff]   ;;  %v14030_v39 = vld [vmem:[%s16787_s15 + $0x4c8] ss:$16 sps:$4 sm:$0xff]  }
 0x8a6   :  { %10037 = vmatpush1.bf16.msra.mxu1 %v13976_v33  ;;  %v14038_v33 = vld [vmem:[%s16787_s15 + $0x4ec] ss:$16 sps:$4 sm:$0xff]   ;;  %v14036_v34 = vld [vmem:[%s16787_s15 + $0x4e8] ss:$16 sps:$4 sm:$0xff]  }
 0x8a7   :  { %10038 = vmatprep.subr.bf16.mxu1 %v13981_v59  ;;  %v8509_v43 = vadd.f32 %v12177_v55, %v16426_v53  ;;  %v14044_v35 = vld [vmem:[%s16787_s15 + $0x50c] ss:$16 sps:$4 sm:$0xff]   ;;  %v14042_v59 = vld [vmem:[%s16787_s15 + $0x508] ss:$16 sps:$4 sm:$0xff]  }
 0x8a8   :  { %9900 = vmatpush1.bf16.msra.mxu0 %v14033_v36  ;;  %v14050_v27 = vld [vmem:[%s16787_s15 + $0x52c] ss:$16 sps:$4 sm:$0xff]   ;;  %v14048_v36 = vld [vmem:[%s16787_s15 + $0x528] ss:$16 sps:$4 sm:$0xff]  }
 0x8a9   :  { %v8546_v45 = vpop.f32.mrb[48].mxu0  ;;  %9901 = vmatprep.subr.bf16.mxu0 %v14041_v38  ;;  %v14056_v55 = vld [vmem:[%s16787_s15 + $0x54c] ss:$16 sps:$4 sm:$0xff]  }
 0x8aa   :  { %v8547_v6 = vadd.f32 %v8546_v45, %v8506_v50  ;;  %v12195_v1 = vpop.f32.mrb[49].mxu0  ;;  %10039 = vmatpush1.bf16.msra.mxu1 %v13979_v40  ;;  %v14054_v50 = vld [vmem:[%s16787_s15 + $0x548] ss:$16 sps:$4 sm:$0xff]   ;;  %v14062_v38 = vld [vmem:[%s16787_s15 + $0x56c] ss:$16 sps:$4 sm:$0xff]  }
 0x8ab   :  { %v8549_v49 = vpop.f32.mrb[50].mxu0  ;;  %10040 = vmatprep.subr.bf16.mxu1 %v13984_v37  ;;  %v14060_v40 = vld [vmem:[%s16787_s15 + $0x568] ss:$16 sps:$4 sm:$0xff]   ;;  %v14086_v1 = vld [vmem:[%s16787_s15 + $0x5ec] ss:$16 sps:$4 sm:$0xff]  }
 0x8ac   :  { %v8550_v51 = vadd.f32 %v8549_v49, %v8509_v43  ;;  %v12196_v52 = vpop.f32.mrb[51].mxu0  ;;  %9902 = vmatpush1.bf16.msra.mxu0 %v14039_v41  ;;  %v8559_v53 = vmax.f32 %v8547_v6, 0.0  ;;  %v14068_v43 = vld [vmem:[%s16787_s15 + $0x58c] ss:$16 sps:$4 sm:$0xff]   ;;  %v14066_v37 = vld [vmem:[%s16787_s15 + $0x588] ss:$16 sps:$4 sm:$0xff]  }
 0x8ad   :  { %9903 = vmatprep.subr.bf16.mxu0 %v14047_v46  ;;  %v14074_v41 = vld [vmem:[%s16787_s15 + $0x5ac] ss:$16 sps:$4 sm:$0xff]   ;;  %v14072_v45 = vld [vmem:[%s16787_s15 + $0x5a8] ss:$16 sps:$4 sm:$0xff]  }
 0x8ae   :  { %v8566_v56 = vmax.f32 %v8550_v51, 0.0  ;;  %10041 = vmatpush1.bf16.msra.mxu1 %v13982_v48  ;;  %v14080_v46 = vld [vmem:[%s16787_s15 + $0x5cc] ss:$16 sps:$4 sm:$0xff]   ;;  %v14078_v6 = vld [vmem:[%s16787_s15 + $0x5c8] ss:$16 sps:$4 sm:$0xff]   ;;  %v6058_v51 = vrot.slane %v16189_v47, %v15362_v26 }
 0x8af   :  { %10042 = vmatprep.subr.bf16.mxu1 %v13987_v31  ;;  %v14084_v48 = vld [vmem:[%s16787_s15 + $0x5e8] ss:$16 sps:$4 sm:$0xff]   ;;  %v14092_v49 = vld [vmem:[%s16787_s15 + $0x60c] ss:$16 sps:$4 sm:$0xff]   ;;  %v6054_v31 = vrot.slane %v16189_v47, %v15359_v25  ;;  %v14087_v25 = vld [vmem:[%s16787_s15 + $0x600] ss:$16 sps:$4 sm:$0xff]  }
 0x8b0   :  { %v16557_v60 = vpack.c.bf16 %v8566_v56, %v8559_v53  ;;  %9904 = vmatpush1.bf16.msra.mxu0 %v14045_v4  ;;  %v14090_v26 = vld [vmem:[%s16787_s15 + $0x608] ss:$16 sps:$4 sm:$0xff]   ;;  %v14095_v47 = vld [vmem:[%s16787_s15 + $0x624] ss:$16 sps:$4 sm:$0xff]  }
 0x8b1   :  { %9905 = vmatprep.subr.bf16.mxu0 %v14053_v2 }
 0x8b2   :  { %10043 = vmatpush1.bf16.msra.mxu1 %v13985_v57 }
 0x8b3   :  { %10044 = vmatprep.subr.bf16.mxu1 %v13990_v58 }
 0x8b4   :  { %9906 = vmatpush1.bf16.msra.mxu0 %v14051_v61 }
 0x8b5   :  { %9907 = vmatprep.subr.bf16.mxu0 %v14059_v22 }
 0x8b6   :  { %10045 = vmatpush1.bf16.msra.mxu1 %v13988_v62 }
 0x8b7   :  { %10057 = vmatprep.subr.bf16.mxu1 %v13996_v63 }
 0x8b8   :  { %9908 = vmatpush1.bf16.msra.mxu0 %v14057_v3 }
 0x8b9   :  { %10047 = vmatmul.mubr.bf16.vlgmr.msra.gmra.mrb[48].mxu1 %v16219_v21  ;;  %9909 = vmatprep.subr.bf16.mxu0 %v14065_v42  ;;  %v14069_v21 = vld [vmem:[%s16787_s15 + $0x5a0] ss:$16 sps:$4 sm:$0xff]  }
 0x8ba   :  { %10058 = vmatpush1.bf16.msra.mxu1 %v13994_v5 }
 0x8bb   :  { %10059 = vmatprep.subr.bf16.mxu1 %v14002_v23  ;;  %v14098_v23 = vld [vmem:[%s16787_s15 + $0x62c] ss:$16 sps:$4 sm:$0xff]  }
 0x8bc   :  { %9910 = vmatpush1.bf16.msra.mxu0 %v14063_v11  ;;  %v14093_v11 = vld [vmem:[%s16787_s15 + $0x620] ss:$16 sps:$4 sm:$0xff]  }
 0x8bd   :  { %9911 = vmatprep.subr.bf16.mxu0 %v14071_v13  ;;  %v14096_v13 = vld [vmem:[%s16787_s15 + $0x628] ss:$16 sps:$4 sm:$0xff]  }
 0x8be   :  { %10060 = vmatpush1.bf16.msra.mxu1 %v14000_v14  ;;  %v14101_v14 = vld [vmem:[#allocation10 + $0x4] ss:$8 sps:$4 sm:$0xff]  }
 0x8bf   :  { %10061 = vmatprep.subr.bf16.mxu1 %v14008_v20  ;;  %v14099_v20 = vld [vmem:[#allocation10] ss:$8 sps:$4 sm:$0xff]  }
 0x8c0   :  { %9912 = vmatpush1.bf16.msra.mxu0 %v14069_v21  ;;  %v14104_v21 = vld [vmem:[#allocation10 + $0x14] ss:$8 sps:$4 sm:$0xff]  }
 0x8c1   :  { %9913 = vmatprep.subr.bf16.mxu0 %v14077_v54  ;;  %v14102_v54 = vld [vmem:[#allocation10 + $0x10] ss:$8 sps:$4 sm:$0xff]  }
 0x8c2   :  { %10062 = vmatpush1.bf16.msra.mxu1 %v14006_v16  ;;  %v14107_v16 = vld [vmem:[#allocation10 + $0x24] ss:$8 sps:$4 sm:$0xff]  }
 0x8c3   :  { %10063 = vmatprep.subr.bf16.mxu1 %v14014_v17  ;;  %v14105_v17 = vld [vmem:[#allocation10 + $0x20] ss:$8 sps:$4 sm:$0xff]  }
 0x8c4   :  { %9914 = vmatpush1.bf16.msra.mxu0 %v14075_v18  ;;  %v14110_v18 = vld [vmem:[#allocation10 + $0x34] ss:$8 sps:$4 sm:$0xff]  }
 0x8c5   :  { %9915 = vmatprep.subr.bf16.mxu0 %v14083_v15  ;;  %v14108_v15 = vld [vmem:[#allocation10 + $0x30] ss:$8 sps:$4 sm:$0xff]  }
 0x8c6   :  { %10064 = vmatpush1.bf16.msra.mxu1 %v14012_v19  ;;  %v14113_v19 = vld [vmem:[#allocation10 + $0x44] ss:$8 sps:$4 sm:$0xff]  }
 0x8c7   :  { %10065 = vmatprep.subr.bf16.mxu1 %v14020_v24  ;;  %v14111_v24 = vld [vmem:[#allocation10 + $0x40] ss:$8 sps:$4 sm:$0xff]  }
 0x8c8   :  { %9916 = vmatpush1.bf16.msra.mxu0 %v14081_v28  ;;  %v14116_v28 = vld [vmem:[#allocation10 + $0x54] ss:$8 sps:$4 sm:$0xff]  }
 0x8c9   :  { %9928 = vmatprep.subr.bf16.mxu0 %v14089_v29  ;;  %v14114_v29 = vld [vmem:[#allocation10 + $0x50] ss:$8 sps:$4 sm:$0xff]  }
 0x8ca   :  { %10066 = vmatpush1.bf16.msra.mxu1 %v14018_v7  ;;  %v14117_v7 = vld [vmem:[#allocation10 + $0x60] ss:$8 sps:$4 sm:$0xff]  }
 0x8cb   :  { %10067 = vmatprep.subr.bf16.mxu1 %v14026_v30  ;;  %v14122_v30 = vld [vmem:[#allocation10 + $0x74] ss:$8 sps:$4 sm:$0xff]  }
 0x8ce   :  { %10068 = vmatpush1.bf16.msra.mxu1 %v14024_v44  ;;  %v14120_v44 = vld [vmem:[#allocation10 + $0x70] ss:$8 sps:$4 sm:$0xff]  }
 0x8cf   :  { %10069 = vmatprep.subr.bf16.mxu1 %v14032_v32  ;;  %v14125_v32 = vld [vmem:[#allocation10 + $0x84] ss:$8 sps:$4 sm:$0xff]  }
 0x8d2   :  { %10070 = vmatpush1.bf16.msra.mxu1 %v14030_v39  ;;  %v14123_v39 = vld [vmem:[#allocation10 + $0x80] ss:$8 sps:$4 sm:$0xff]  }
 0x8d3   :  { %10071 = vmatprep.subr.bf16.mxu1 %v14038_v33  ;;  %v14128_v33 = vld [vmem:[#allocation10 + $0x94] ss:$8 sps:$4 sm:$0xff]  }
 0x8d6   :  { %10072 = vmatpush1.bf16.msra.mxu1 %v14036_v34  ;;  %v14126_v34 = vld [vmem:[#allocation10 + $0x90] ss:$8 sps:$4 sm:$0xff]  }
 0x8d7   :  { %10073 = vmatprep.subr.bf16.mxu1 %v14044_v35  ;;  %v14131_v35 = vld [vmem:[#allocation10 + $0xa4] ss:$8 sps:$4 sm:$0xff]  }
 0x8da   :  { %10074 = vmatpush1.bf16.msra.mxu1 %v14042_v59  ;;  %v14129_v59 = vld [vmem:[#allocation10 + $0xa0] ss:$8 sps:$4 sm:$0xff]  }
 0x8db   :  { %10075 = vmatprep.subr.bf16.mxu1 %v14050_v27  ;;  %v14134_v27 = vld [vmem:[#allocation10 + $0xb4] ss:$8 sps:$4 sm:$0xff]  }
 0x8de   :  { %10076 = vmatpush1.bf16.msra.mxu1 %v14048_v36  ;;  %v14132_v36 = vld [vmem:[#allocation10 + $0xb0] ss:$8 sps:$4 sm:$0xff]  }
 0x8df   :  { %10077 = vmatprep.subr.bf16.mxu1 %v14056_v55  ;;  %v14137_v55 = vld [vmem:[#allocation10 + $0xc4] ss:$8 sps:$4 sm:$0xff]  }
 0x8e2   :  { %10078 = vmatpush1.bf16.msra.mxu1 %v14054_v50  ;;  %v14135_v50 = vld [vmem:[#allocation10 + $0xc0] ss:$8 sps:$4 sm:$0xff]  }
 0x8e3   :  { %10079 = vmatprep.subr.bf16.mxu1 %v14062_v38  ;;  %v14140_v38 = vld [vmem:[#allocation10 + $0xd4] ss:$8 sps:$4 sm:$0xff]  }
 0x8e6   :  { %10080 = vmatpush1.bf16.msra.mxu1 %v14060_v40  ;;  %v14138_v40 = vld [vmem:[#allocation10 + $0xd0] ss:$8 sps:$4 sm:$0xff]  }
 0x8e7   :  { %10081 = vmatprep.subr.bf16.mxu1 %v14068_v43  ;;  %v14143_v43 = vld [vmem:[#allocation10 + $0xe4] ss:$8 sps:$4 sm:$0xff]  }
 0x8ea   :  { %10082 = vmatpush1.bf16.msra.mxu1 %v14066_v37  ;;  %v14141_v37 = vld [vmem:[#allocation10 + $0xe0] ss:$8 sps:$4 sm:$0xff]  }
 0x8eb   :  { %10083 = vmatprep.subr.bf16.mxu1 %v14074_v41  ;;  %v14146_v41 = vld [vmem:[#allocation10 + $0xf4] ss:$8 sps:$4 sm:$0xff]  }
 0x8ee   :  { %10084 = vmatpush1.bf16.msra.mxu1 %v14072_v45  ;;  %v14144_v45 = vld [vmem:[#allocation10 + $0xf0] ss:$8 sps:$4 sm:$0xff]  }
 0x8ef   :  { %10085 = vmatprep.subr.bf16.mxu1 %v14080_v46  ;;  %v14149_v46 = vld [vmem:[#allocation10 + $0x104] ss:$8 sps:$4 sm:$0xff]  }
 0x8f2   :  { %10086 = vmatpush1.bf16.msra.mxu1 %v14078_v6  ;;  %v14174_v6 = vld [vmem:[#allocation11] sm:$0xff]  }
 0x8f3   :  { %10087 = vmatprep.subr.bf16.mxu1 %v14086_v1  ;;  %v14175_v1 = vld [vmem:[#allocation11 + $0x8] sm:$0xff]  }
 0x8f6   :  { %10088 = vmatpush1.bf16.msra.mxu1 %v14084_v48  ;;  %v14176_v48 = vld [vmem:[#allocation11 + $0x10] sm:$0xff]  }
 0x8f7   :  { %10100 = vmatprep.subr.bf16.mxu1 %v14092_v49  ;;  %v14177_v49 = vld [vmem:[#allocation11 + $0x18] sm:$0xff]  }
 0x90c   :  { %v8380_v52 = vpop.f32.mrb[44].mxu1 }
 0x90d   :  { %v12233_v4 = vadd.f32 %v8380_v52, %v6054_v31  ;;  %v8382_v2 = vpop.f32.mrb[45].mxu1  ;;  %v14180_v52 = vld [vmem:[#allocation11 + $0x30] sm:$0xff]  }
 0x90e   :  { %v12234_v53 = vadd.f32 %v8382_v2, %v6058_v51  ;;  %v8384_v56 = vpop.f32.mrb[46].mxu1  ;;  %v14182_v2 = vld [vmem:[#allocation11 + $0x40] sm:$0xff]  }
 0x90f   :  { %v12235_v57 = vadd.f32 %v8384_v56, %v6054_v31  ;;  %v8386_v58 = vpop.f32.mrb[47].mxu1  ;;  %v8557_v22 = vmax.f32 %v12233_v4, 0.0  ;;  %v14178_v31 = vld [vmem:[#allocation11 + $0x20] sm:$0xff]   ;;  %v14181_v4 = vld [vmem:[#allocation11 + $0x38] sm:$0xff]  }
 0x910   :  { %v12236_v61 = vadd.f32 %v8386_v58, %v6058_v51  ;;  %v8558_v63 = vmax.f32 %v12234_v53, 0.0  ;;  %v14179_v51 = vld [vmem:[#allocation11 + $0x28] sm:$0xff]   ;;  %v8774_v56 = vld [vmem:[%s16788_s16] sm:$0xf] }
 0x911   :  { %v8564_v62 = vmax.f32 %v12235_v57, 0.0  ;;  %v14183_v53 = vld [vmem:[#allocation11 + $0x48] sm:$0xff]   ;;  %v8779_v57 = vrot.slane %v8774_v56, %v14627_v9  ;;  %v8787_v58 = vrot.slane %v8774_v56, %v14805_v8 }
 0x912   :  { %v8565_v3 = vmax.f32 %v12236_v61, 0.0  ;;  %v8783_v61 = vrot.slane %v8774_v56, %v14630_v10 }
 0x913   :  { %v8571_v42 = vpack.c.bf16 %v8564_v62, %v8557_v22  ;;  %v8791_v22 = vrot.slane %v8774_v56, %v14811_v12 }
 0x914   :  { %v8572_v5 = vpack.c.bf16 %v8565_v3, %v8558_v63 }
 0x916   :  { %9917 = vmatprep.mubr.bf16.mxu0 %v8572_v5  ;;  %10089 = vmatprep.mubr.bf16.mxu1 %v8572_v5 }
 0x917   :  { %9918 = vmatmul.mubr.bf16.vlgmr.msra.gmra.mrb[52].mxu0 %v8571_v42  ;;  %10090 = vmatmul.mubr.bf16.vlgmr.msra.gmra.mrb[48].mxu1 %v8571_v42 }
 0x918   :  { %9929 = vmatpush1.bf16.msra.mxu0 %v14087_v25  ;;  %10101 = vmatpush1.bf16.msra.mxu1 %v14090_v26 }
 0x919   :  { %9930 = vmatprep.subr.bf16.mxu0 %v14095_v47  ;;  %10102 = vmatprep.subr.bf16.mxu1 %v14098_v23 }
 0x91a   :  { %9960 = vmatprep.mubr.bf16.mxu0 %v14363_v0  ;;  %10132 = vmatprep.mubr.bf16.mxu1 %v14363_v0 }
 0x91c   :  { %9931 = vmatpush1.bf16.msra.mxu0 %v14093_v11  ;;  %10103 = vmatpush1.bf16.msra.mxu1 %v14096_v13 }
 0x91d   :  { %10470 = vmatprep.subr.bf16.mxu0 %v14101_v14  ;;  %10675 = vmatprep.subr.bf16.mxu1 %v14363_v0 }
 0x923   :  { %11953 = vmatmul.mubr.msk.bf16.vlgmr.msra.gmra.mrb[52].mxu0 %vm4928_vm3, %v16557_v60  ;;  %11954 = vmatmul.mubr.msk.bf16.vlgmr.msra.gmra.mrb[48].mxu1 %vm4928_vm3, %v16557_v60  ;;  %v14119_v60 = vld [vmem:[#allocation10 + $0x64] ss:$8 sps:$4 sm:$0xff]  }
 0x924   :  { %10471 = vmatpush1.bf16.msra.mxu0 %v14099_v20  ;;  %10676 = vmatpush1.bf16.msra.mxu1 %v14174_v6  ;;  %v14185_v6 = vld [vmem:[#allocation11 + $0x58] sm:$0xff]  }
 0x925   :  { %10472 = vmatprep.subr.bf16.mxu0 %v14104_v21  ;;  %10677 = vmatprep.subr.bf16.mxu1 %v14363_v0 }
 0x928   :  { %10473 = vmatpush1.bf16.msra.mxu0 %v14102_v54  ;;  %10678 = vmatpush1.bf16.msra.mxu1 %v14175_v1  ;;  %v14186_v1 = vld [vmem:[#allocation11 + $0x60] ss:$0 sps:$4 sm:$0xff]  }
 0x929   :  { %10474 = vmatprep.subr.bf16.mxu0 %v14107_v16  ;;  %10679 = vmatprep.subr.bf16.mxu1 %v14363_v0 }
 0x92c   :  { %10475 = vmatpush1.bf16.msra.mxu0 %v14105_v17  ;;  %10680 = vmatpush1.bf16.msra.mxu1 %v14176_v48  ;;  %v10673_v48 = vsel %vm478_vm0, %v14186_v1, 0 }
 0x92d   :  { %10476 = vmatprep.subr.bf16.mxu0 %v14110_v18  ;;  %10681 = vmatprep.subr.bf16.mxu1 %v14363_v0 }
 0x930   :  { %10477 = vmatpush1.bf16.msra.mxu0 %v14108_v15  ;;  %10682 = vmatpush1.bf16.msra.mxu1 %v14177_v49  ;;  %v10205_v49 = vld [vmem:[%s16790_s18] sm:$0x3] }
 0x931   :  { %10478 = vmatprep.subr.bf16.mxu0 %v14113_v19  ;;  %10683 = vmatprep.subr.bf16.mxu1 %v14363_v0 }
 0x934   :  { %10479 = vmatpush1.bf16.msra.mxu0 %v14111_v24  ;;  %10684 = vmatpush1.bf16.msra.mxu1 %v14178_v31  ;;  %v10210_v31 = vrot.slane %v10205_v49, %v14627_v9  ;;  %v12006_v9 = vld [vmem:[%s16815_s19] ss:$0 sm:$0xff] }
 0x935   :  { %10480 = vmatprep.subr.bf16.mxu0 %v14116_v28  ;;  %10685 = vmatprep.subr.bf16.mxu1 %v14363_v0 }
 0x938   :  { %10481 = vmatpush1.bf16.msra.mxu0 %v14114_v29  ;;  %10686 = vmatpush1.bf16.msra.mxu1 %v14179_v51  ;;  %v10214_v51 = vrot.slane %v10205_v49, %v14630_v10 }
 0x939   :  { %10482 = vmatprep.subr.bf16.mxu0 %v14119_v60  ;;  %10687 = vmatprep.subr.bf16.mxu1 %v14363_v0 }
 0x93c   :  { %10483 = vmatpush1.bf16.msra.mxu0 %v14117_v7  ;;  %10688 = vmatpush1.bf16.msra.mxu1 %v14180_v52 }
 0x93d   :  { %10484 = vmatprep.subr.bf16.mxu0 %v14122_v30  ;;  %10689 = vmatprep.subr.bf16.mxu1 %v14363_v0 }
 0x940   :  { %10485 = vmatpush1.bf16.msra.mxu0 %v14120_v44  ;;  %10690 = vmatpush1.bf16.msra.mxu1 %v14181_v4  ;;  %v14147_v44 = vld [vmem:[#allocation10 + $0x100] ss:$8 sps:$4 sm:$0xff]  }
 0x941   :  { %10486 = vmatprep.subr.bf16.mxu0 %v14125_v32  ;;  %10691 = vmatprep.subr.bf16.mxu1 %v14363_v0  ;;  %v14152_v32 = vld [vmem:[#allocation10 + $0x114] ss:$8 sps:$4 sm:$0xff]  }
 0x944   :  { %10487 = vmatpush1.bf16.msra.mxu0 %v14123_v39  ;;  %10692 = vmatpush1.bf16.msra.mxu1 %v14182_v2  ;;  %v14150_v39 = vld [vmem:[#allocation10 + $0x110] ss:$8 sps:$4 sm:$0xff]  }
 0x945   :  { %10488 = vmatprep.subr.bf16.mxu0 %v14128_v33  ;;  %10693 = vmatprep.subr.bf16.mxu1 %v14363_v0  ;;  %v14155_v33 = vld [vmem:[#allocation10 + $0x124] ss:$8 sps:$4 sm:$0xff]  }
 0x948   :  { %10489 = vmatpush1.bf16.msra.mxu0 %v14126_v34  ;;  %10694 = vmatpush1.bf16.msra.mxu1 %v14183_v53  ;;  %v14153_v34 = vld [vmem:[#allocation10 + $0x120] ss:$8 sps:$4 sm:$0xff]  }
 0x949   :  { %10490 = vmatprep.subr.bf16.mxu0 %v14131_v35  ;;  %10695 = vmatprep.subr.bf16.mxu1 %v14363_v0  ;;  %v14158_v35 = vld [vmem:[#allocation10 + $0x134] ss:$8 sps:$4 sm:$0xff]  }
 0x94c   :  { %10491 = vmatpush1.bf16.msra.mxu0 %v14129_v59  ;;  %v14156_v59 = vld [vmem:[#allocation10 + $0x130] ss:$8 sps:$4 sm:$0xff]  }
 0x94d   :  { %10492 = vmatprep.subr.bf16.mxu0 %v14134_v27  ;;  %v14161_v27 = vld [vmem:[#allocation10 + $0x144] ss:$8 sps:$4 sm:$0xff]  }
 0x950   :  { %10493 = vmatpush1.bf16.msra.mxu0 %v14132_v36  ;;  %v14159_v36 = vld [vmem:[#allocation10 + $0x140] ss:$8 sps:$4 sm:$0xff]  }
 0x951   :  { %10494 = vmatprep.subr.bf16.mxu0 %v14137_v55  ;;  %v14164_v55 = vld [vmem:[#allocation10 + $0x154] ss:$8 sps:$4 sm:$0xff]  }
 0x954   :  { %10495 = vmatpush1.bf16.msra.mxu0 %v14135_v50  ;;  %v14162_v50 = vld [vmem:[#allocation10 + $0x150] ss:$8 sps:$4 sm:$0xff]  }
 0x955   :  { %10496 = vmatprep.subr.bf16.mxu0 %v14140_v38  ;;  %v14167_v38 = vld [vmem:[#allocation10 + $0x164] ss:$8 sps:$4 sm:$0xff]  }
 0x958   :  { %10497 = vmatpush1.bf16.msra.mxu0 %v14138_v40  ;;  %v14165_v40 = vld [vmem:[#allocation10 + $0x160] ss:$8 sps:$4 sm:$0xff]  }
 0x959   :  { %10498 = vmatprep.subr.bf16.mxu0 %v14143_v43  ;;  %v14170_v43 = vld [vmem:[#allocation10 + $0x174] ss:$8 sps:$4 sm:$0xff]  }
 0x95c   :  { %10499 = vmatpush1.bf16.msra.mxu0 %v14141_v37  ;;  %v14168_v37 = vld [vmem:[#allocation10 + $0x170] ss:$8 sps:$4 sm:$0xff]  }
 0x95d   :  { %10500 = vmatprep.subr.bf16.mxu0 %v14146_v41  ;;  %v14173_v41 = vld [vmem:[#allocation10 + $0x184] ss:$8 sps:$4 sm:$0xff]  }
 0x960   :  { %10501 = vmatpush1.bf16.msra.mxu0 %v14144_v45  ;;  %v14171_v45 = vld [vmem:[#allocation10 + $0x180] ss:$8 sps:$4 sm:$0xff]  }
 0x961   :  { %10513 = vmatprep.subr.bf16.mxu0 %v14149_v46  ;;  %v14184_v46 = vld [vmem:[#allocation11 + $0x50] sm:$0xff]  }
 0x962   :  { %10696 = vmatpush1.bf16.msra.mxu1 %v14184_v46 }
 0x963   :  { %10697 = vmatprep.subr.bf16.mxu1 %v14363_v0 }
 0x966   :  { %10698 = vmatpush1.bf16.msra.mxu1 %v14185_v6 }
 0x967   :  { %10699 = vmatprep.subr.bf16.mxu1 %v14363_v0 }
 0x96a   :  { %10700 = vmatpush1.bf16.msra.mxu1 %v10673_v48 }
 0x9f6   :  { %v9962_v62 = vpop.f32.mrb[52].mxu0  ;;  %v10134_v63 = vpop.f32.mrb[48].mxu1 }
 0x9f7   :  { %v12237_v3 = vadd.f32 %v9962_v62, %v8779_v57  ;;  %v12241_v42 = vadd.f32 %v10134_v63, %v8787_v58  ;;  %v9964_v5 = vpop.f32.mrb[53].mxu0  ;;  %v10136_v25 = vpop.f32.mrb[49].mxu1 }
 0x9f8   :  { %v12238_v26 = vadd.f32 %v9964_v5, %v8783_v61  ;;  %v12242_v47 = vadd.f32 %v10136_v25, %v8791_v22  ;;  %v9966_v23 = vpop.f32.mrb[54].mxu0  ;;  %v10138_v11 = vpop.f32.mrb[50].mxu1 }
 0x9f9   :  { %v12239_v13 = vadd.f32 %v9966_v23, %v8779_v57  ;;  %v12243_v14 = vadd.f32 %v10138_v11, %v8787_v58  ;;  %v9968_v20 = vpop.f32.mrb[55].mxu0  ;;  %v10140_v21 = vpop.f32.mrb[51].mxu1  ;;  %v10143_v16 = vmax.f32 %v12237_v3, 0.0  ;;  %v10145_v17 = vmax.f32 %v12241_v42, 0.0 }
 0x9fa   :  { %v12240_v54 = vadd.f32 %v9968_v20, %v8783_v61  ;;  %v12244_v8 = vadd.f32 %v10140_v21, %v8791_v22  ;;  %v10144_v15 = vmax.f32 %v12238_v26, 0.0  ;;  %v10146_v19 = vmax.f32 %v12242_v47, 0.0 }
 0x9fb   :  { %v10147_v18 = vmax.f32 %v12239_v13, 0.0  ;;  %v10149_v12 = vmax.f32 %v12243_v14, 0.0 }
 0x9fc   :  { %v10148_v24 = vmax.f32 %v12240_v54, 0.0  ;;  %v10150_v28 = vmax.f32 %v12244_v8, 0.0 }
 0x9fd   :  { %v10151_v29 = vpack.c.bf16 %v10147_v18, %v10143_v16  ;;  %v10153_v60 = vpack.c.bf16 %v10149_v12, %v10145_v17 }
 0x9fe   :  { %v10152_v7 = vpack.c.bf16 %v10148_v24, %v10144_v15  ;;  %v10154_v30 = vpack.c.bf16 %v10150_v28, %v10146_v19 }
 0xa00   :  { %10502 = vmatprep.mubr.bf16.mxu0 %v10152_v7 }
 0xa01   :  { %10503 = vmatmul.mubr.bf16.vlgmr.msra.gmra.mrb[56].mxu0 %v10151_v29 }
 0xa02   :  { %10514 = vmatpush1.bf16.msra.mxu0 %v14147_v44  ;;  %12005 = vmatprep.mubr.msk.bf16.mxu0 %vm2326_vm2, %v10154_v30 }
 0xa03   :  { %10515 = vmatprep.subr.bf16.mxu0 %v14152_v32 }
 0xa06   :  { %10516 = vmatpush1.bf16.msra.mxu0 %v14150_v39 }
 0xa07   :  { %10517 = vmatprep.subr.bf16.mxu0 %v14155_v33 }
 0xa0a   :  { %10518 = vmatpush1.bf16.msra.mxu0 %v14153_v34 }
 0xa0b   :  { %10519 = vmatprep.subr.bf16.mxu0 %v14158_v35 }
 0xa0e   :  { %10520 = vmatpush1.bf16.msra.mxu0 %v14156_v59 }
 0xa0f   :  { %10521 = vmatprep.subr.bf16.mxu0 %v14161_v27 }
 0xa12   :  { %10522 = vmatpush1.bf16.msra.mxu0 %v14159_v36 }
 0xa13   :  { %10523 = vmatprep.subr.bf16.mxu0 %v14164_v55 }
 0xa16   :  { %10524 = vmatpush1.bf16.msra.mxu0 %v14162_v50 }
 0xa17   :  { %10525 = vmatprep.subr.bf16.mxu0 %v14167_v38 }
 0xa1a   :  { %10526 = vmatpush1.bf16.msra.mxu0 %v14165_v40 }
 0xa1b   :  { %10527 = vmatprep.subr.bf16.mxu0 %v14170_v43 }
 0xa1e   :  { %10528 = vmatpush1.bf16.msra.mxu0 %v14168_v37 }
 0xa1f   :  { %10529 = vmatprep.subr.bf16.mxu0 %v14173_v41 }
 0xa22   :  { %10530 = vmatpush1.bf16.msra.mxu0 %v14171_v45 }
 0xa25   :  { %10546 = vmatmul.mubr.bf16.vlgmr.msra.gmra.mrb[56].mxu0 %v10153_v60 }
 0xaf8   :  { %v10547_v52 = vpop.f32.mrb[56].mxu0 }
 0xaf9   :  { %v12245_v4 = vadd.f32 %v10547_v52, %v10210_v31  ;;  %v10549_v2 = vpop.f32.mrb[57].mxu0 }
 0xafa   :  { %v12246_v53 = vadd.f32 %v10549_v2, %v10214_v51  ;;  %v10551_v56 = vpop.f32.mrb[58].mxu0 }
 0xafb   :  { %v12247_v57 = vadd.f32 %v10551_v56, %v10210_v31  ;;  %v10553_v58 = vpop.f32.mrb[59].mxu0  ;;  %v10556_v61 = vmax.f32 %v12245_v4, 0.0 }
 0xafc   :  { %v12248_v0 = vadd.f32 %v10553_v58, %v10214_v51  ;;  %v10557_v62 = vmax.f32 %v12246_v53, 0.0 }
 0xafd   :  { %v10558_v22 = vmax.f32 %v12247_v57, 0.0 }
 0xafe   :  { %v10559_v63 = vmax.f32 %v12248_v0, 0.0 }
 0xaff   :  { %v10560_v3 = vpack.c.bf16 %v10558_v22, %v10556_v61 }
 0xb00   :  { %v10561_v42 = vpack.c.bf16 %v10559_v63, %v10557_v62 }
 0xb02   :  { %12020 = vmatprep.mubr.msk.bf16.mxu1 %vm474_vm1, %v10561_v42 }
 0xb03   :  { %10708 = vmatmul.mubr.bf16.vlgmr.msra.gmra.mrb[52].mxu1 %v10560_v3 }
 0xbd6   :  { %v10709_v10 = vpop.f32.mrb[52].mxu1 }
 0xbd7   :  { %v10710_v5 = vadd.f32 %v12006_v9, %v10709_v10  ;;  %v10711_v25 = vpop.f32.mrb[53].mxu1 }
 0xbd8   :  { %v10712_v26 = vpop.f32.mrb[54].mxu1 }
 0xbd9   :  { %10716 = vst [vmem:[#allocation13] sm:$0xff] %v10710_v5  ;;  %v10713_v47 = vadd.f32 %v12006_v9, %v10712_v26  ;;  %v10714_v23 = vpop.f32.mrb[55].mxu1 }
 0xbdb   :  { %10717 = vst [vmem:[#allocation13 + $0x8] sm:$0xff] %v10713_v47 }
 0xbdc   :  { %14330 = shalt.err (!%p14327_p10)
}
 0xbdd   :  { %s16816_s24 = sld [smem:[#allocation26_spill]] }
 0xbe3   :  { %s14331_s3 = scalar_lea.hbm %s16816_s24, 256 }
 0xbe4   :  { %p14332_p11 = scmp.ne.s32.totalorder %s16816_s24, %s14331_s3  ;;  %p14335_p12 = scmp.lt.u32.totalorder %s14331_s3, %s16816_s24 }
 0xbe6   :  { %p14337_p13 = pnand %p14335_p12, %p14332_p11 }
 0xbe8   :  { %14340 = shalt.err (!%p14337_p13)
}
 0xbe9   :  { %10729 = dma.vmem_to_hbm [thread:$0]  %s10724_s28, 256, %s16816_s24, [#allocation4], %s14352_s22, %s14352_s22, %s14353_s23  }
 0xbea   :  { %14349 = dma.done.wait [#allocation4], 256  }
 0xbeb   :  { %14350 = vsyncadd [#allocation4], 4294967040 }
 0xbec   :  { %10733 = vsyncpa [#allocation3], 1 }
 0xbed   :  { %10734 = vsyncpa [#allocation6], 1 }
 0xbee   :  { %10735 = vsyncpa [#allocation9], 1 }
 0xbef   :  { %10736 = vsyncpa [#allocation12], 1 }
 0xbf0   :  { %10737 = vsyncpa [#allocation4], 1 }

</bundles_post_ra>
